<compile_context>
chip_gen: v7x
topology: tpu7x:2x2x1
jax: 0.10.0
libtpu: 0.0.40
codegen_flags: <defaults>
</compile_context>

<pallas_src>
import jax
import jax.numpy as jnp
from jax import lax
from jax.experimental import pallas as pl
from jax.experimental.pallas import tpu as pltpu


def _crit_kernel(mol_ids_ref, adj_ids_ref,
                 atom_w_ref, atom_b_ref, bond_w_ref, bond_b_ref,
                 w_big_ref, b_gcn_ref, out_w_ref, out_b_ref, out_ref):
    f32 = jnp.float32
    bf16 = jnp.bfloat16

    mol_ids = mol_ids_ref[...]                                     # [TB, N] int32
    adj_ids = adj_ids_ref[...]                                     # [TB, N, N] int32
    TB, N = mol_ids.shape
    A, E = atom_w_ref.shape
    S, C = bond_w_ref.shape
    L = w_big_ref.shape[0]

    # ---- masks (exact torch semantics) -----------------------------------
    # maskmol = mol.clamp(0,1).float().unsqueeze(2)
    maskmol = (mol_ids > 0).astype(f32)[:, :, None]                # [TB, N, 1]
    mm = maskmol[:, :, 0]                                          # [TB, N]
    eye = (lax.broadcasted_iota(jnp.int32, (N, N), 0)
           == lax.broadcasted_iota(jnp.int32, (N, N), 1)).astype(f32)
    # mask[b,i,j] = clamp(mm[b,i]*mm[b,j] - eye[i,j], 0, 1)
    mask = jnp.clip(mm[:, :, None] * mm[:, None, :] - eye[None], 0.0, 1.0)

    # ---- atom embedding: in-register one-hot, lookup on the MXU (bf16) -----
    atom_iota = lax.broadcasted_iota(jnp.int32, (1, 1, A), 2)
    mol_oh = (mol_ids[:, :, None] == atom_iota).astype(bf16).reshape(TB * N, A)
    mol_e = jnp.dot(mol_oh, atom_w_ref[...], preferred_element_type=f32)
    mol_e = (mol_e.reshape(TB, N, E) + atom_b_ref[...]) * maskmol  # [TB, N, E]

    # ---- bond embedding: one-hot + MXU lookup, then bias + mask ------------
    bond_iota = lax.broadcasted_iota(jnp.int32, (1, 1, 1, S), 3)
    adj_oh = (adj_ids[:, :, :, None] == bond_iota).astype(bf16).reshape(TB * N * N, S)
    adj_emb = jnp.dot(adj_oh, bond_w_ref[...], preferred_element_type=f32)
    adj_e = (adj_emb.reshape(TB, N, N, C) + bond_b_ref[...]) * mask[..., None]

    # ---- relational GCN stack (self.gcn) -----------------------------------
    # Per layer:  g[b,i,c,f] = sum_j adj_e[b,i,j,c] * h[b,j,f]  (N VPU FMAs)
    #             msg        = [g | h] @ w_big[l]               (one MXU dot)
    #             h          = tanh(msg + b) * maskmol
    h = mol_e
    for l in range(L):
        g = adj_e[:, :, 0, :, None] * h[:, 0, None, None, :]      # [TB,N,C,E]
        for j in range(1, N):
            g = g + adj_e[:, :, j, :, None] * h[:, j, None, None, :]
        big_in = jnp.concatenate(
            [g.reshape(TB * N, C * E), h.reshape(TB * N, E)], axis=1
        ).astype(bf16)                                             # [TB*N,(C+1)*E]
        msg = jnp.dot(big_in, w_big_ref[l], preferred_element_type=f32)
        h = jnp.tanh(msg.reshape(TB, N, E) + b_gcn_ref[l]) * maskmol

    # ---- readout: mean over nodes, 1-wide projection on the VPU, sigmoid ---
    pooled = jnp.mean(h, axis=1)                                   # [TB, E]
    logits = jnp.sum(pooled * out_w_ref[...], axis=-1, keepdims=True) + out_b_ref[...]
    out_ref[...] = jax.nn.sigmoid(logits)                          # [TB, 1]


def _pick_batch_tile(B, N, batch_tile):
    """Largest legal tile <= batch_tile dividing B; prefer >=2 grid steps."""
    best = B  # full-array block is always a legal block shape
    for tb in range(min(batch_tile, B), 0, -1):
        if B % tb == 0 and (tb == B or tb % 8 == 0):
            best = tb
            break
    # Keep >= 2 grid steps (megacore split on v7x, pipeline overlap elsewhere)
    # when it does not drop the MXU M-fill (tb*N) below ~128 rows.
    if B // best < 2:
        for tb in range(best // 2, 0, -1):
            if B % tb == 0 and tb % 8 == 0 and tb * N >= 128:
                best = tb
                break
    return best


def init_params(key, atom_size, bond_size, emb=32, bond_emb=8, layers=2):
    """Deterministic synthetic parameters (shapes from Crit.__init__)."""
    ks = jax.random.split(key, 5)
    s = 0.1
    return dict(
        atom_w=s * jax.random.normal(ks[0], (atom_size, emb), jnp.float32),
        atom_b=jnp.zeros((1, emb), jnp.float32),
        bond_w=s * jax.random.normal(ks[1], (bond_size, bond_emb), jnp.float32),
        bond_b=jnp.zeros((1, bond_emb), jnp.float32),
        w_rel=s * jax.random.normal(ks[2], (layers, bond_emb, emb, emb), jnp.float32),
        w_self=s * jax.random.normal(ks[3], (layers, emb, emb), jnp.float32),
        b_gcn=jnp.zeros((layers, 1, emb), jnp.float32),
        out_w=s * jax.random.normal(ks[4], (emb, 1), jnp.float32),
        out_b=jnp.zeros((1, 1), jnp.float32),
    )


def crit_forward(params, mol_ids, adj_ids, *, batch_tile=128):
    B, N = mol_ids.shape
    layers, C, E, _ = params['w_rel'].shape
    A = params['atom_w'].shape[0]
    S = params['bond_w'].shape[0]

    tb = _pick_batch_tile(B, N, batch_tile)
    grid = (B // tb,)

    # Host-side weight fusion (K-stacked), pre-cast to bf16 for the MXU:
    #   w_big[l, c*E + f, e] = w_rel[l, c, f, e]   rows 0 .. C*E-1   (relation)
    #   w_big[l, C*E + f, e] = w_self[l, f, e]     rows C*E .. (C+1)*E-1 (self)
    w_big = jnp.concatenate(
        [params['w_rel'].reshape(layers, C * E, E), params['w_self']], axis=1
    ).astype(jnp.bfloat16)
    atom_w = params['atom_w'].astype(jnp.bfloat16)
    bond_w = params['bond_w'].astype(jnp.bfloat16)

    def resident(shape):
        # Whole-array block pinned in VMEM across the batch grid.
        return pl.BlockSpec(shape, lambda i, _n=len(shape): (0,) * _n)

    return pl.pallas_call(
        _crit_kernel,
        out_shape=jax.ShapeDtypeStruct((B, 1), jnp.float32),
        grid=grid,
        in_specs=[
            pl.BlockSpec((tb, N), lambda i: (i, 0)),               # mol ids tile
            pl.BlockSpec((tb, N, N), lambda i: (i, 0, 0)),         # adj ids tile
            resident((A, E)),                                      # atom table (bf16)
            resident((1, E)),                                      # atom bias
            resident((S, C)),                                      # bond table (bf16)
            resident((1, C)),                                      # bond bias
            resident((layers, (C + 1) * E, E)),                    # fused W (bf16)
            resident((layers, 1, E)),                              # gcn bias
            resident((1, E)),                                      # out W (transposed)
            resident((1, 1)),                                      # out b
        ],
        out_specs=pl.BlockSpec((tb, 1), lambda i: (i, 0)),
        compiler_params=pltpu.CompilerParams(
            dimension_semantics=("parallel",),
            vmem_limit_bytes=48 * 1024 * 1024,
        ),
    )(mol_ids.astype(jnp.int32), adj_ids.astype(jnp.int32),
      atom_w, params['atom_b'], bond_w, params['bond_b'],
      w_big, params['b_gcn'],
      params['out_w'].T, params['out_b'])


def crit_reference(params, mol_ids, adj_ids):
    """Pure-JAX f32 reference with the un-fused per-channel GCN formulation."""
    layers, C, E, _ = params['w_rel'].shape
    N = mol_ids.shape[1]
    maskmol = jnp.clip(mol_ids, 0, 1).astype(jnp.float32)[:, :, None]
    mm = maskmol[:, :, 0]
    mask = jnp.clip(mm[:, :, None] * mm[:, None, :]
                    - jnp.eye(N, dtype=jnp.float32)[None], 0.0, 1.0)
    mol_oh = jax.nn.one_hot(mol_ids, params['atom_w'].shape[0], dtype=jnp.float32)
    adj_oh = jax.nn.one_hot(adj_ids, params['bond_w'].shape[0], dtype=jnp.float32)
    mol_e = (mol_oh @ params['atom_w'] + params['atom_b']) * maskmol
    adj_e = (jnp.einsum('bijs,sc->bijc', adj_oh, params['bond_w'])
             + params['bond_b']) * mask[..., None]
    h = mol_e
    for l in range(layers):
        msg = jnp.einsum('bne,ef->bnf', h, params['w_self'][l])
        for c in range(C):
            hc = jnp.einsum('bne,ef->bnf', h, params['w_rel'][l, c])
            msg = msg + jnp.einsum('bij,bje->bie', adj_e[:, :, :, c], hc)
        h = jnp.tanh(msg + params['b_gcn'][l]) * maskmol
    pooled = h.mean(axis=1)
    return jax.nn.sigmoid(pooled @ params['out_w'] + params['out_b'])


if __name__ == "__main__":
    # config: atom_size=10, bond_size=5, dis_layers=2, emb_size=32, bond_emb_size=8
    ATOM_SIZE, BOND_SIZE, LAYERS, EMB, BOND_EMB = 10, 5, 2, 32, 8
    B, N = 2, 8

    key = jax.random.PRNGKey(0)
    k_mol, k_adj, k_par, k_mol2, k_adj2 = jax.random.split(key, 5)
    mol = jax.random.randint(k_mol, (B, N), 0, ATOM_SIZE, dtype=jnp.int32)
    adj = jax.random.randint(k_adj, (B, N, N), 0, BOND_SIZE, dtype=jnp.int32)
    params = init_params(k_par, ATOM_SIZE, BOND_SIZE, EMB, BOND_EMB, LAYERS)

    out = jax.block_until_ready(crit_forward(params, mol, adj))
    assert out.shape == (B, 1) and out.dtype == jnp.float32
    ref = jax.block_until_ready(crit_reference(params, mol, adj))
    assert jnp.allclose(out, ref, atol=2e-3, rtol=2e-3), (out, ref)

    # Second check with a batch large enough to exercise a multi-step grid.
    B2 = 32
    mol2 = jax.random.randint(k_mol2, (B2, N), 0, ATOM_SIZE, dtype=jnp.int32)
    adj2 = jax.random.randint(k_adj2, (B2, N, N), 0, BOND_SIZE, dtype=jnp.int32)
    out2 = jax.block_until_ready(crit_forward(params, mol2, adj2))
    ref2 = jax.block_until_ready(crit_reference(params, mol2, adj2))
    assert jnp.allclose(out2, ref2, atol=2e-3, rtol=2e-3), (out2, ref2)

    print("KERNEL_OK")
</pallas_src>

<mosaic_0001>
module attributes {stable_mosaic.version = 11 : i64} {
  func.func @_crit_kernel(%arg0: i32, %arg1: memref<2x8xi32, #tpu.memory_space<vmem>>, %arg2: memref<2x8x8xi32, #tpu.memory_space<vmem>>, %arg3: memref<10x32xbf16, #tpu.memory_space<vmem>>, %arg4: memref<1x32xf32, #tpu.memory_space<vmem>>, %arg5: memref<5x8xbf16, #tpu.memory_space<vmem>>, %arg6: memref<1x8xf32, #tpu.memory_space<vmem>>, %arg7: memref<2x288x32xbf16, #tpu.memory_space<vmem>>, %arg8: memref<2x1x32xf32, #tpu.memory_space<vmem>>, %arg9: memref<1x32xf32, #tpu.memory_space<vmem>>, %arg10: memref<1x1xf32, #tpu.memory_space<vmem>>, %arg11: memref<2x1xf32, #tpu.memory_space<vmem>>) attributes {dimension_semantics = [#tpu.dimension_semantics<parallel>], iteration_bounds = array<i64: 1>, scalar_prefetch = 0 : i64, scratch_operands = 0 : i64, tpu.core_type = #tpu.core_type<tc>, window_params = [{transform_indices = @transform_0, window_bounds = array<i64: 2, 8>}, {transform_indices = @transform_1, window_bounds = array<i64: 2, 8, 8>}, {pipeline_mode = #tpu.pipeline_mode<synchronous>, transform_indices = @transform_2, window_bounds = array<i64: 10, 32>}, {pipeline_mode = #tpu.pipeline_mode<synchronous>, transform_indices = @transform_3, window_bounds = array<i64: 1, 32>}, {pipeline_mode = #tpu.pipeline_mode<synchronous>, transform_indices = @transform_4, window_bounds = array<i64: 5, 8>}, {pipeline_mode = #tpu.pipeline_mode<synchronous>, transform_indices = @transform_5, window_bounds = array<i64: 1, 8>}, {pipeline_mode = #tpu.pipeline_mode<synchronous>, transform_indices = @transform_6, window_bounds = array<i64: 2, 288, 32>}, {pipeline_mode = #tpu.pipeline_mode<synchronous>, transform_indices = @transform_7, window_bounds = array<i64: 2, 1, 32>}, {pipeline_mode = #tpu.pipeline_mode<synchronous>, transform_indices = @transform_8, window_bounds = array<i64: 1, 32>}, {pipeline_mode = #tpu.pipeline_mode<synchronous>, transform_indices = @transform_9, window_bounds = array<i64: 1, 1>}, {transform_indices = @transform_10, window_bounds = array<i64: 2, 1>}]} {
    %c0 = arith.constant 0 : index
    %c0_0 = arith.constant 0 : index
    %0 = vector.load %arg1[%c0, %c0_0] : memref<2x8xi32, #tpu.memory_space<vmem>>, vector<2x8xi32>
    %c0_1 = arith.constant 0 : index
    %c0_2 = arith.constant 0 : index
    %c0_3 = arith.constant 0 : index
    %1 = vector.load %arg2[%c0_1, %c0_2, %c0_3] : memref<2x8x8xi32, #tpu.memory_space<vmem>>, vector<2x8x8xi32>
    %c0_i32 = arith.constant 0 : i32
    %2 = vector.broadcast %c0_i32 : i32 to vector<2x8xi32>
    %3 = arith.cmpi sgt, %0, %2 : vector<2x8xi32>
    %4 = arith.extui %3 : vector<2x8xi1> to vector<2x8xi32>
    %5 = arith.sitofp %4 : vector<2x8xi32> to vector<2x8xf32>
    %6 = vector.shape_cast %5 : vector<2x8xf32> to vector<2x8x1xf32>
    %7 = vector.shape_cast %6 : vector<2x8x1xf32> to vector<2x8xf32>
    %8 = tpu.iota {dimensions = array<i32: 0>} : vector<8x8xi32>
    %9 = tpu.iota {dimensions = array<i32: 1>} : vector<8x8xi32>
    %10 = arith.cmpi eq, %8, %9 : vector<8x8xi32>
    %11 = arith.extui %10 : vector<8x8xi1> to vector<8x8xi32>
    %12 = arith.sitofp %11 : vector<8x8xi32> to vector<8x8xf32>
    %13 = vector.shape_cast %7 : vector<2x8xf32> to vector<2x8x1xf32>
    %14 = vector.shape_cast %7 : vector<2x8xf32> to vector<2x1x8xf32>
    %15 = vector.broadcast %13 : vector<2x8x1xf32> to vector<2x8x8xf32>
    %16 = vector.broadcast %14 : vector<2x1x8xf32> to vector<2x8x8xf32>
    %17 = arith.mulf %15, %16 : vector<2x8x8xf32>
    %18 = vector.shape_cast %12 : vector<8x8xf32> to vector<1x8x8xf32>
    %19 = vector.broadcast %18 : vector<1x8x8xf32> to vector<2x8x8xf32>
    %20 = arith.subf %17, %19 : vector<2x8x8xf32>
    %cst = arith.constant 0.000000e+00 : f32
    %cst_4 = arith.constant 1.000000e+00 : f32
    %21 = vector.broadcast %cst : f32 to vector<2x8x8xf32>
    %22 = arith.maximumf %21, %20 : vector<2x8x8xf32>
    %23 = vector.broadcast %cst_4 : f32 to vector<2x8x8xf32>
    %24 = arith.minimumf %23, %22 : vector<2x8x8xf32>
    %25 = tpu.iota {dimensions = array<i32: 2>} : vector<1x1x10xi32>
    %26 = vector.shape_cast %0 : vector<2x8xi32> to vector<2x8x1xi32>
    %27 = vector.broadcast %26 : vector<2x8x1xi32> to vector<2x8x10xi32>
    %28 = vector.broadcast %25 : vector<1x1x10xi32> to vector<2x8x10xi32>
    %29 = arith.cmpi eq, %27, %28 : vector<2x8x10xi32>
    %30 = arith.extui %29 : vector<2x8x10xi1> to vector<2x8x10xi32>
    %31 = arith.sitofp %30 : vector<2x8x10xi32> to vector<2x8x10xf32>
    %32 = arith.truncf %31 : vector<2x8x10xf32> to vector<2x8x10xbf16>
    %33 = vector.shape_cast %32 : vector<2x8x10xbf16> to vector<16x10xbf16>
    %c0_5 = arith.constant 0 : index
    %c0_6 = arith.constant 0 : index
    %34 = vector.load %arg3[%c0_5, %c0_6] : memref<10x32xbf16, #tpu.memory_space<vmem>>, vector<10x32xbf16>
    %cst_7 = arith.constant dense<0.000000e+00> : vector<16x32xf32>
    %35 = tpu.matmul %33, %34, %cst_7 {dimension_numbers = #tpu.dot_dimension_numbers<[1], [0], [0], [1], [0, 0, 1, 1], [], []>} : vector<16x10xbf16>, vector<10x32xbf16>, vector<16x32xf32> -> vector<16x32xf32>
    %36 = vector.shape_cast %35 : vector<16x32xf32> to vector<2x8x32xf32>
    %c0_8 = arith.constant 0 : index
    %c0_9 = arith.constant 0 : index
    %37 = vector.load %arg4[%c0_8, %c0_9] : memref<1x32xf32, #tpu.memory_space<vmem>>, vector<1x32xf32>
    %38 = vector.shape_cast %37 : vector<1x32xf32> to vector<1x1x32xf32>
    %39 = vector.broadcast %38 : vector<1x1x32xf32> to vector<2x8x32xf32>
    %40 = arith.addf %36, %39 : vector<2x8x32xf32>
    %41 = vector.broadcast %6 : vector<2x8x1xf32> to vector<2x8x32xf32>
    %42 = arith.mulf %40, %41 : vector<2x8x32xf32>
    %43 = tpu.iota {dimensions = array<i32: 3>} : vector<1x1x1x5xi32>
    %44 = vector.shape_cast %1 : vector<2x8x8xi32> to vector<2x8x8x1xi32>
    %45 = vector.broadcast %44 : vector<2x8x8x1xi32> to vector<2x8x8x5xi32>
    %46 = vector.broadcast %43 : vector<1x1x1x5xi32> to vector<2x8x8x5xi32>
    %47 = arith.cmpi eq, %45, %46 : vector<2x8x8x5xi32>
    %48 = arith.extui %47 : vector<2x8x8x5xi1> to vector<2x8x8x5xi32>
    %49 = arith.sitofp %48 : vector<2x8x8x5xi32> to vector<2x8x8x5xf32>
    %50 = arith.truncf %49 : vector<2x8x8x5xf32> to vector<2x8x8x5xbf16>
    %51 = vector.shape_cast %50 : vector<2x8x8x5xbf16> to vector<128x5xbf16>
    %c0_10 = arith.constant 0 : index
    %c0_11 = arith.constant 0 : index
    %52 = vector.load %arg5[%c0_10, %c0_11] : memref<5x8xbf16, #tpu.memory_space<vmem>>, vector<5x8xbf16>
    %cst_12 = arith.constant dense<0.000000e+00> : vector<128x8xf32>
    %53 = tpu.matmul %51, %52, %cst_12 {dimension_numbers = #tpu.dot_dimension_numbers<[1], [0], [0], [1], [0, 0, 1, 1], [], []>} : vector<128x5xbf16>, vector<5x8xbf16>, vector<128x8xf32> -> vector<128x8xf32>
    %54 = vector.shape_cast %53 : vector<128x8xf32> to vector<2x8x8x8xf32>
    %c0_13 = arith.constant 0 : index
    %c0_14 = arith.constant 0 : index
    %55 = vector.load %arg6[%c0_13, %c0_14] : memref<1x8xf32, #tpu.memory_space<vmem>>, vector<1x8xf32>
    %56 = vector.shape_cast %55 : vector<1x8xf32> to vector<1x1x1x8xf32>
    %57 = vector.broadcast %56 : vector<1x1x1x8xf32> to vector<2x8x8x8xf32>
    %58 = arith.addf %54, %57 : vector<2x8x8x8xf32>
    %59 = vector.shape_cast %24 : vector<2x8x8xf32> to vector<2x8x8x1xf32>
    %60 = vector.broadcast %59 : vector<2x8x8x1xf32> to vector<2x8x8x8xf32>
    %61 = arith.mulf %58, %60 : vector<2x8x8x8xf32>
    %62 = vector.extract_strided_slice %61 {offsets = [0, 0, 0, 0], sizes = [2, 8, 1, 8], strides = [1, 1, 1, 1]} : vector<2x8x8x8xf32> to vector<2x8x1x8xf32>
    %63 = vector.shape_cast %62 : vector<2x8x1x8xf32> to vector<2x8x8xf32>
    %64 = vector.shape_cast %63 : vector<2x8x8xf32> to vector<2x8x8x1xf32>
    %65 = vector.extract_strided_slice %42 {offsets = [0, 0, 0], sizes = [2, 1, 32], strides = [1, 1, 1]} : vector<2x8x32xf32> to vector<2x1x32xf32>
    %66 = vector.shape_cast %65 : vector<2x1x32xf32> to vector<2x32xf32>
    %67 = vector.shape_cast %66 : vector<2x32xf32> to vector<2x1x1x32xf32>
    %68 = vector.broadcast %64 : vector<2x8x8x1xf32> to vector<2x8x8x32xf32>
    %69 = vector.broadcast %67 : vector<2x1x1x32xf32> to vector<2x8x8x32xf32>
    %70 = arith.mulf %68, %69 : vector<2x8x8x32xf32>
    %71 = vector.extract_strided_slice %61 {offsets = [0, 0, 1, 0], sizes = [2, 8, 1, 8], strides = [1, 1, 1, 1]} : vector<2x8x8x8xf32> to vector<2x8x1x8xf32>
    %72 = vector.shape_cast %71 : vector<2x8x1x8xf32> to vector<2x8x8xf32>
    %73 = vector.shape_cast %72 : vector<2x8x8xf32> to vector<2x8x8x1xf32>
    %74 = vector.extract_strided_slice %42 {offsets = [0, 1, 0], sizes = [2, 1, 32], strides = [1, 1, 1]} : vector<2x8x32xf32> to vector<2x1x32xf32>
    %75 = vector.shape_cast %74 : vector<2x1x32xf32> to vector<2x32xf32>
    %76 = vector.shape_cast %75 : vector<2x32xf32> to vector<2x1x1x32xf32>
    %77 = vector.broadcast %73 : vector<2x8x8x1xf32> to vector<2x8x8x32xf32>
    %78 = vector.broadcast %76 : vector<2x1x1x32xf32> to vector<2x8x8x32xf32>
    %79 = arith.mulf %77, %78 : vector<2x8x8x32xf32>
    %80 = arith.addf %70, %79 : vector<2x8x8x32xf32>
    %81 = vector.extract_strided_slice %61 {offsets = [0, 0, 2, 0], sizes = [2, 8, 1, 8], strides = [1, 1, 1, 1]} : vector<2x8x8x8xf32> to vector<2x8x1x8xf32>
    %82 = vector.shape_cast %81 : vector<2x8x1x8xf32> to vector<2x8x8xf32>
    %83 = vector.shape_cast %82 : vector<2x8x8xf32> to vector<2x8x8x1xf32>
    %84 = vector.extract_strided_slice %42 {offsets = [0, 2, 0], sizes = [2, 1, 32], strides = [1, 1, 1]} : vector<2x8x32xf32> to vector<2x1x32xf32>
    %85 = vector.shape_cast %84 : vector<2x1x32xf32> to vector<2x32xf32>
    %86 = vector.shape_cast %85 : vector<2x32xf32> to vector<2x1x1x32xf32>
    %87 = vector.broadcast %83 : vector<2x8x8x1xf32> to vector<2x8x8x32xf32>
    %88 = vector.broadcast %86 : vector<2x1x1x32xf32> to vector<2x8x8x32xf32>
    %89 = arith.mulf %87, %88 : vector<2x8x8x32xf32>
    %90 = arith.addf %80, %89 : vector<2x8x8x32xf32>
    %91 = vector.extract_strided_slice %61 {offsets = [0, 0, 3, 0], sizes = [2, 8, 1, 8], strides = [1, 1, 1, 1]} : vector<2x8x8x8xf32> to vector<2x8x1x8xf32>
    %92 = vector.shape_cast %91 : vector<2x8x1x8xf32> to vector<2x8x8xf32>
    %93 = vector.shape_cast %92 : vector<2x8x8xf32> to vector<2x8x8x1xf32>
    %94 = vector.extract_strided_slice %42 {offsets = [0, 3, 0], sizes = [2, 1, 32], strides = [1, 1, 1]} : vector<2x8x32xf32> to vector<2x1x32xf32>
    %95 = vector.shape_cast %94 : vector<2x1x32xf32> to vector<2x32xf32>
    %96 = vector.shape_cast %95 : vector<2x32xf32> to vector<2x1x1x32xf32>
    %97 = vector.broadcast %93 : vector<2x8x8x1xf32> to vector<2x8x8x32xf32>
    %98 = vector.broadcast %96 : vector<2x1x1x32xf32> to vector<2x8x8x32xf32>
    %99 = arith.mulf %97, %98 : vector<2x8x8x32xf32>
    %100 = arith.addf %90, %99 : vector<2x8x8x32xf32>
    %101 = vector.extract_strided_slice %61 {offsets = [0, 0, 4, 0], sizes = [2, 8, 1, 8], strides = [1, 1, 1, 1]} : vector<2x8x8x8xf32> to vector<2x8x1x8xf32>
    %102 = vector.shape_cast %101 : vector<2x8x1x8xf32> to vector<2x8x8xf32>
    %103 = vector.shape_cast %102 : vector<2x8x8xf32> to vector<2x8x8x1xf32>
    %104 = vector.extract_strided_slice %42 {offsets = [0, 4, 0], sizes = [2, 1, 32], strides = [1, 1, 1]} : vector<2x8x32xf32> to vector<2x1x32xf32>
    %105 = vector.shape_cast %104 : vector<2x1x32xf32> to vector<2x32xf32>
    %106 = vector.shape_cast %105 : vector<2x32xf32> to vector<2x1x1x32xf32>
    %107 = vector.broadcast %103 : vector<2x8x8x1xf32> to vector<2x8x8x32xf32>
    %108 = vector.broadcast %106 : vector<2x1x1x32xf32> to vector<2x8x8x32xf32>
    %109 = arith.mulf %107, %108 : vector<2x8x8x32xf32>
    %110 = arith.addf %100, %109 : vector<2x8x8x32xf32>
    %111 = vector.extract_strided_slice %61 {offsets = [0, 0, 5, 0], sizes = [2, 8, 1, 8], strides = [1, 1, 1, 1]} : vector<2x8x8x8xf32> to vector<2x8x1x8xf32>
    %112 = vector.shape_cast %111 : vector<2x8x1x8xf32> to vector<2x8x8xf32>
    %113 = vector.shape_cast %112 : vector<2x8x8xf32> to vector<2x8x8x1xf32>
    %114 = vector.extract_strided_slice %42 {offsets = [0, 5, 0], sizes = [2, 1, 32], strides = [1, 1, 1]} : vector<2x8x32xf32> to vector<2x1x32xf32>
    %115 = vector.shape_cast %114 : vector<2x1x32xf32> to vector<2x32xf32>
    %116 = vector.shape_cast %115 : vector<2x32xf32> to vector<2x1x1x32xf32>
    %117 = vector.broadcast %113 : vector<2x8x8x1xf32> to vector<2x8x8x32xf32>
    %118 = vector.broadcast %116 : vector<2x1x1x32xf32> to vector<2x8x8x32xf32>
    %119 = arith.mulf %117, %118 : vector<2x8x8x32xf32>
    %120 = arith.addf %110, %119 : vector<2x8x8x32xf32>
    %121 = vector.extract_strided_slice %61 {offsets = [0, 0, 6, 0], sizes = [2, 8, 1, 8], strides = [1, 1, 1, 1]} : vector<2x8x8x8xf32> to vector<2x8x1x8xf32>
    %122 = vector.shape_cast %121 : vector<2x8x1x8xf32> to vector<2x8x8xf32>
    %123 = vector.shape_cast %122 : vector<2x8x8xf32> to vector<2x8x8x1xf32>
    %124 = vector.extract_strided_slice %42 {offsets = [0, 6, 0], sizes = [2, 1, 32], strides = [1, 1, 1]} : vector<2x8x32xf32> to vector<2x1x32xf32>
    %125 = vector.shape_cast %124 : vector<2x1x32xf32> to vector<2x32xf32>
    %126 = vector.shape_cast %125 : vector<2x32xf32> to vector<2x1x1x32xf32>
    %127 = vector.broadcast %123 : vector<2x8x8x1xf32> to vector<2x8x8x32xf32>
    %128 = vector.broadcast %126 : vector<2x1x1x32xf32> to vector<2x8x8x32xf32>
    %129 = arith.mulf %127, %128 : vector<2x8x8x32xf32>
    %130 = arith.addf %120, %129 : vector<2x8x8x32xf32>
    %131 = vector.extract_strided_slice %61 {offsets = [0, 0, 7, 0], sizes = [2, 8, 1, 8], strides = [1, 1, 1, 1]} : vector<2x8x8x8xf32> to vector<2x8x1x8xf32>
    %132 = vector.shape_cast %131 : vector<2x8x1x8xf32> to vector<2x8x8xf32>
    %133 = vector.shape_cast %132 : vector<2x8x8xf32> to vector<2x8x8x1xf32>
    %134 = vector.extract_strided_slice %42 {offsets = [0, 7, 0], sizes = [2, 1, 32], strides = [1, 1, 1]} : vector<2x8x32xf32> to vector<2x1x32xf32>
    %135 = vector.shape_cast %134 : vector<2x1x32xf32> to vector<2x32xf32>
    %136 = vector.shape_cast %135 : vector<2x32xf32> to vector<2x1x1x32xf32>
    %137 = vector.broadcast %133 : vector<2x8x8x1xf32> to vector<2x8x8x32xf32>
    %138 = vector.broadcast %136 : vector<2x1x1x32xf32> to vector<2x8x8x32xf32>
    %139 = arith.mulf %137, %138 : vector<2x8x8x32xf32>
    %140 = arith.addf %130, %139 : vector<2x8x8x32xf32>
    %141 = vector.shape_cast %140 : vector<2x8x8x32xf32> to vector<16x256xf32>
    %142 = vector.shape_cast %42 : vector<2x8x32xf32> to vector<16x32xf32>
    %143 = tpu.concatenate %141, %142 in 1 : vector<16x256xf32>, vector<16x32xf32> -> vector<16x288xf32>
    %144 = arith.truncf %143 : vector<16x288xf32> to vector<16x288xbf16>
    %c0_15 = arith.constant 0 : index
    %c0_16 = arith.constant 0 : index
    %c0_17 = arith.constant 0 : index
    %145 = vector.load %arg7[%c0_15, %c0_16, %c0_17] : memref<2x288x32xbf16, #tpu.memory_space<vmem>>, vector<1x288x32xbf16>
    %146 = vector.shape_cast %145 : vector<1x288x32xbf16> to vector<288x32xbf16>
    %cst_18 = arith.constant dense<0.000000e+00> : vector<16x32xf32>
    %147 = tpu.matmul %144, %146, %cst_18 {dimension_numbers = #tpu.dot_dimension_numbers<[1], [0], [0], [1], [0, 0, 1, 1], [], []>} : vector<16x288xbf16>, vector<288x32xbf16>, vector<16x32xf32> -> vector<16x32xf32>
    %148 = vector.shape_cast %147 : vector<16x32xf32> to vector<2x8x32xf32>
    %c0_19 = arith.constant 0 : index
    %c0_20 = arith.constant 0 : index
    %c0_21 = arith.constant 0 : index
    %149 = vector.load %arg8[%c0_19, %c0_20, %c0_21] : memref<2x1x32xf32, #tpu.memory_space<vmem>>, vector<1x1x32xf32>
    %150 = vector.shape_cast %149 : vector<1x1x32xf32> to vector<1x32xf32>
    %151 = vector.shape_cast %150 : vector<1x32xf32> to vector<1x1x32xf32>
    %152 = vector.broadcast %151 : vector<1x1x32xf32> to vector<2x8x32xf32>
    %153 = arith.addf %148, %152 : vector<2x8x32xf32>
    %154 = math.tanh %153 : vector<2x8x32xf32>
    %155 = vector.broadcast %6 : vector<2x8x1xf32> to vector<2x8x32xf32>
    %156 = arith.mulf %154, %155 : vector<2x8x32xf32>
    %157 = vector.extract_strided_slice %61 {offsets = [0, 0, 0, 0], sizes = [2, 8, 1, 8], strides = [1, 1, 1, 1]} : vector<2x8x8x8xf32> to vector<2x8x1x8xf32>
    %158 = vector.shape_cast %157 : vector<2x8x1x8xf32> to vector<2x8x8xf32>
    %159 = vector.shape_cast %158 : vector<2x8x8xf32> to vector<2x8x8x1xf32>
    %160 = vector.extract_strided_slice %156 {offsets = [0, 0, 0], sizes = [2, 1, 32], strides = [1, 1, 1]} : vector<2x8x32xf32> to vector<2x1x32xf32>
    %161 = vector.shape_cast %160 : vector<2x1x32xf32> to vector<2x32xf32>
    %162 = vector.shape_cast %161 : vector<2x32xf32> to vector<2x1x1x32xf32>
    %163 = vector.broadcast %159 : vector<2x8x8x1xf32> to vector<2x8x8x32xf32>
    %164 = vector.broadcast %162 : vector<2x1x1x32xf32> to vector<2x8x8x32xf32>
    %165 = arith.mulf %163, %164 : vector<2x8x8x32xf32>
    %166 = vector.extract_strided_slice %61 {offsets = [0, 0, 1, 0], sizes = [2, 8, 1, 8], strides = [1, 1, 1, 1]} : vector<2x8x8x8xf32> to vector<2x8x1x8xf32>
    %167 = vector.shape_cast %166 : vector<2x8x1x8xf32> to vector<2x8x8xf32>
    %168 = vector.shape_cast %167 : vector<2x8x8xf32> to vector<2x8x8x1xf32>
    %169 = vector.extract_strided_slice %156 {offsets = [0, 1, 0], sizes = [2, 1, 32], strides = [1, 1, 1]} : vector<2x8x32xf32> to vector<2x1x32xf32>
    %170 = vector.shape_cast %169 : vector<2x1x32xf32> to vector<2x32xf32>
    %171 = vector.shape_cast %170 : vector<2x32xf32> to vector<2x1x1x32xf32>
    %172 = vector.broadcast %168 : vector<2x8x8x1xf32> to vector<2x8x8x32xf32>
    %173 = vector.broadcast %171 : vector<2x1x1x32xf32> to vector<2x8x8x32xf32>
    %174 = arith.mulf %172, %173 : vector<2x8x8x32xf32>
    %175 = arith.addf %165, %174 : vector<2x8x8x32xf32>
    %176 = vector.extract_strided_slice %61 {offsets = [0, 0, 2, 0], sizes = [2, 8, 1, 8], strides = [1, 1, 1, 1]} : vector<2x8x8x8xf32> to vector<2x8x1x8xf32>
    %177 = vector.shape_cast %176 : vector<2x8x1x8xf32> to vector<2x8x8xf32>
    %178 = vector.shape_cast %177 : vector<2x8x8xf32> to vector<2x8x8x1xf32>
    %179 = vector.extract_strided_slice %156 {offsets = [0, 2, 0], sizes = [2, 1, 32], strides = [1, 1, 1]} : vector<2x8x32xf32> to vector<2x1x32xf32>
    %180 = vector.shape_cast %179 : vector<2x1x32xf32> to vector<2x32xf32>
    %181 = vector.shape_cast %180 : vector<2x32xf32> to vector<2x1x1x32xf32>
    %182 = vector.broadcast %178 : vector<2x8x8x1xf32> to vector<2x8x8x32xf32>
    %183 = vector.broadcast %181 : vector<2x1x1x32xf32> to vector<2x8x8x32xf32>
    %184 = arith.mulf %182, %183 : vector<2x8x8x32xf32>
    %185 = arith.addf %175, %184 : vector<2x8x8x32xf32>
    %186 = vector.extract_strided_slice %61 {offsets = [0, 0, 3, 0], sizes = [2, 8, 1, 8], strides = [1, 1, 1, 1]} : vector<2x8x8x8xf32> to vector<2x8x1x8xf32>
    %187 = vector.shape_cast %186 : vector<2x8x1x8xf32> to vector<2x8x8xf32>
    %188 = vector.shape_cast %187 : vector<2x8x8xf32> to vector<2x8x8x1xf32>
    %189 = vector.extract_strided_slice %156 {offsets = [0, 3, 0], sizes = [2, 1, 32], strides = [1, 1, 1]} : vector<2x8x32xf32> to vector<2x1x32xf32>
    %190 = vector.shape_cast %189 : vector<2x1x32xf32> to vector<2x32xf32>
    %191 = vector.shape_cast %190 : vector<2x32xf32> to vector<2x1x1x32xf32>
    %192 = vector.broadcast %188 : vector<2x8x8x1xf32> to vector<2x8x8x32xf32>
    %193 = vector.broadcast %191 : vector<2x1x1x32xf32> to vector<2x8x8x32xf32>
    %194 = arith.mulf %192, %193 : vector<2x8x8x32xf32>
    %195 = arith.addf %185, %194 : vector<2x8x8x32xf32>
    %196 = vector.extract_strided_slice %61 {offsets = [0, 0, 4, 0], sizes = [2, 8, 1, 8], strides = [1, 1, 1, 1]} : vector<2x8x8x8xf32> to vector<2x8x1x8xf32>
    %197 = vector.shape_cast %196 : vector<2x8x1x8xf32> to vector<2x8x8xf32>
    %198 = vector.shape_cast %197 : vector<2x8x8xf32> to vector<2x8x8x1xf32>
    %199 = vector.extract_strided_slice %156 {offsets = [0, 4, 0], sizes = [2, 1, 32], strides = [1, 1, 1]} : vector<2x8x32xf32> to vector<2x1x32xf32>
    %200 = vector.shape_cast %199 : vector<2x1x32xf32> to vector<2x32xf32>
    %201 = vector.shape_cast %200 : vector<2x32xf32> to vector<2x1x1x32xf32>
    %202 = vector.broadcast %198 : vector<2x8x8x1xf32> to vector<2x8x8x32xf32>
    %203 = vector.broadcast %201 : vector<2x1x1x32xf32> to vector<2x8x8x32xf32>
    %204 = arith.mulf %202, %203 : vector<2x8x8x32xf32>
    %205 = arith.addf %195, %204 : vector<2x8x8x32xf32>
    %206 = vector.extract_strided_slice %61 {offsets = [0, 0, 5, 0], sizes = [2, 8, 1, 8], strides = [1, 1, 1, 1]} : vector<2x8x8x8xf32> to vector<2x8x1x8xf32>
    %207 = vector.shape_cast %206 : vector<2x8x1x8xf32> to vector<2x8x8xf32>
    %208 = vector.shape_cast %207 : vector<2x8x8xf32> to vector<2x8x8x1xf32>
    %209 = vector.extract_strided_slice %156 {offsets = [0, 5, 0], sizes = [2, 1, 32], strides = [1, 1, 1]} : vector<2x8x32xf32> to vector<2x1x32xf32>
    %210 = vector.shape_cast %209 : vector<2x1x32xf32> to vector<2x32xf32>
    %211 = vector.shape_cast %210 : vector<2x32xf32> to vector<2x1x1x32xf32>
    %212 = vector.broadcast %208 : vector<2x8x8x1xf32> to vector<2x8x8x32xf32>
    %213 = vector.broadcast %211 : vector<2x1x1x32xf32> to vector<2x8x8x32xf32>
    %214 = arith.mulf %212, %213 : vector<2x8x8x32xf32>
    %215 = arith.addf %205, %214 : vector<2x8x8x32xf32>
    %216 = vector.extract_strided_slice %61 {offsets = [0, 0, 6, 0], sizes = [2, 8, 1, 8], strides = [1, 1, 1, 1]} : vector<2x8x8x8xf32> to vector<2x8x1x8xf32>
    %217 = vector.shape_cast %216 : vector<2x8x1x8xf32> to vector<2x8x8xf32>
    %218 = vector.shape_cast %217 : vector<2x8x8xf32> to vector<2x8x8x1xf32>
    %219 = vector.extract_strided_slice %156 {offsets = [0, 6, 0], sizes = [2, 1, 32], strides = [1, 1, 1]} : vector<2x8x32xf32> to vector<2x1x32xf32>
    %220 = vector.shape_cast %219 : vector<2x1x32xf32> to vector<2x32xf32>
    %221 = vector.shape_cast %220 : vector<2x32xf32> to vector<2x1x1x32xf32>
    %222 = vector.broadcast %218 : vector<2x8x8x1xf32> to vector<2x8x8x32xf32>
    %223 = vector.broadcast %221 : vector<2x1x1x32xf32> to vector<2x8x8x32xf32>
    %224 = arith.mulf %222, %223 : vector<2x8x8x32xf32>
    %225 = arith.addf %215, %224 : vector<2x8x8x32xf32>
    %226 = vector.extract_strided_slice %61 {offsets = [0, 0, 7, 0], sizes = [2, 8, 1, 8], strides = [1, 1, 1, 1]} : vector<2x8x8x8xf32> to vector<2x8x1x8xf32>
    %227 = vector.shape_cast %226 : vector<2x8x1x8xf32> to vector<2x8x8xf32>
    %228 = vector.shape_cast %227 : vector<2x8x8xf32> to vector<2x8x8x1xf32>
    %229 = vector.extract_strided_slice %156 {offsets = [0, 7, 0], sizes = [2, 1, 32], strides = [1, 1, 1]} : vector<2x8x32xf32> to vector<2x1x32xf32>
    %230 = vector.shape_cast %229 : vector<2x1x32xf32> to vector<2x32xf32>
    %231 = vector.shape_cast %230 : vector<2x32xf32> to vector<2x1x1x32xf32>
    %232 = vector.broadcast %228 : vector<2x8x8x1xf32> to vector<2x8x8x32xf32>
    %233 = vector.broadcast %231 : vector<2x1x1x32xf32> to vector<2x8x8x32xf32>
    %234 = arith.mulf %232, %233 : vector<2x8x8x32xf32>
    %235 = arith.addf %225, %234 : vector<2x8x8x32xf32>
    %236 = vector.shape_cast %235 : vector<2x8x8x32xf32> to vector<16x256xf32>
    %237 = vector.shape_cast %156 : vector<2x8x32xf32> to vector<16x32xf32>
    %238 = tpu.concatenate %236, %237 in 1 : vector<16x256xf32>, vector<16x32xf32> -> vector<16x288xf32>
    %239 = arith.truncf %238 : vector<16x288xf32> to vector<16x288xbf16>
    %c1 = arith.constant 1 : index
    %c0_22 = arith.constant 0 : index
    %c0_23 = arith.constant 0 : index
    %240 = vector.load %arg7[%c1, %c0_22, %c0_23] : memref<2x288x32xbf16, #tpu.memory_space<vmem>>, vector<1x288x32xbf16>
    %241 = vector.shape_cast %240 : vector<1x288x32xbf16> to vector<288x32xbf16>
    %cst_24 = arith.constant dense<0.000000e+00> : vector<16x32xf32>
    %242 = tpu.matmul %239, %241, %cst_24 {dimension_numbers = #tpu.dot_dimension_numbers<[1], [0], [0], [1], [0, 0, 1, 1], [], []>} : vector<16x288xbf16>, vector<288x32xbf16>, vector<16x32xf32> -> vector<16x32xf32>
    %243 = vector.shape_cast %242 : vector<16x32xf32> to vector<2x8x32xf32>
    %c1_25 = arith.constant 1 : index
    %c0_26 = arith.constant 0 : index
    %c0_27 = arith.constant 0 : index
    %244 = vector.load %arg8[%c1_25, %c0_26, %c0_27] : memref<2x1x32xf32, #tpu.memory_space<vmem>>, vector<1x1x32xf32>
    %245 = vector.shape_cast %244 : vector<1x1x32xf32> to vector<1x32xf32>
    %246 = vector.shape_cast %245 : vector<1x32xf32> to vector<1x1x32xf32>
    %247 = vector.broadcast %246 : vector<1x1x32xf32> to vector<2x8x32xf32>
    %248 = arith.addf %243, %247 : vector<2x8x32xf32>
    %249 = math.tanh %248 : vector<2x8x32xf32>
    %250 = vector.broadcast %6 : vector<2x8x1xf32> to vector<2x8x32xf32>
    %251 = arith.mulf %249, %250 : vector<2x8x32xf32>
    %cst_28 = arith.constant dense<0.000000e+00> : vector<2x32xf32>
    %252 = vector.multi_reduction <add>, %251, %cst_28 [1] : vector<2x8x32xf32> to vector<2x32xf32>
    %cst_29 = arith.constant 8.000000e+00 : f32
    %253 = vector.broadcast %cst_29 : f32 to vector<2x32xf32>
    %254 = arith.divf %252, %253 : vector<2x32xf32>
    %c0_30 = arith.constant 0 : index
    %c0_31 = arith.constant 0 : index
    %255 = vector.load %arg9[%c0_30, %c0_31] : memref<1x32xf32, #tpu.memory_space<vmem>>, vector<1x32xf32>
    %256 = vector.broadcast %255 : vector<1x32xf32> to vector<2x32xf32>
    %257 = arith.mulf %254, %256 : vector<2x32xf32>
    %cst_32 = arith.constant dense<0.000000e+00> : vector<2xf32>
    %258 = vector.multi_reduction <add>, %257, %cst_32 [1] : vector<2x32xf32> to vector<2xf32>
    %259 = vector.shape_cast %258 : vector<2xf32> to vector<2x1xf32>
    %c0_33 = arith.constant 0 : index
    %c0_34 = arith.constant 0 : index
    %260 = vector.load %arg10[%c0_33, %c0_34] : memref<1x1xf32, #tpu.memory_space<vmem>>, vector<1x1xf32>
    %261 = vector.broadcast %260 : vector<1x1xf32> to vector<2x1xf32>
    %262 = arith.addf %259, %261 : vector<2x1xf32>
    %263 = arith.negf %262 : vector<2x1xf32>
    %264 = math.exp %263 : vector<2x1xf32>
    %cst_35 = arith.constant 1.000000e+00 : f32
    %265 = vector.broadcast %cst_35 : f32 to vector<2x1xf32>
    %266 = arith.addf %265, %264 : vector<2x1xf32>
    %267 = arith.divf %265, %266 : vector<2x1xf32>
    %c0_36 = arith.constant 0 : index
    %c0_37 = arith.constant 0 : index
    %268 = vector.load %arg11[%c0_36, %c0_37] : memref<2x1xf32, #tpu.memory_space<vmem>>, vector<2x1xf32>
    tpu.vector_store %arg11[%c0_36, %c0_37], %267 {strides = array<i32>} : memref<2x1xf32, #tpu.memory_space<vmem>>, vector<2x1xf32>,
    return
  }
  func.func @transform_0(%arg0: i32) -> (i32, i32) {
    %c0_i32 = arith.constant 0 : i32
    %c0_i32_0 = arith.constant 0 : i32
    return %arg0, %c0_i32 : i32, i32
  }
  func.func @transform_1(%arg0: i32) -> (i32, i32, i32) {
    %c0_i32 = arith.constant 0 : i32
    %c0_i32_0 = arith.constant 0 : i32
    %c0_i32_1 = arith.constant 0 : i32
    return %arg0, %c0_i32, %c0_i32_0 : i32, i32, i32
  }
  func.func @transform_2(%arg0: i32) -> (i32, i32) {
    %c0_i32 = arith.constant 0 : i32
    %c0_i32_0 = arith.constant 0 : i32
    %c0_i32_1 = arith.constant 0 : i32
    return %c0_i32, %c0_i32_0 : i32, i32
  }
  func.func @transform_3(%arg0: i32) -> (i32, i32) {
    %c0_i32 = arith.constant 0 : i32
    %c0_i32_0 = arith.constant 0 : i32
    %c0_i32_1 = arith.constant 0 : i32
    return %c0_i32, %c0_i32_0 : i32, i32
  }
  func.func @transform_4(%arg0: i32) -> (i32, i32) {
    %c0_i32 = arith.constant 0 : i32
    %c0_i32_0 = arith.constant 0 : i32
    %c0_i32_1 = arith.constant 0 : i32
    return %c0_i32, %c0_i32_0 : i32, i32
  }
  func.func @transform_5(%arg0: i32) -> (i32, i32) {
    %c0_i32 = arith.constant 0 : i32
    %c0_i32_0 = arith.constant 0 : i32
    %c0_i32_1 = arith.constant 0 : i32
    return %c0_i32, %c0_i32_0 : i32, i32
  }
  func.func @transform_6(%arg0: i32) -> (i32, i32, i32) {
    %c0_i32 = arith.constant 0 : i32
    %c0_i32_0 = arith.constant 0 : i32
    %c0_i32_1 = arith.constant 0 : i32
    %c0_i32_2 = arith.constant 0 : i32
    return %c0_i32, %c0_i32_0, %c0_i32_1 : i32, i32, i32
  }
  func.func @transform_7(%arg0: i32) -> (i32, i32, i32) {
    %c0_i32 = arith.constant 0 : i32
    %c0_i32_0 = arith.constant 0 : i32
    %c0_i32_1 = arith.constant 0 : i32
    %c0_i32_2 = arith.constant 0 : i32
    return %c0_i32, %c0_i32_0, %c0_i32_1 : i32, i32, i32
  }
  func.func @transform_8(%arg0: i32) -> (i32, i32) {
    %c0_i32 = arith.constant 0 : i32
    %c0_i32_0 = arith.constant 0 : i32
    %c0_i32_1 = arith.constant 0 : i32
    return %c0_i32, %c0_i32_0 : i32, i32
  }
  func.func @transform_9(%arg0: i32) -> (i32, i32) {
    %c0_i32 = arith.constant 0 : i32
    %c0_i32_0 = arith.constant 0 : i32
    %c0_i32_1 = arith.constant 0 : i32
    return %c0_i32, %c0_i32_0 : i32, i32
  }
  func.func @transform_10(%arg0: i32) -> (i32, i32) {
    %c0_i32 = arith.constant 0 : i32
    %c0_i32_0 = arith.constant 0 : i32
    return %arg0, %c0_i32 : i32, i32
  }
}

</mosaic_0001>

<bundles_post_ra>
// kernel: tpu_custom_call.1
= control target key start
LH: loop header
LB: loop body
LE: loop exit
PB: predicated region body
PF: predicated region fallthrough
CT: control target
= control target key end

     0   :  { %v44_v0 = vlaneseq  ;;  %v5521_v1 = vmov 0.0   ;;  %v3766_v4 = vmov 1966171168   ;;  %vm442_vm1 = vcmask 1041408   ;;  %s3771_s11 = smov 32   ;;  %s3772_s12 = smov 64   ;;  %s5510_s1 = inlined_call_operand.vmem [shape: s32[2,8,8], index: 1, kind: input, shape index: {}]   ;;  %s5511_s0 = inlined_call_operand.vmem [shape: s32[2,8], index: 0, kind: input, shape index: {}]   ;;  %s5512_s4 = inlined_call_operand.vmem [shape: bf16[5,8], index: 4, kind: input, shape index: {}]   ;;  %s5513_s2 = inlined_call_operand.vmem [shape: bf16[10,32], index: 2, kind: input, shape index: {}]   ;;  %s5514_s6 = inlined_call_operand.vmem [shape: bf16[2,288,32], index: 6, kind: input, shape index: {}]   ;;  %s5515_s5 = inlined_call_operand.vmem [shape: f32[1,8], index: 5, kind: input, shape index: {}]   ;;  %s5516_s3 = inlined_call_operand.vmem [shape: f32[1,32], index: 3, kind: input, shape index: {}]   ;;  %s5517_s7 = inlined_call_operand.vmem [shape: f32[2,1,32], index: 7, kind: input, shape index: {}]   ;;  %s5518_s9 = inlined_call_operand.<no memory space> [shape: f32[1,1], index: 9, kind: input, shape index: {}]   ;;  %s5519_s8 = inlined_call_operand.vmem [shape: f32[1,32], index: 8, kind: input, shape index: {}]   ;;  %s5520_s10 = inlined_call_operand.vmem [shape: f32[2,1], index: 10, kind: output, shape index: {}]  }
   0x1   :  { %3607 = vmatprep.subr.bf16.mxu0 %v5521_v1  ;;  %v39_v3 = vld [vmem:[%s5510_s1] sm:$0xff]  ;;  %v67_v5 = vunpack.c.l.s4 %v3766_v4  ;;  %vm443_vm2 = vcmask 1042432   ;;  %v3767_v26 = vmov 65535   ;;  %v40_v34 = vld [vmem:[%s5510_s1 + $0x8] sm:$0xff]  ;;  %vm144_vm3 = vcmask 1044480   ;;  %s3773_s13 = smov 96  }
   0x2   :  { %v3831_v2 = vshrl.u32 %v44_v0, 7  ;;  %v3853_v12 = vld [vmem:[%s5511_s0] sm:$0x3]  ;;  %v444_v27 = vsel %vm442_vm1, 4294967295, %v3767_v26  ;;  %v3904_v44 = vand.u32 127, %v44_v0  ;;  %vm3768_vm4 = vmmov 0  }
   0x3   :  { %vm41_vm0 = vcmp.gt.s32.totalorder %v3853_v12, 0  ;;  %v68_v17 = vunpack.c.0.s8 %v67_v5  ;;  %v376_v21 = vld [vmem:[%s5512_s4] sm:$0x7]  ;;  %v445_v28 = vsel %vm443_vm2, %v444_v27, 0  ;;  %3609 = vmatprep.mubr.msk.bf16.mxu0 %vm3768_vm4, %v5521_v1  ;;  %vm417_vm10 = vcmask 39936  }
   0x4   :  { %5694 = vst [vmem:[#allocation3_spill] sm:$0xff] %v3831_v2  ;;  %v3837_v6 = vsub.s32 2, %v3831_v2  ;;  %v3840_v7 = vsub.s32 0, %v3831_v2  ;;  %v3843_v8 = vsub.s32 3, %v3831_v2  ;;  %v3846_v9 = vsub.s32 1, %v3831_v2 }
   0x5   :  { %v3856_v13 = vsub.s32 5, %v3831_v2  ;;  %v3862_v16 = vsub.s32 4, %v3831_v2  ;;  %v3416_v19 = vsel %vm41_vm0, 1.0, %v5521_v1  ;;  %v3867_v20 = vsub.s32 %v68_v17, %v3831_v2  ;;  %v3716_v40 = vld [vmem:[%s5513_s2] sm:$0x1f]  }
   0x6   :  { %5695 = vst [vmem:[#allocation4_spill] sm:$0xff] %v3837_v6  ;;  %5696 = vst [vmem:[#allocation5_spill] sm:$0xff] %v3840_v7  ;;  %v217_v10 = vrot.slane %v39_v3, %v3837_v6  ;;  %v203_v11 = vrot.slane %v39_v3, %v3840_v7  ;;  %v224_v14 = vrot.slane %v39_v3, %v3843_v8  ;;  %v3874_v23 = vsub.s32 7, %v3831_v2 }
   0x7   :  { %5697 = vst [vmem:[#allocation6_spill] sm:$0xff] %v3843_v8  ;;  %5698 = vst [vmem:[#allocation7_spill] sm:$0xff] %v3846_v9  ;;  %v210_v15 = vrot.slane %v39_v3, %v3846_v9  ;;  %v238_v18 = vrot.slane %v39_v3, %v3856_v13  ;;  %v231_v22 = vrot.slane %v39_v3, %v3862_v16  ;;  %v3877_v24 = vsub.s32 6, %v3831_v2 }
   0x8   :  { %5699 = vst [vmem:[#allocation8_spill] sm:$0xff] %v3856_v13  ;;  %219 = vbcast.lane.b32.xlu1 %v217_v10, 256  ;;  %205 = vbcast.lane.b32.xlu0 %v203_v11, 256  ;;  %5700 = vst [vmem:[#allocation9_spill] sm:$0xff] %v3862_v16  ;;  %v3880_v25 = vrot.slane %v3416_v19, %v3867_v20  ;;  %v447_v31 = vand.u32 %v445_v28, %v376_v21  ;;  %v146_v41 = vsel %vm144_vm3, %v3716_v40, 0 }
   0x9   :  { %5701 = vst [vmem:[#allocation10_spill] sm:$0xff] %v3874_v23  ;;  %5702 = vst [vmem:[#allocation11_spill] sm:$0xff] %v3877_v24  ;;  %v252_v32 = vrot.slane %v39_v3, %v3874_v23  ;;  %v245_v33 = vrot.slane %v39_v3, %v3877_v24  ;;  %v266_v36 = vrot.slane %v40_v34, %v3846_v9  ;;  %3608 = vmatpush3.bf16.msra.mxu0 %v146_v41 }
   0xa   :  { %v73_v29 = vcombine.high %v3880_v25, %v3880_v25  ;;  %v80_v30 = vrot.slane %v3880_v25, %v3867_v20  ;;  %3613 = vmatprep.subr.bf16.mxu1 %v447_v31  ;;  %v259_v37 = vrot.slane %v40_v34, %v3840_v7  ;;  %v280_v38 = vrot.slane %v40_v34, %v3843_v8 }
   0xb   :  { %3614 = vmatpush3.bf16.msra.mxu1 %v447_v31  ;;  %v273_v39 = vrot.slane %v40_v34, %v3837_v6  ;;  %v294_v42 = vrot.slane %v40_v34, %v3856_v13  ;;  %v287_v43 = vrot.slane %v40_v34, %v3862_v16  ;;  %3631 = vmatprep.subr.bf16.mxu0 %v5521_v1 }
   0xc   :  { %226 = vbcast.lane.b32.xlu1 %v224_v14, 256  ;;  %212 = vbcast.lane.b32.xlu0 %v210_v15, 256  ;;  %v3892_v35 = vrot.slane %v73_v29, %v3867_v20  ;;  %vm62_vm5 = vcmp.eq.s32.totalorder %v3831_v2, %v3904_v44  ;;  %v308_v45 = vrot.slane %v40_v34, %v3874_v23 }
   0xd   :  { %v301_v46 = vrot.slane %v40_v34, %v3877_v24  ;;  %v116_v47 = vrot.slane %v3853_v12, %v3846_v9  ;;  %v109_v48 = vrot.slane %v3853_v12, %v3840_v7  ;;  %v47_v49 = vrot.slane %v3416_v19, %v3840_v7 }
   0xe   :  { %v54_v50 = vrot.slane %v3416_v19, %v3846_v9  ;;  %v3417_v20 = vsel %vm62_vm5, 1.0, %v5521_v1  ;;  %vm2217_vm5 = vcmask 261120  }
  0x10   :  { %240 = vbcast.lane.b32.xlu1 %v238_v18, 256  ;;  %233 = vbcast.lane.b32.xlu0 %v231_v22, 256 }
  0x14   :  { %254 = vbcast.lane.b32.xlu1 %v252_v32, 256  ;;  %247 = vbcast.lane.b32.xlu0 %v245_v33, 256 }
  0x18   :  { %268 = vbcast.lane.b32.xlu1 %v266_v36, 256  ;;  %261 = vbcast.lane.b32.xlu0 %v259_v37, 256 }
  0x1c   :  { %282 = vbcast.lane.b32.xlu1 %v280_v38, 256  ;;  %275 = vbcast.lane.b32.xlu0 %v273_v39, 256 }
  0x20   :  { %296 = vbcast.lane.b32.xlu1 %v294_v42, 256  ;;  %289 = vbcast.lane.b32.xlu0 %v287_v43, 256  ;;  %v91_v43 = vrot.slane %v80_v30, %v3840_v7 }
  0x24   :  { %310 = vbcast.lane.b32.xlu1 %v308_v45, 256  ;;  %303 = vbcast.lane.b32.xlu0 %v301_v46, 256  ;;  %v95_v45 = vrot.slane %v3892_v35, %v3840_v7 }
  0x28   :  { %118 = vbcast.lane.b32.xlu1 %v116_v47, 256  ;;  %111 = vbcast.lane.b32.xlu0 %v109_v48, 256 }
  0x2c   :  { %49 = vbcast.lane.b32.xlu0 %v47_v49, 256  ;;  %56 = vbcast.lane.b32.xlu1 %v54_v50, 256 }
  0x7a   :  { %v220_v51 = vpop.permute.xlu1 %219  ;;  %v206_v52 = vpop.permute.xlu0 %205 }
  0x7b   :  { %vm314_vm6 = vcmp.eq.s32.totalorder %v220_v51, %v3904_v44  ;;  %vm312_vm7 = vcmp.eq.s32.totalorder %v206_v52, %v3904_v44 }
  0x7c   :  { %v3426_v55 = vsel %vm314_vm6, 1.0, %v5521_v1  ;;  %v3424_v57 = vsel %vm312_vm7, 1.0, %v5521_v1 }
  0x7e   :  { %v227_v53 = vpop.permute.xlu1 %226  ;;  %v213_v54 = vpop.permute.xlu0 %212 }
  0x7f   :  { %vm315_vm8 = vcmp.eq.s32.totalorder %v227_v53, %v3904_v44  ;;  %vm313_vm9 = vcmp.eq.s32.totalorder %v213_v54, %v3904_v44 }
  0x80   :  { %v3427_v56 = vsel %vm315_vm8, 1.0, %v5521_v1  ;;  %v3425_v58 = vsel %vm313_vm9, 1.0, %v5521_v1 }
  0x81   :  { %v3539_v59 = vpack.c.bf16 %v3427_v56, %v3426_v55  ;;  %v3538_v60 = vpack.c.bf16 %v3425_v58, %v3424_v57 }
  0x82   :  { %v241_v61 = vpop.permute.xlu1 %240  ;;  %v234_v62 = vpop.permute.xlu0 %233 }
  0x83   :  { %vm317_vm11 = vcmp.eq.s32.totalorder %v241_v61, %v3904_v44  ;;  %vm316_vm12 = vcmp.eq.s32.totalorder %v234_v62, %v3904_v44  ;;  %3615 = vmatprep.mubr.msk.bf16.mxu1 %vm417_vm10, %v3538_v60 }
  0x84   :  { %v3429_v63 = vsel %vm317_vm11, 1.0, %v5521_v1  ;;  %v3428_v0 = vsel %vm316_vm12, 1.0, %v5521_v1  ;;  %3616 = vmatmul.mubr.msk.bf16.vlgmr.msra.gmra.mrb[0].mxu1 %vm417_vm10, %v3539_v59  ;;  %vm140_vm12 = vcmask 80896  }
  0x85   :  { %v3540_v3 = vpack.c.bf16 %v3429_v63, %v3428_v0 }
  0x86   :  { %v255_v4 = vpop.permute.xlu1 %254  ;;  %v248_v5 = vpop.permute.xlu0 %247 }
  0x87   :  { %vm319_vm13 = vcmp.eq.s32.totalorder %v255_v4, %v3904_v44  ;;  %vm318_vm14 = vcmp.eq.s32.totalorder %v248_v5, %v3904_v44  ;;  %3619 = vmatprep.mubr.msk.bf16.mxu1 %vm417_vm10, %v3540_v3 }
  0x88   :  { %v3431_v10 = vsel %vm319_vm13, 1.0, %v5521_v1  ;;  %v3430_v11 = vsel %vm318_vm14, 1.0, %v5521_v1  ;;  %vm2223_vm13 = vcmask 785408   ;;  %vm3392_vm14 = vcmask 254976  }
  0x89   :  { %v3541_v12 = vpack.c.bf16 %v3431_v10, %v3430_v11 }
  0x8a   :  { %v269_v14 = vpop.permute.xlu1 %268  ;;  %v262_v15 = vpop.permute.xlu0 %261 }
  0x8b   :  { %vm321_vm15 = vcmp.eq.s32.totalorder %v269_v14, %v3904_v44  ;;  %vm320_vm0 = vcmp.eq.s32.totalorder %v262_v15, %v3904_v44  ;;  %v3717_v14 = vld [vmem:[%s5514_s6 + $0x80] sm:$0xff]   ;;  %v3718_v15 = vld [vmem:[%s5514_s6 + $0x88] sm:$0xff]  }
  0x8c   :  { %v3433_v17 = vsel %vm321_vm15, 1.0, %v5521_v1  ;;  %v3432_v18 = vsel %vm320_vm0, 1.0, %v5521_v1  ;;  %3620 = vmatmul.mubr.msk.bf16.gmra.mrb[4].mxu1 %vm417_vm10, %v3541_v12  ;;  %vm3410_vm15 = vcmask 1024  }
  0x8d   :  { %v3542_v19 = vpack.c.bf16 %v3433_v17, %v3432_v18 }
  0x8e   :  { %v283_v21 = vpop.permute.xlu1 %282  ;;  %v276_v22 = vpop.permute.xlu0 %275 }
  0x8f   :  { %vm323_vm1 = vcmp.eq.s32.totalorder %v283_v21, %v3904_v44  ;;  %vm322_vm2 = vcmp.eq.s32.totalorder %v276_v22, %v3904_v44  ;;  %3623 = vmatprep.mubr.msk.bf16.mxu1 %vm417_vm10, %v3542_v19  ;;  %v4011_v19 = vld [vmem:[%s5515_s5] ss:$0 sm:$0xff] }
  0x90   :  { %v3435_v26 = vsel %vm323_vm1, 1.0, %v5521_v1  ;;  %v3434_v27 = vsel %vm322_vm2, 1.0, %v5521_v1 }
  0x91   :  { %v3543_v28 = vpack.c.bf16 %v3435_v26, %v3434_v27 }
  0x92   :  { %v297_v29 = vpop.permute.xlu1 %296  ;;  %v290_v31 = vpop.permute.xlu0 %289 }
  0x93   :  { %vm325_vm3 = vcmp.eq.s32.totalorder %v297_v29, %v3904_v44  ;;  %vm324_vm6 = vcmp.eq.s32.totalorder %v290_v31, %v3904_v44 }
  0x94   :  { %v3437_v32 = vsel %vm325_vm3, 1.0, %v5521_v1  ;;  %v3436_v33 = vsel %vm324_vm6, 1.0, %v5521_v1  ;;  %3624 = vmatmul.mubr.msk.bf16.gmra.mrb[8].mxu1 %vm417_vm10, %v3543_v28 }
  0x95   :  { %v3544_v34 = vpack.c.bf16 %v3437_v32, %v3436_v33 }
  0x96   :  { %v311_v36 = vpop.permute.xlu1 %310  ;;  %v304_v37 = vpop.permute.xlu0 %303 }
  0x97   :  { %vm327_vm7 = vcmp.eq.s32.totalorder %v311_v36, %v3904_v44  ;;  %vm326_vm8 = vcmp.eq.s32.totalorder %v304_v37, %v3904_v44  ;;  %3627 = vmatprep.mubr.msk.bf16.mxu1 %vm417_vm10, %v3544_v34 }
  0x98   :  { %v3439_v38 = vsel %vm327_vm7, 1.0, %v5521_v1  ;;  %v3438_v39 = vsel %vm326_vm8, 1.0, %v5521_v1 }
  0x99   :  { %v3545_v40 = vpack.c.bf16 %v3439_v38, %v3438_v39 }
  0x9a   :  { %v119_v41 = vpop.permute.xlu1 %118  ;;  %v112_v42 = vpop.permute.xlu0 %111 }
  0x9b   :  { %vm121_vm9 = vcmp.eq.s32.totalorder %v119_v41, %v3904_v44  ;;  %vm120_vm11 = vcmp.eq.s32.totalorder %v112_v42, %v3904_v44 }
  0x9c   :  { %v3419_v46 = vsel %vm121_vm9, 1.0, %v5521_v1  ;;  %v3418_v47 = vsel %vm120_vm11, 1.0, %v5521_v1  ;;  %3628 = vmatmul.mubr.msk.bf16.gmra.mrb[12].mxu1 %vm417_vm10, %v3545_v40  ;;  %vm2220_vm10 = vcmask 523264  }
  0x9d   :  { %v3537_v48 = vpack.c.bf16 %v3419_v46, %v3418_v47 }
  0x9e   :  { %v3973_v25 = vpop.permute.xlu0 %49  ;;  %v3975_v30 = vpop.permute.xlu1 %56 }
  0x9f   :  { %5703 = vst [vmem:[#allocation12_spill] sm:$0xff] %v3973_v25  ;;  %5704 = vst [vmem:[#allocation13_spill] sm:$0xff] %v3975_v30  ;;  %3610 = vmatmul.mubr.msk.bf16.vlgmr.msra.gmra.mrb[0].mxu0 %vm140_vm12, %v3537_v48  ;;  %v98_v35 = vmul.f32 %v91_v43, %v3973_v25  ;;  %v99_v49 = vmul.f32 %v95_v45, %v3975_v30 }
  0xa0   :  { %3635 = vmatprep.mubr.msk.bf16.mxu0 %vm3768_vm4, %v5521_v1  ;;  %3632 = vmatpush3.bf16.msra.mxu0 %v3717_v14 }
  0xa1   :  { %v100_v50 = vsub.f32 %v98_v35, %v3417_v20  ;;  %v101_v51 = vsub.f32 %v99_v49, %v3417_v20  ;;  %3633 = vmatprep.subr.bf16.mxu0 %v5521_v1 }
  0xa3   :  { %v102_v52 = vmax.f32 %v100_v50, 0.0  ;;  %v103_v59 = vmax.f32 %v101_v51, 0.0 }
  0xa4   :  { %3634 = vmatpush3.bf16.msra.mxu0 %v3718_v15 }
  0xa5   :  { %v104_v53 = vmin.f32 %v102_v52, 1.0  ;;  %v105_v62 = vmin.f32 %v103_v59, 1.0 }
  0xa7   :  { %v579_v54 = vrot.slane %v104_v53, %v3846_v9  ;;  %v572_v44 = vrot.slane %v104_v53, %v3840_v7  ;;  %v593_v55 = vrot.slane %v104_v53, %v3843_v8  ;;  %v586_v56 = vrot.slane %v104_v53, %v3837_v6 }
  0xa8   :  { %v607_v57 = vrot.slane %v104_v53, %v3856_v13  ;;  %v600_v58 = vrot.slane %v104_v53, %v3862_v16  ;;  %v621_v60 = vrot.slane %v104_v53, %v3874_v23  ;;  %v614_v61 = vrot.slane %v104_v53, %v3877_v24 }
  0xa9   :  { %581 = vbcast.lane.b32.xlu1 %v579_v54, 256  ;;  %574 = vbcast.lane.b32.xlu0 %v572_v44, 256  ;;  %v635_v63 = vrot.slane %v105_v62, %v3846_v9  ;;  %v628_v0 = vrot.slane %v105_v62, %v3840_v7  ;;  %v649_v3 = vrot.slane %v105_v62, %v3843_v8 }
  0xaa   :  { %v642_v4 = vrot.slane %v105_v62, %v3837_v6  ;;  %v663_v5 = vrot.slane %v105_v62, %v3856_v13  ;;  %v656_v10 = vrot.slane %v105_v62, %v3862_v16  ;;  %v677_v11 = vrot.slane %v105_v62, %v3874_v23 }
  0xab   :  { %v670_v12 = vrot.slane %v105_v62, %v3877_v24 }
  0xad   :  { %595 = vbcast.lane.b32.xlu1 %v593_v55, 256  ;;  %588 = vbcast.lane.b32.xlu0 %v586_v56, 256 }
  0xb1   :  { %609 = vbcast.lane.b32.xlu1 %v607_v57, 256  ;;  %602 = vbcast.lane.b32.xlu0 %v600_v58, 256 }
  0xb5   :  { %623 = vbcast.lane.b32.xlu1 %v621_v60, 256  ;;  %616 = vbcast.lane.b32.xlu0 %v614_v61, 256  ;;  %v3423_v61 = vld [vmem:[%s5516_s3] ss:$0 sm:$0xff] }
  0xb9   :  { %637 = vbcast.lane.b32.xlu1 %v635_v63, 256  ;;  %630 = vbcast.lane.b32.xlu0 %v628_v0, 256 }
  0xbd   :  { %651 = vbcast.lane.b32.xlu1 %v649_v3, 256  ;;  %644 = vbcast.lane.b32.xlu0 %v642_v4, 256 }
  0xc1   :  { %665 = vbcast.lane.b32.xlu1 %v663_v5, 256  ;;  %658 = vbcast.lane.b32.xlu0 %v656_v10, 256 }
  0xc5   :  { %679 = vbcast.lane.b32.xlu1 %v677_v11, 256  ;;  %672 = vbcast.lane.b32.xlu0 %v670_v12, 256 }
 0x11b   :  { %v4004_v17 = vpop.permute.xlu0 %574  ;;  %v4006_v18 = vpop.permute.xlu1 %581 }
 0x11f   :  { %v589_v27 = vpop.permute.xlu0 %588  ;;  %v596_v33 = vpop.permute.xlu1 %595 }
 0x157   :  { %v3617_v21 = vpop.f32.mrb[0].mxu1 }
 0x158   :  { %v555_v22 = vadd.f32 %v3617_v21, %v4011_v19  ;;  %v483_v26 = vpop.f32.mrb[1].mxu1 }
 0x159   :  { %v3618_v28 = vpop.f32.mrb[2].mxu1 }
 0x15a   :  { %v4014_v29 = vmul.f32 %v589_v27, %v555_v22  ;;  %v556_v31 = vadd.f32 %v3618_v28, %v4011_v19  ;;  %v486_v32 = vpop.f32.mrb[3].mxu1  ;;  %v553_v22 = vadd.f32 %v4011_v19, %v483_v26 }
 0x15c   :  { %v4017_v34 = vmul.f32 %v596_v33, %v556_v31  ;;  %v714_v36 = vrot.slane %v4014_v29, %v3840_v7  ;;  %v850_v41 = vrot.slane %v4014_v29, %v3846_v9  ;;  %v1002_v20 = vrot.slane %v4014_v29, %v3837_v6 }
 0x15d   :  { %v1154_v50 = vrot.slane %v4014_v29, %v3843_v8  ;;  %v1306_v58 = vrot.slane %v4014_v29, %v3862_v16  ;;  %v1458_v62 = vrot.slane %v4014_v29, %v3856_v13  ;;  %v1610_v28 = vrot.slane %v4014_v29, %v3877_v24 }
 0x15e   :  { %716 = vbcast.lane.b32.xlu0 %v714_v36, 256  ;;  %v721_v37 = vrot.slane %v4017_v34, %v3840_v7  ;;  %v857_v47 = vrot.slane %v4017_v34, %v3846_v9  ;;  %v1009_v35 = vrot.slane %v4017_v34, %v3837_v6  ;;  %v1161_v44 = vrot.slane %v4017_v34, %v3843_v8 }
 0x15f   :  { %v3621_v38 = vpop.f32.mrb[4].mxu1  ;;  %v1313_v59 = vrot.slane %v4017_v34, %v3862_v16  ;;  %v1465_v10 = vrot.slane %v4017_v34, %v3856_v13  ;;  %v554_v36 = vadd.f32 %v4011_v19, %v486_v32  ;;  %v681_v26 = vmul.f32 %v4004_v17, %v553_v22 }
 0x160   :  { %v4024_v39 = vadd.f32 %v3621_v38, %v4011_v19  ;;  %v499_v40 = vpop.f32.mrb[5].mxu1  ;;  %723 = vbcast.lane.b32.xlu1 %v721_v37, 256  ;;  %v1617_v37 = vrot.slane %v4017_v34, %v3877_v24 }
 0x161   :  { %v4029_v42 = vadd.f32 %v4011_v19, %v499_v40  ;;  %v3622_v43 = vpop.f32.mrb[6].mxu1  ;;  %v682_v32 = vmul.f32 %v4006_v18, %v554_v36  ;;  %v988_v18 = vrot.slane %v681_v26, %v3837_v6 }
 0x162   :  { %v4032_v45 = vadd.f32 %v3622_v43, %v4011_v19  ;;  %v502_v46 = vpop.f32.mrb[7].mxu1  ;;  %852 = vbcast.lane.b32.xlu0 %v850_v41, 256  ;;  %v1762_v41 = vrot.slane %v4014_v29, %v3874_v23  ;;  %v1769_v43 = vrot.slane %v4017_v34, %v3874_v23  ;;  %v836_v29 = vrot.slane %v681_v26, %v3846_v9 }
 0x163   :  { %v4037_v48 = vadd.f32 %v4011_v19, %v502_v46  ;;  %v700_v46 = vrot.slane %v681_v26, %v3840_v7  ;;  %v707_v17 = vrot.slane %v682_v32, %v3840_v7  ;;  %v995_v34 = vrot.slane %v682_v32, %v3837_v6 }
 0x164   :  { %859 = vbcast.lane.b32.xlu1 %v857_v47, 256  ;;  %v843_v47 = vrot.slane %v682_v32, %v3846_v9 }
 0x166   :  { %1004 = vbcast.lane.b32.xlu0 %v1002_v20, 256  ;;  %v1140_v20 = vrot.slane %v681_v26, %v3843_v8 }
 0x167   :  { %v3625_v49 = vpop.f32.mrb[8].mxu1 }
 0x168   :  { %1011 = vbcast.lane.b32.xlu1 %v1009_v35, 256  ;;  %v4046_v51 = vadd.f32 %v3625_v49, %v4011_v19  ;;  %v515_v52 = vpop.f32.mrb[9].mxu1  ;;  %v1147_v35 = vrot.slane %v682_v32, %v3843_v8  ;;  %v1292_v49 = vrot.slane %v681_v26, %v3862_v16 }
 0x169   :  { %v4049_v53 = vadd.f32 %v4011_v19, %v515_v52  ;;  %v3626_v54 = vpop.f32.mrb[10].mxu1  ;;  %v1444_v52 = vrot.slane %v681_v26, %v3856_v13 }
 0x16a   :  { %1156 = vbcast.lane.b32.xlu0 %v1154_v50, 256  ;;  %v4054_v55 = vadd.f32 %v3626_v54, %v4011_v19  ;;  %v518_v56 = vpop.f32.mrb[11].mxu1  ;;  %v1299_v50 = vrot.slane %v682_v32, %v3862_v16  ;;  %v603_v54 = vpop.permute.xlu0 %602 }
 0x16b   :  { %v4057_v57 = vadd.f32 %v4011_v19, %v518_v56  ;;  %v610_v56 = vpop.permute.xlu1 %609 }
 0x16c   :  { %1163 = vbcast.lane.b32.xlu1 %v1161_v44, 256  ;;  %v1451_v44 = vrot.slane %v682_v32, %v3856_v13 }
 0x16e   :  { %1308 = vbcast.lane.b32.xlu0 %v1306_v58, 256  ;;  %v1596_v58 = vrot.slane %v681_v26, %v3877_v24 }
 0x16f   :  { %v3629_v60 = vpop.f32.mrb[12].mxu1 }
 0x170   :  { %1315 = vbcast.lane.b32.xlu1 %v1313_v59, 256  ;;  %v4069_v63 = vadd.f32 %v3629_v60, %v4011_v19  ;;  %v531_v0 = vpop.f32.mrb[13].mxu1  ;;  %v1603_v59 = vrot.slane %v682_v32, %v3877_v24  ;;  %v617_v60 = vpop.permute.xlu0 %616 }
 0x171   :  { %v4072_v3 = vadd.f32 %v4011_v19, %v531_v0  ;;  %v3630_v4 = vpop.f32.mrb[14].mxu1  ;;  %v624_v0 = vpop.permute.xlu1 %623 }
 0x172   :  { %v182_v5 = vpop.f32.mrb[0].mxu0  ;;  %1460 = vbcast.lane.b32.xlu0 %v1458_v62, 256  ;;  %v4077_v11 = vadd.f32 %v3630_v4, %v4011_v19  ;;  %v534_v12 = vpop.f32.mrb[15].mxu1  ;;  %v1748_v62 = vrot.slane %v681_v26, %v3874_v23  ;;  %v688_v4 = vmul.f32 %v624_v0, %v4032_v45 }
 0x173   :  { %v196_v14 = vadd.f32 %v3423_v61, %v182_v5  ;;  %v3611_v15 = vpop.f32.mrb[1].mxu0  ;;  %v4080_v21 = vadd.f32 %v4011_v19, %v534_v12  ;;  %v1755_v5 = vrot.slane %v682_v32, %v3874_v23  ;;  %v686_v32 = vmul.f32 %v610_v56, %v4037_v48 }
 0x174   :  { %v185_v27 = vpop.f32.mrb[2].mxu0  ;;  %1467 = vbcast.lane.b32.xlu1 %v1465_v10, 256  ;;  %v749_v12 = vrot.slane %v688_v4, %v3840_v7  ;;  %v1037_v45 = vrot.slane %v688_v4, %v3837_v6  ;;  %v1493_v36 = vrot.slane %v688_v4, %v3856_v13  ;;  %v1645_v26 = vrot.slane %v688_v4, %v3877_v24 }
 0x175   :  { %v197_v31 = vadd.f32 %v3423_v61, %v185_v27  ;;  %v3612_v33 = vpop.f32.mrb[3].mxu0  ;;  %v4089_v38 = vmul.f32 %v196_v14, %v3973_v25  ;;  %v687_v61 = vmul.f32 %v617_v60, %v4024_v39  ;;  %v885_v39 = vrot.slane %v688_v4, %v3846_v9 }
 0x176   :  { %1612 = vbcast.lane.b32.xlu0 %v1610_v28, 256  ;;  %v1189_v27 = vrot.slane %v688_v4, %v3843_v8  ;;  %v871_v48 = vrot.slane %v686_v32, %v3846_v9  ;;  %v1479_v0 = vrot.slane %v686_v32, %v3856_v13 }
 0x177   :  { %v4092_v40 = vmul.f32 %v197_v31, %v3975_v30  ;;  %v742_v10 = vrot.slane %v687_v61, %v3840_v7  ;;  %v878_v14 = vrot.slane %v687_v61, %v3846_v9  ;;  %v1030_v15 = vrot.slane %v687_v61, %v3837_v6 }
 0x178   :  { %1619 = vbcast.lane.b32.xlu1 %v1617_v37, 256  ;;  %v1182_v22 = vrot.slane %v687_v61, %v3843_v8  ;;  %v1334_v28 = vrot.slane %v687_v61, %v3862_v16  ;;  %v1341_v31 = vrot.slane %v688_v4, %v3862_v16  ;;  %v1486_v33 = vrot.slane %v687_v61, %v3856_v13 }
 0x179   :  { %5705 = vst [vmem:[#allocation14_spill] sm:$0xff] %v4092_v40  ;;  %v2234_v19 = vpack.c.bf16 %v4092_v40, %v4089_v38  ;;  %v1638_v37 = vrot.slane %v687_v61, %v3877_v24 }
 0x17a   :  { %1764 = vbcast.lane.b32.xlu0 %v1762_v41, 256  ;;  %v685_v41 = vmul.f32 %v603_v54, %v4029_v42  ;;  %v1175_v54 = vrot.slane %v686_v32, %v3843_v8 }
 0x17b   :  { %3636 = vmatmul.mubr.msk.bf16.vlgmr.msra.gmra.mrb[4].mxu0 %vm2217_vm5, %v2234_v19  ;;  %v1790_v19 = vrot.slane %v687_v61, %v3874_v23 }
 0x17c   :  { %1771 = vbcast.lane.b32.xlu1 %v1769_v43, 256  ;;  %v4138_v43 = vpop.permute.xlu0 %630  ;;  %v864_v42 = vrot.slane %v685_v41, %v3846_v9  ;;  %v1320_v56 = vrot.slane %v685_v41, %v3862_v16  ;;  %v1472_v61 = vrot.slane %v685_v41, %v3856_v13 }
 0x17e   :  { %702 = vbcast.lane.b32.xlu0 %v700_v46, 256  ;;  %v1797_v46 = vrot.slane %v688_v4, %v3874_v23 }
 0x180   :  { %709 = vbcast.lane.b32.xlu1 %v707_v17, 256  ;;  %v4141_v17 = vpop.permute.xlu1 %637 }
 0x182   :  { %838 = vbcast.lane.b32.xlu0 %v836_v29, 256  ;;  %v728_v29 = vrot.slane %v685_v41, %v3840_v7 }
 0x184   :  { %845 = vbcast.lane.b32.xlu1 %v843_v47, 256  ;;  %v735_v47 = vrot.slane %v686_v32, %v3840_v7 }
 0x186   :  { %990 = vbcast.lane.b32.xlu0 %v988_v18, 256  ;;  %v645_v18 = vpop.permute.xlu0 %644 }
 0x188   :  { %997 = vbcast.lane.b32.xlu1 %v995_v34, 256  ;;  %v652_v34 = vpop.permute.xlu1 %651 }
 0x18a   :  { %1142 = vbcast.lane.b32.xlu0 %v1140_v20, 256  ;;  %v1016_v20 = vrot.slane %v685_v41, %v3837_v6 }
 0x18c   :  { %1149 = vbcast.lane.b32.xlu1 %v1147_v35, 256  ;;  %v4148_v35 = vpop.permute.xlu0 %658 }
 0x18e   :  { %1294 = vbcast.lane.b32.xlu0 %v1292_v49, 256  ;;  %v1023_v49 = vrot.slane %v686_v32, %v3837_v6 }
 0x190   :  { %1301 = vbcast.lane.b32.xlu1 %v1299_v50, 256  ;;  %v4151_v50 = vpop.permute.xlu1 %665 }
 0x192   :  { %1446 = vbcast.lane.b32.xlu0 %v1444_v52, 256  ;;  %v1168_v52 = vrot.slane %v685_v41, %v3843_v8 }
 0x194   :  { %1453 = vbcast.lane.b32.xlu1 %v1451_v44, 256  ;;  %v4155_v44 = vpop.permute.xlu0 %672 }
 0x196   :  { %1598 = vbcast.lane.b32.xlu0 %v1596_v58, 256  ;;  %v4158_v58 = vpop.permute.xlu1 %679 }
 0x198   :  { %1605 = vbcast.lane.b32.xlu1 %v1603_v59, 256  ;;  %v1327_v59 = vrot.slane %v686_v32, %v3862_v16 }
 0x19a   :  { %1750 = vbcast.lane.b32.xlu0 %v1748_v62, 256 }
 0x19c   :  { %1757 = vbcast.lane.b32.xlu1 %v1755_v5, 256  ;;  %v1624_v5 = vrot.slane %v685_v41, %v3877_v24 }
 0x19e   :  { %744 = vbcast.lane.b32.xlu0 %v742_v10, 256 }
 0x1a0   :  { %751 = vbcast.lane.b32.xlu1 %v749_v12, 256  ;;  %v1631_v12 = vrot.slane %v686_v32, %v3877_v24 }
 0x1a2   :  { %880 = vbcast.lane.b32.xlu0 %v878_v14, 256  ;;  %v691_v14 = vmul.f32 %v645_v18, %v4046_v51 }
 0x1a4   :  { %887 = vbcast.lane.b32.xlu1 %v885_v39, 256 }
 0x1a6   :  { %1032 = vbcast.lane.b32.xlu0 %v1030_v15, 256  ;;  %v1776_v15 = vrot.slane %v685_v41, %v3874_v23 }
 0x1a8   :  { %1039 = vbcast.lane.b32.xlu1 %v1037_v45, 256  ;;  %v692_v45 = vmul.f32 %v652_v34, %v4054_v55  ;;  %v906_v55 = vrot.slane %v691_v14, %v3846_v9 }
 0x1aa   :  { %1184 = vbcast.lane.b32.xlu0 %v1182_v22, 256  ;;  %v777_v51 = vrot.slane %v692_v45, %v3840_v7 }
 0x1ac   :  { %1191 = vbcast.lane.b32.xlu1 %v1189_v27, 256  ;;  %v1783_v27 = vrot.slane %v686_v32, %v3874_v23 }
 0x1ae   :  { %1336 = vbcast.lane.b32.xlu0 %v1334_v28, 256 }
 0x1b0   :  { %1343 = vbcast.lane.b32.xlu1 %v1341_v31, 256  ;;  %v770_v31 = vrot.slane %v691_v14, %v3840_v7 }
 0x1b2   :  { %1488 = vbcast.lane.b32.xlu0 %v1486_v33, 256 }
 0x1b4   :  { %1495 = vbcast.lane.b32.xlu1 %v1493_v36, 256 }
 0x1b6   :  { %1640 = vbcast.lane.b32.xlu0 %v1638_v37, 256 }
 0x1b8   :  { %1647 = vbcast.lane.b32.xlu1 %v1645_v26, 256  ;;  %v913_v26 = vrot.slane %v692_v45, %v3846_v9 }
 0x1ba   :  { %1792 = vbcast.lane.b32.xlu0 %v1790_v19, 256  ;;  %v1058_v19 = vrot.slane %v691_v14, %v3837_v6 }
 0x1bc   :  { %1799 = vbcast.lane.b32.xlu1 %v1797_v46, 256  ;;  %v1065_v46 = vrot.slane %v692_v45, %v3837_v6 }
 0x1be   :  { %730 = vbcast.lane.b32.xlu0 %v728_v29, 256 }
 0x1c0   :  { %737 = vbcast.lane.b32.xlu1 %v735_v47, 256  ;;  %v1210_v47 = vrot.slane %v691_v14, %v3843_v8 }
 0x1c2   :  { %866 = vbcast.lane.b32.xlu0 %v864_v42, 256  ;;  %v1217_v42 = vrot.slane %v692_v45, %v3843_v8 }
 0x1c4   :  { %873 = vbcast.lane.b32.xlu1 %v871_v48, 256  ;;  %v1362_v48 = vrot.slane %v691_v14, %v3862_v16 }
 0x1c6   :  { %1018 = vbcast.lane.b32.xlu0 %v1016_v20, 256 }
 0x1c8   :  { %1025 = vbcast.lane.b32.xlu1 %v1023_v49, 256  ;;  %v1369_v49 = vrot.slane %v692_v45, %v3862_v16 }
 0x1ca   :  { %1170 = vbcast.lane.b32.xlu0 %v1168_v52, 256 }
 0x1cc   :  { %1177 = vbcast.lane.b32.xlu1 %v1175_v54, 256  ;;  %v1514_v54 = vrot.slane %v691_v14, %v3856_v13 }
 0x1ce   :  { %1322 = vbcast.lane.b32.xlu0 %v1320_v56, 256 }
 0x1d0   :  { %1329 = vbcast.lane.b32.xlu1 %v1327_v59, 256  ;;  %v4161_v60 = vpop.permute.xlu0 %716  ;;  %v1521_v59 = vrot.slane %v692_v45, %v3856_v13 }
 0x1d1   :  { %5706 = vst [vmem:[#allocation15_spill] sm:$0xff] %v4161_v60 }
 0x1d2   :  { %v4164_v62 = vpop.permute.xlu1 %723  ;;  %1474 = vbcast.lane.b32.xlu0 %v1472_v61, 256 }
 0x1d3   :  { %5707 = vst [vmem:[#allocation16_spill] sm:$0xff] %v4164_v62 }
 0x1d4   :  { %1481 = vbcast.lane.b32.xlu1 %v1479_v0, 256  ;;  %v4167_v4 = vpop.permute.xlu0 %852  ;;  %v1666_v0 = vrot.slane %v691_v14, %v3877_v24 }
 0x1d5   :  { %5708 = vst [vmem:[#allocation17_spill] sm:$0xff] %v4167_v4 }
 0x1d6   :  { %v4170_v10 = vpop.permute.xlu1 %859  ;;  %1626 = vbcast.lane.b32.xlu0 %v1624_v5, 256 }
 0x1d7   :  { %5709 = vst [vmem:[#allocation18_spill] sm:$0xff] %v4170_v10 }
 0x1d8   :  { %1633 = vbcast.lane.b32.xlu1 %v1631_v12, 256  ;;  %v4174_v39 = vpop.permute.xlu0 %1004  ;;  %v1673_v12 = vrot.slane %v692_v45, %v3877_v24 }
 0x1d9   :  { %5710 = vst [vmem:[#allocation19_spill] sm:$0xff] %v4174_v39 }
 0x1da   :  { %v4178_v22 = vpop.permute.xlu1 %1011  ;;  %1778 = vbcast.lane.b32.xlu0 %v1776_v15, 256  ;;  %v689_v15 = vmul.f32 %v4138_v43, %v4049_v53 }
 0x1db   :  { %5711 = vst [vmem:[#allocation20_spill] sm:$0xff] %v4178_v22 }
 0x1dc   :  { %1785 = vbcast.lane.b32.xlu1 %v1783_v27, 256  ;;  %v4181_v28 = vpop.permute.xlu0 %1156 }
 0x1dd   :  { %5712 = vst [vmem:[#allocation21_spill] sm:$0xff] %v4181_v28 }
 0x1de   :  { %v4184_v33 = vpop.permute.xlu1 %1163  ;;  %772 = vbcast.lane.b32.xlu0 %v770_v31, 256  ;;  %v1818_v31 = vrot.slane %v691_v14, %v3874_v23 }
 0x1df   :  { %5713 = vst [vmem:[#allocation22_spill] sm:$0xff] %v4184_v33 }
 0x1e0   :  { %779 = vbcast.lane.b32.xlu1 %v777_v51, 256  ;;  %v4187_v36 = vpop.permute.xlu0 %1308  ;;  %v690_v51 = vmul.f32 %v4141_v17, %v4057_v57  ;;  %v892_v57 = vrot.slane %v689_v15, %v3846_v9 }
 0x1e1   :  { %5714 = vst [vmem:[#allocation23_spill] sm:$0xff] %v4187_v36 }
 0x1e2   :  { %v4190_v37 = vpop.permute.xlu1 %1315  ;;  %908 = vbcast.lane.b32.xlu0 %v906_v55, 256  ;;  %v763_v53 = vrot.slane %v690_v51, %v3840_v7  ;;  %v899_v14 = vrot.slane %v690_v51, %v3846_v9 }
 0x1e3   :  { %5715 = vst [vmem:[#allocation24_spill] sm:$0xff] %v4190_v37 }
 0x1e4   :  { %915 = vbcast.lane.b32.xlu1 %v913_v26, 256  ;;  %v4193_v41 = vpop.permute.xlu0 %1460  ;;  %v1825_v26 = vrot.slane %v692_v45, %v3874_v23 }
 0x1e5   :  { %5716 = vst [vmem:[#allocation25_spill] sm:$0xff] %v4193_v41 }
 0x1e6   :  { %v4196_v32 = vpop.permute.xlu1 %1467  ;;  %1060 = vbcast.lane.b32.xlu0 %v1058_v19, 256 }
 0x1e7   :  { %5717 = vst [vmem:[#allocation26_spill] sm:$0xff] %v4196_v32 }
 0x1e8   :  { %1067 = vbcast.lane.b32.xlu1 %v1065_v46, 256  ;;  %v4199_v29 = vpop.permute.xlu0 %1612  ;;  %v756_v46 = vrot.slane %v689_v15, %v3840_v7 }
 0x1e9   :  { %5718 = vst [vmem:[#allocation27_spill] sm:$0xff] %v4199_v29 }
 0x1ea   :  { %v4202_v18 = vpop.permute.xlu1 %1619  ;;  %1212 = vbcast.lane.b32.xlu0 %v1210_v47, 256 }
 0x1eb   :  { %5719 = vst [vmem:[#allocation28_spill] sm:$0xff] %v4202_v18 }
 0x1ec   :  { %1219 = vbcast.lane.b32.xlu1 %v1217_v42, 256  ;;  %v4205_v34 = vpop.permute.xlu0 %1764  ;;  %v1044_v42 = vrot.slane %v689_v15, %v3837_v6 }
 0x1ed   :  { %5720 = vst [vmem:[#allocation29_spill] sm:$0xff] %v4205_v34 }
 0x1ee   :  { %v4208_v20 = vpop.permute.xlu1 %1771  ;;  %1364 = vbcast.lane.b32.xlu0 %v1362_v48, 256 }
 0x1ef   :  { %5721 = vst [vmem:[#allocation30_spill] sm:$0xff] %v4208_v20 }
 0x1f0   :  { %1371 = vbcast.lane.b32.xlu1 %v1369_v49, 256  ;;  %v4211_v52 = vpop.permute.xlu0 %702  ;;  %v1051_v49 = vrot.slane %v690_v51, %v3837_v6 }
 0x1f1   :  { %5722 = vst [vmem:[#allocation31_spill] sm:$0xff] %v4211_v52 }
 0x1f2   :  { %v4214_v56 = vpop.permute.xlu1 %709  ;;  %1516 = vbcast.lane.b32.xlu0 %v1514_v54, 256 }
 0x1f3   :  { %5723 = vst [vmem:[#allocation32_spill] sm:$0xff] %v4214_v56 }
 0x1f4   :  { %1523 = vbcast.lane.b32.xlu1 %v1521_v59, 256  ;;  %v4217_v61 = vpop.permute.xlu0 %838  ;;  %v1196_v59 = vrot.slane %v689_v15, %v3843_v8 }
 0x1f5   :  { %5724 = vst [vmem:[#allocation33_spill] sm:$0xff] %v4217_v61 }
 0x1f6   :  { %v4220_v5 = vpop.permute.xlu1 %845  ;;  %1668 = vbcast.lane.b32.xlu0 %v1666_v0, 256 }
 0x1f7   :  { %5725 = vst [vmem:[#allocation34_spill] sm:$0xff] %v4220_v5 }
 0x1f8   :  { %1675 = vbcast.lane.b32.xlu1 %v1673_v12, 256  ;;  %v4225_v27 = vpop.permute.xlu0 %990  ;;  %v1203_v12 = vrot.slane %v690_v51, %v3843_v8 }
 0x1f9   :  { %5726 = vst [vmem:[#allocation35_spill] sm:$0xff] %v4225_v27 }
 0x1fa   :  { %v4230_v55 = vpop.permute.xlu1 %997  ;;  %1820 = vbcast.lane.b32.xlu0 %v1818_v31, 256 }
 0x1fb   :  { %5727 = vst [vmem:[#allocation36_spill] sm:$0xff] %v4230_v55 }
 0x1fc   :  { %1827 = vbcast.lane.b32.xlu1 %v1825_v26, 256  ;;  %v4233_v19 = vpop.permute.xlu0 %1142  ;;  %v1348_v26 = vrot.slane %v689_v15, %v3862_v16 }
 0x1fd   :  { %5728 = vst [vmem:[#allocation37_spill] sm:$0xff] %v4233_v19 }
 0x1fe   :  { %v4236_v47 = vpop.permute.xlu1 %1149  ;;  %758 = vbcast.lane.b32.xlu0 %v756_v46, 256 }
 0x1ff   :  { %5729 = vst [vmem:[#allocation38_spill] sm:$0xff] %v4236_v47 }
 0x200   :  { %765 = vbcast.lane.b32.xlu1 %v763_v53, 256  ;;  %v4239_v43 = vpop.permute.xlu0 %1294  ;;  %v1355_v53 = vrot.slane %v690_v51, %v3862_v16 }
 0x201   :  { %5730 = vst [vmem:[#allocation39_spill] sm:$0xff] %v4239_v43 }
 0x202   :  { %v4242_v17 = vpop.permute.xlu1 %1301  ;;  %894 = vbcast.lane.b32.xlu0 %v892_v57, 256 }
 0x203   :  { %5731 = vst [vmem:[#allocation40_spill] sm:$0xff] %v4242_v17 }
 0x204   :  { %901 = vbcast.lane.b32.xlu1 %v899_v14, 256  ;;  %v4245_v45 = vpop.permute.xlu0 %1446  ;;  %v1500_v14 = vrot.slane %v689_v15, %v3856_v13 }
 0x205   :  { %5732 = vst [vmem:[#allocation41_spill] sm:$0xff] %v4245_v45 }
 0x206   :  { %v4248_v48 = vpop.permute.xlu1 %1453  ;;  %1046 = vbcast.lane.b32.xlu0 %v1044_v42, 256 }
 0x207   :  { %5733 = vst [vmem:[#allocation42_spill] sm:$0xff] %v4248_v48 }
 0x208   :  { %1053 = vbcast.lane.b32.xlu1 %v1051_v49, 256  ;;  %v4251_v54 = vpop.permute.xlu0 %1598  ;;  %v1507_v49 = vrot.slane %v690_v51, %v3856_v13 }
 0x209   :  { %5734 = vst [vmem:[#allocation43_spill] sm:$0xff] %v4251_v54 }
 0x20a   :  { %v4254_v0 = vpop.permute.xlu1 %1605  ;;  %1198 = vbcast.lane.b32.xlu0 %v1196_v59, 256 }
 0x20b   :  { %5735 = vst [vmem:[#allocation44_spill] sm:$0xff] %v4254_v0 }
 0x20c   :  { %1205 = vbcast.lane.b32.xlu1 %v1203_v12, 256  ;;  %v4257_v31 = vpop.permute.xlu0 %1750  ;;  %v1652_v12 = vrot.slane %v689_v15, %v3877_v24 }
 0x20d   :  { %5736 = vst [vmem:[#allocation45_spill] sm:$0xff] %v4257_v31 }
 0x20e   :  { %v4260_v46 = vpop.permute.xlu1 %1757  ;;  %1350 = vbcast.lane.b32.xlu0 %v1348_v26, 256  ;;  %v1659_v26 = vrot.slane %v690_v51, %v3877_v24 }
 0x20f   :  { %5737 = vst [vmem:[#allocation46_spill] sm:$0xff] %v4260_v46 }
 0x210   :  { %1357 = vbcast.lane.b32.xlu1 %v1355_v53, 256  ;;  %v4263_v57 = vpop.permute.xlu0 %744  ;;  %v4277_v53 = vmul.f32 %v4155_v44, %v4069_v63 }
 0x211   :  { %5738 = vst [vmem:[#allocation47_spill] sm:$0xff] %v4263_v57 }
 0x212   :  { %v4266_v42 = vpop.permute.xlu1 %751  ;;  %1502 = vbcast.lane.b32.xlu0 %v1500_v14, 256  ;;  %5742 = vst [vmem:[#allocation51_spill] sm:$0xff] %v4277_v53  ;;  %v1804_v14 = vrot.slane %v689_v15, %v3874_v23  ;;  %v798_v63 = vrot.slane %v4277_v53, %v3840_v7 }
 0x213   :  { %5739 = vst [vmem:[#allocation48_spill] sm:$0xff] %v4266_v42 }
 0x214   :  { %1509 = vbcast.lane.b32.xlu1 %v1507_v49, 256  ;;  %v4269_v59 = vpop.permute.xlu0 %880  ;;  %v4284_v49 = vmul.f32 %v4158_v58, %v4077_v11  ;;  %v934_v58 = vrot.slane %v4277_v53, %v3846_v9 }
 0x215   :  { %5740 = vst [vmem:[#allocation49_spill] sm:$0xff] %v4269_v59 }
 0x216   :  { %v4272_v1 = vpop.permute.xlu1 %887  ;;  %1654 = vbcast.lane.b32.xlu0 %v1652_v12, 256  ;;  %5744 = vst [vmem:[#allocation53_spill] sm:$0xff] %v4284_v49  ;;  %v1811_v12 = vrot.slane %v690_v51, %v3874_v23  ;;  %v805_v15 = vrot.slane %v4284_v49, %v3840_v7  ;;  %v941_v51 = vrot.slane %v4284_v49, %v3846_v9 }
 0x217   :  { %5741 = vst [vmem:[#allocation50_spill] sm:$0xff] %v4272_v1  ;;  %v1701_v42 = vrot.slane %v4284_v49, %v3877_v24 }
 0x218   :  { %1661 = vbcast.lane.b32.xlu1 %v1659_v26, 256  ;;  %v4279_v30 = vpop.permute.xlu0 %1032 }
 0x219   :  { %5743 = vst [vmem:[#allocation52_spill] sm:$0xff] %v4279_v30 }
 0x21a   :  { %v4286_v25 = vpop.permute.xlu1 %1039  ;;  %1806 = vbcast.lane.b32.xlu0 %v1804_v14, 256 }
 0x21b   :  { %5745 = vst [vmem:[#allocation54_spill] sm:$0xff] %v4286_v25  ;;  %v1694_v25 = vrot.slane %v4277_v53, %v3877_v24 }
 0x21c   :  { %1813 = vbcast.lane.b32.xlu1 %v1811_v12, 256  ;;  %v4289_v40 = vpop.permute.xlu0 %1184  ;;  %v1086_v12 = vrot.slane %v4277_v53, %v3837_v6 }
 0x21d   :  { %5746 = vst [vmem:[#allocation55_spill] sm:$0xff] %v4289_v40 }
 0x21e   :  { %v4293_v44 = vpop.permute.xlu1 %1191  ;;  %800 = vbcast.lane.b32.xlu0 %v798_v63, 256  ;;  %v3769_v63 = vmov 1983009808  }
 0x21f   :  { %5747 = vst [vmem:[#allocation56_spill] sm:$0xff] %v4293_v44  ;;  %v4309_v2 = vunpack.c.l.s4 %v3769_v63  ;;  %v4328_v63 = vmul.f32 %v4148_v35, %v4072_v3  ;;  %v4348_v3 = vrot.slane %v4089_v38, %v3843_v8 }
 0x220   :  { %807 = vbcast.lane.b32.xlu1 %v805_v15, 256  ;;  %v4297_v11 = vpop.permute.xlu0 %1336 }
 0x221   :  { %5748 = vst [vmem:[#allocation57_spill] sm:$0xff] %v4297_v11  ;;  %5751 = vst [vmem:[#allocation60_spill] sm:$0xff] %v4309_v2  ;;  %v1093_v11 = vrot.slane %v4284_v49, %v3837_v6  ;;  %v4364_v2 = vrot.slane %v4089_v38, %v3877_v24 }
 0x222   :  { %v4301_v26 = vpop.permute.xlu1 %1343  ;;  %936 = vbcast.lane.b32.xlu0 %v934_v58, 256 }
 0x223   :  { %5749 = vst [vmem:[#allocation58_spill] sm:$0xff] %v4301_v26  ;;  %v3770_v26 = vmov 1934713408  }
 0x224   :  { %943 = vbcast.lane.b32.xlu1 %v941_v51, 256  ;;  %v4305_v14 = vpop.permute.xlu0 %1488  ;;  %v1238_v51 = vrot.slane %v4277_v53, %v3843_v8  ;;  %v4320_v44 = vunpack.c.l.s4 %v3770_v26  ;;  %v4340_v26 = vrot.slane %v4089_v38, %v3846_v9 }
 0x225   :  { %5750 = vst [vmem:[#allocation59_spill] sm:$0xff] %v4305_v14  ;;  %v4336_v14 = vrot.slane %v4089_v38, %v3840_v7 }
 0x226   :  { %v4311_v15 = vpop.permute.xlu1 %1495  ;;  %1088 = vbcast.lane.b32.xlu0 %v1086_v12, 256  ;;  %5754 = vst [vmem:[#allocation63_spill] sm:$0xff] %v4320_v44  ;;  %v1245_v12 = vrot.slane %v4284_v49, %v3843_v8  ;;  %v4360_v44 = vrot.slane %v4089_v38, %v3856_v13  ;;  %v955_v46 = vmul.f32 %v4340_v26, %v4167_v4 }
 0x227   :  { %5752 = vst [vmem:[#allocation61_spill] sm:$0xff] %v4311_v15  ;;  %v1549_v15 = vrot.slane %v4284_v49, %v3856_v13  ;;  %v820_v24 = vmul.f32 %v4336_v14, %v4164_v62  ;;  %v817_v4 = vmul.f32 %v4336_v14, %v4211_v52 }
 0x228   :  { %1095 = vbcast.lane.b32.xlu1 %v1093_v11, 256  ;;  %v4315_v58 = vpop.permute.xlu0 %1640  ;;  %v4332_v11 = vmul.f32 %v4151_v50, %v4080_v21  ;;  %v4352_v21 = vrot.slane %v4089_v38, %v3862_v16  ;;  %v1390_v50 = vrot.slane %v4277_v53, %v3862_v16 }
 0x229   :  { %5753 = vst [vmem:[#allocation62_spill] sm:$0xff] %v4315_v58 }
 0x22a   :  { %v4322_v40 = vpop.permute.xlu1 %1647  ;;  %1240 = vbcast.lane.b32.xlu0 %v1238_v51, 256  ;;  %v4344_v51 = vrot.slane %v4089_v38, %v3837_v6 }
 0x22b   :  { %5755 = vst [vmem:[#allocation64_spill] sm:$0xff] %v4322_v40  ;;  %v4368_v40 = vrot.slane %v4089_v38, %v3874_v23  ;;  %v784_v38 = vrot.slane %v4328_v63, %v3840_v7 }
 0x22c   :  { %1247 = vbcast.lane.b32.xlu1 %v1245_v12, 256  ;;  %v4354_v35 = vpop.permute.xlu0 %1792  ;;  %v1397_v12 = vrot.slane %v4284_v49, %v3862_v16  ;;  %v1107_v23 = vmul.f32 %v4344_v51, %v4174_v39  ;;  %v1106_v62 = vmul.f32 %v4344_v51, %v4230_v55 }
 0x22d   :  { %5756 = vst [vmem:[#allocation65_spill] sm:$0xff] %v4354_v35  ;;  %v1542_v35 = vrot.slane %v4277_v53, %v3856_v13  ;;  %v956_v53 = vmul.f32 %v4340_v26, %v4170_v10  ;;  %v819_v10 = vmul.f32 %v4336_v14, %v4161_v60 }
 0x22e   :  { %v4372_v58 = vpop.permute.xlu1 %1799  ;;  %1392 = vbcast.lane.b32.xlu0 %v1390_v50, 256  ;;  %v953_v50 = vmul.f32 %v4340_v26, %v4217_v61  ;;  %v1108_v61 = vmul.f32 %v4344_v51, %v4178_v22  ;;  %v1259_v22 = vmul.f32 %v4348_v3, %v4181_v28 }
 0x22f   :  { %5757 = vst [vmem:[#allocation66_spill] sm:$0xff] %v4372_v58  ;;  %v954_v58 = vmul.f32 %v4340_v26, %v4220_v5  ;;  %v1105_v5 = vmul.f32 %v4344_v51, %v4225_v27  ;;  %v971_v60 = vadd.f32 %v955_v46, %v819_v10  ;;  %v972_v39 = vadd.f32 %v956_v53, %v820_v24 }
 0x230   :  { %1399 = vbcast.lane.b32.xlu1 %v1397_v12, 256  ;;  %v4394_v49 = vpop.permute.xlu0 %730  ;;  %v818_v12 = vmul.f32 %v4336_v14, %v4214_v56  ;;  %v969_v52 = vadd.f32 %v953_v50, %v817_v4  ;;  %v1257_v56 = vmul.f32 %v4348_v3, %v4233_v19  ;;  %v1258_v27 = vmul.f32 %v4348_v3, %v4236_v47 }
 0x231   :  { %5758 = vst [vmem:[#allocation67_spill] sm:$0xff] %v4394_v49  ;;  %v1123_v55 = vadd.f32 %v1107_v23, %v971_v60  ;;  %v1124_v10 = vadd.f32 %v1108_v61, %v972_v39  ;;  %v1411_v24 = vmul.f32 %v4352_v21, %v4187_v36  ;;  %v1412_v46 = vmul.f32 %v4352_v21, %v4190_v37  ;;  %v5778_v37 = vld [vmem:[#allocation56_spill] sm:$0xff] }
 0x232   :  { %v4416_v6 = vpop.permute.xlu1 %737  ;;  %1544 = vbcast.lane.b32.xlu0 %v1542_v35, 256  ;;  %v1260_v35 = vmul.f32 %v4348_v3, %v4184_v33  ;;  %v1410_v50 = vmul.f32 %v4352_v21, %v4242_v17  ;;  %v1563_v60 = vmul.f32 %v4360_v44, %v4193_v41  ;;  %v1564_v39 = vmul.f32 %v4360_v44, %v4196_v32  ;;  %v5779_v17 = vld [vmem:[#allocation57_spill] sm:$0xff]  ;;  %v3728_v33 = vld [vmem:[%s5514_s6 + $0x20] sm:$0xff]  }
 0x233   :  { %5759 = vst [vmem:[#allocation68_spill] sm:$0xff] %v4416_v6  ;;  %v970_v6 = vadd.f32 %v954_v58, %v818_v12  ;;  %v1409_v58 = vmul.f32 %v4352_v21, %v4239_v43  ;;  %v1275_v12 = vadd.f32 %v1259_v22, %v1123_v55  ;;  %v1715_v55 = vmul.f32 %v4364_v2, %v4199_v29 }
 0x234   :  { %1551 = vbcast.lane.b32.xlu1 %v1549_v15, 256  ;;  %v4430_v8 = vpop.permute.xlu0 %866  ;;  %v1121_v15 = vadd.f32 %v1105_v5, %v969_v52  ;;  %v1276_v23 = vadd.f32 %v1260_v35, %v1124_v10  ;;  %v1716_v35 = vmul.f32 %v4364_v2, %v4202_v18  ;;  %v5773_v18 = vld [vmem:[#allocation55_spill] sm:$0xff]  ;;  %v1264_v36 = vmul.f32 %v4348_v3, %v5778_v37 }
 0x235   :  { %5760 = vst [vmem:[#allocation69_spill] sm:$0xff] %v4430_v8  ;;  %v1122_v4 = vadd.f32 %v1106_v62, %v970_v6  ;;  %v1561_v6 = vmul.f32 %v4360_v44, %v4245_v45  ;;  %v1562_v62 = vmul.f32 %v4360_v44, %v4248_v48  ;;  %v1427_v5 = vadd.f32 %v1411_v24, %v1275_v12 }
 0x236   :  { %v4440_v53 = vpop.permute.xlu1 %873  ;;  %1696 = vbcast.lane.b32.xlu0 %v1694_v25, 256  ;;  %v1273_v25 = vadd.f32 %v1257_v56, %v1121_v15  ;;  %v1428_v22 = vadd.f32 %v1412_v46, %v1276_v23  ;;  %v1714_v15 = vmul.f32 %v4364_v2, %v4254_v0  ;;  %v5764_v46 = vrot.slane %v4332_v11, %v3840_v7  ;;  %v5771_v23 = vld [vmem:[#allocation48_spill] sm:$0xff] }
 0x237   :  { %5761 = vst [vmem:[#allocation70_spill] sm:$0xff] %v4440_v53  ;;  %v1274_v52 = vadd.f32 %v1258_v27, %v1122_v4  ;;  %v1713_v27 = vmul.f32 %v4364_v2, %v4251_v54  ;;  %v1579_v4 = vadd.f32 %v1563_v60, %v1427_v5  ;;  %v4485_v5 = vmul.f32 %v4368_v40, %v4205_v34  ;;  %v5775_v0 = vld [vmem:[#allocation4_spill] sm:$0xff] }
 0x238   :  { %1703 = vbcast.lane.b32.xlu1 %v1701_v42, 256  ;;  %v4450_v61 = vpop.permute.xlu0 %1018  ;;  %v1425_v42 = vadd.f32 %v1409_v58, %v1273_v25  ;;  %v1580_v24 = vadd.f32 %v1564_v39, %v1428_v22  ;;  %v959_v22 = vmul.f32 %v4340_v26, %v4269_v59  ;;  %v821_v60 = vmul.f32 %v4336_v14, %v4394_v49 }
 0x239   :  { %5762 = vst [vmem:[#allocation71_spill] sm:$0xff] %v4450_v61  ;;  %v1426_v56 = vadd.f32 %v1410_v50, %v1274_v52  ;;  %v4479_v39 = vadd.f32 %v1715_v55, %v1579_v4  ;;  %v823_v4 = vmul.f32 %v4336_v14, %v4263_v57  ;;  %v958_v25 = vmul.f32 %v4340_v26, %v4440_v53 }
 0x23a   :  { %v4460_v10 = vpop.permute.xlu1 %1025  ;;  %786 = vbcast.lane.b32.xlu0 %v784_v38, 256  ;;  %v1577_v58 = vadd.f32 %v1561_v6, %v1425_v42  ;;  %v4481_v52 = vadd.f32 %v1716_v35, %v1580_v24  ;;  %v5767_v6 = vrot.slane %v4328_v63, %v3846_v9  ;;  %v957_v42 = vmul.f32 %v4340_v26, %v4430_v8 }
 0x23b   :  { %5763 = vst [vmem:[#allocation72_spill] sm:$0xff] %v4460_v10  ;;  %v1578_v50 = vadd.f32 %v1562_v62, %v1426_v56  ;;  %v4496_v62 = vmul.f32 %v4368_v40, %v4208_v20  ;;  %v1865_v56 = vmul.f32 %v4368_v40, %v4257_v31  ;;  %v960_v24 = vmul.f32 %v4340_v26, %v4272_v1  ;;  %v5772_v31 = vld [vmem:[#allocation54_spill] sm:$0xff]  ;;  %v5777_v26 = vld [vmem:[#allocation68_spill] sm:$0xff] }
 0x23c   :  { %793 = vbcast.lane.b32.xlu1 %v5764_v46, 256  ;;  %v4469_v12 = vpop.permute.xlu0 %1170  ;;  %v4498_v55 = vadd.f32 %v1713_v27, %v1577_v58  ;;  %v5768_v27 = vrot.slane %v4332_v11, %v3846_v9  ;;  %v5770_v58 = vld [vmem:[#allocation46_spill] sm:$0xff]  ;;  %v1109_v38 = vmul.f32 %v4344_v51, %v4450_v61  ;;  %v824_v20 = vmul.f32 %v4336_v14, %v5771_v23 }
 0x23d   :  { %5765 = vst [vmem:[#allocation73_spill] sm:$0xff] %v4469_v12  ;;  %v1730_v35 = vadd.f32 %v1714_v15, %v1578_v50  ;;  %v1866_v50 = vmul.f32 %v4368_v40, %v5770_v58  ;;  %v975_v34 = vadd.f32 %v959_v22, %v823_v4  ;;  %v1263_v29 = vmul.f32 %v4348_v3, %v5773_v18 }
 0x23e   :  { %v4489_v46 = vpop.permute.xlu1 %1177  ;;  %922 = vbcast.lane.b32.xlu0 %v5767_v6, 256  ;;  %v1111_v6 = vmul.f32 %v4344_v51, %v4279_v30  ;;  %v5776_v54 = vrot.slane %v4328_v63, %v5775_v0  ;;  %v822_v32 = vmul.f32 %v4336_v14, %v5777_v26  ;;  %v973_v41 = vadd.f32 %v957_v42, %v821_v60 }
 0x23f   :  { %5766 = vst [vmem:[#allocation74_spill] sm:$0xff] %v4489_v46  ;;  %v1110_v48 = vmul.f32 %v4344_v51, %v4460_v10  ;;  %v1261_v22 = vmul.f32 %v4348_v3, %v4469_v12  ;;  %v976_v4 = vadd.f32 %v960_v24, %v824_v20  ;;  %v1415_v43 = vmul.f32 %v4352_v21, %v5779_v17  ;;  %v5783_v17 = vld [vmem:[#allocation59_spill] sm:$0xff] }
 0x240   :  { %929 = vbcast.lane.b32.xlu1 %v5768_v27, 256  ;;  %v4513_v15 = vpop.permute.xlu0 %1322  ;;  %v1112_v27 = vmul.f32 %v4344_v51, %v5772_v31  ;;  %v1127_v45 = vadd.f32 %v1111_v6, %v975_v34  ;;  %v974_v60 = vadd.f32 %v958_v25, %v822_v32  ;;  %v1125_v42 = vadd.f32 %v1109_v38, %v973_v41  ;;  %v5782_v6 = vld [vmem:[#allocation58_spill] sm:$0xff] }
 0x241   :  { %5769 = vst [vmem:[#allocation75_spill] sm:$0xff] %v4513_v15  ;;  %v1262_v51 = vmul.f32 %v4348_v3, %v4489_v46  ;;  %v1413_v34 = vmul.f32 %v4352_v21, %v4513_v15  ;;  %v1416_v37 = vmul.f32 %v4352_v21, %v5782_v6  ;;  %v1567_v18 = vmul.f32 %v4360_v44, %v5783_v17  ;;  %v5788_v17 = vld [vmem:[#allocation62_spill] sm:$0xff] }
 0x242   :  { %v4529_v58 = vpop.permute.xlu1 %1329  ;;  %1074 = vbcast.lane.b32.xlu0 %v5776_v54, 256  ;;  %v5780_v54 = vrot.slane %v4332_v11, %v5775_v0  ;;  %v1128_v20 = vadd.f32 %v1112_v27, %v976_v4  ;;  %v1279_v24 = vadd.f32 %v1263_v29, %v1127_v45  ;;  %v1126_v41 = vadd.f32 %v1110_v48, %v974_v60  ;;  %v5787_v27 = vld [vmem:[#allocation61_spill] sm:$0xff] }
 0x243   :  { %5774 = vst [vmem:[#allocation76_spill] sm:$0xff] %v4529_v58  ;;  %v1277_v38 = vadd.f32 %v1261_v22, %v1125_v42  ;;  %v1414_v3 = vmul.f32 %v4352_v21, %v4529_v58  ;;  %v1568_v4 = vmul.f32 %v4360_v44, %v5787_v27  ;;  %v1719_v6 = vmul.f32 %v4364_v2, %v5788_v17  ;;  %v3726_v58 = vld [vmem:[%s5514_s6 + $0x18] sm:$0xff]  }
 0x244   :  { %1081 = vbcast.lane.b32.xlu1 %v5780_v54, 256  ;;  %v4547_v14 = vpop.permute.xlu0 %1474  ;;  %v5785_v54 = vld [vmem:[#allocation6_spill] sm:$0xff]  ;;  %v1280_v45 = vadd.f32 %v1264_v36, %v1128_v20  ;;  %v1431_v25 = vadd.f32 %v1415_v43, %v1279_v24  ;;  %v1278_v22 = vadd.f32 %v1262_v51, %v1126_v41  ;;  %v1882_v43 = vadd.f32 %v1866_v50, %v1730_v35  ;;  %v5791_v24 = vld [vmem:[#allocation64_spill] sm:$0xff]  ;;  %v5794_v51 = vld [vmem:[#allocation65_spill] sm:$0xff] }
 0x245   :  { %5781 = vst [vmem:[#allocation77_spill] sm:$0xff] %v4547_v14  ;;  %v5786_v32 = vrot.slane %v4328_v63, %v5785_v54  ;;  %v1565_v29 = vmul.f32 %v4360_v44, %v4547_v14  ;;  %v5789_v15 = vrot.slane %v4332_v11, %v5785_v54  ;;  %v1429_v60 = vadd.f32 %v1413_v34, %v1277_v38 }
 0x246   :  { %v4557_v12 = vpop.permute.xlu1 %1481  ;;  %v1432_v42 = vadd.f32 %v1416_v37, %v1280_v45  ;;  %v1583_v20 = vadd.f32 %v1567_v18, %v1431_v25  ;;  %v1871_v34 = vmul.f32 %v4368_v40, %v5794_v51  ;;  %v1430_v41 = vadd.f32 %v1414_v3, %v1278_v22 }
 0x247   :  { %5784 = vst [vmem:[#allocation78_spill] sm:$0xff] %v4557_v12  ;;  %1226 = vbcast.lane.b32.xlu0 %v5786_v32, 256  ;;  %v1566_v21 = vmul.f32 %v4360_v44, %v4557_v12  ;;  %v1720_v32 = vmul.f32 %v4364_v2, %v5791_v24  ;;  %v1581_v44 = vadd.f32 %v1565_v29, %v1429_v60 }
 0x248   :  { %1233 = vbcast.lane.b32.xlu1 %v5789_v15, 256  ;;  %v4573_v48 = vpop.permute.xlu0 %1626  ;;  %v5793_v15 = vrot.slane %v4328_v63, %v3862_v16  ;;  %v1884_v37 = vadd.f32 %v4496_v62, %v4481_v52  ;;  %v1881_v18 = vadd.f32 %v1865_v56, %v4498_v55  ;;  %v1584_v35 = vadd.f32 %v1568_v4, %v1432_v42 }
 0x249   :  { %5790 = vst [vmem:[#allocation79_spill] sm:$0xff] %v4573_v48  ;;  %v1717_v36 = vmul.f32 %v4364_v2, %v4573_v48  ;;  %v1735_v50 = vadd.f32 %v1719_v6, %v1583_v20  ;;  %v5795_v45 = vrot.slane %v4332_v11, %v3862_v16  ;;  %v1582_v29 = vadd.f32 %v1566_v21, %v1430_v41  ;;  %v3723_v48 = vld [vmem:[%s5514_s6 + $0x50] sm:$0xff]  }
 0x24a   :  { %v4581_v17 = vpop.permute.xlu1 %1633  ;;  %v1883_v52 = vadd.f32 %v4485_v5, %v4479_v39  ;;  %v1913_v62 = vcombine.low %v1882_v43, %v1884_v37  ;;  %v1914_v55 = vcombine.high %v1882_v43, %v1884_v37  ;;  %v1736_v56 = vadd.f32 %v1720_v32, %v1584_v35  ;;  %v5802_v39 = vld [vmem:[#allocation60_spill] sm:$0xff] }
 0x24b   :  { %5792 = vst [vmem:[#allocation80_spill] sm:$0xff] %v4581_v17  ;;  %1378 = vbcast.lane.b32.xlu0 %v5793_v15, 256  ;;  %v1718_v38 = vmul.f32 %v4364_v2, %v4581_v17  ;;  %v5797_v15 = vld [vmem:[#allocation66_spill] sm:$0xff]  ;;  %v1733_v22 = vadd.f32 %v1717_v36, %v1581_v44  ;;  %v5799_v4 = vrot.slane %v4328_v63, %v3856_v13  ;;  %v5801_v44 = vld [vmem:[#allocation3_spill] sm:$0xff]  ;;  %v5803_v5 = vunpack.c.0.s8 %v5802_v39 }
 0x24c   :  { %1385 = vbcast.lane.b32.xlu1 %v5795_v45, 256  ;;  %v4596_v25 = vpop.permute.xlu0 %1778  ;;  %v1872_v3 = vmul.f32 %v4368_v40, %v5797_v15  ;;  %v1887_v42 = vadd.f32 %v1871_v34, %v1735_v50  ;;  %v1897_v32 = vcombine.low %v1881_v18, %v1883_v52  ;;  %v1898_v37 = vcombine.high %v1881_v18, %v1883_v52  ;;  %v3722_v17 = vld [vmem:[%s5514_s6 + $0x8] sm:$0xff]  }
 0x24d   :  { %5796 = vst [vmem:[#allocation81_spill] sm:$0xff] %v4596_v25  ;;  %v1869_v2 = vmul.f32 %v4368_v40, %v4596_v25  ;;  %v1734_v21 = vadd.f32 %v1718_v38, %v1582_v29  ;;  %v4616_v43 = vsub.s32 %v5803_v5, %v5801_v44  ;;  %v5805_v35 = vrot.slane %v4332_v11, %v3856_v13  ;;  %v5808_v38 = vld [vmem:[#allocation11_spill] sm:$0xff] }
 0x24e   :  { %v4604_v6 = vpop.permute.xlu1 %1785  ;;  %v4609_v60 = vpop.f32.mrb[4].mxu0  ;;  %v1680_v50 = vrot.slane %v4328_v63, %v5808_v38  ;;  %v1687_v18 = vrot.slane %v4332_v11, %v5808_v38 }
 0x24f   :  { %5798 = vst [vmem:[#allocation82_spill] sm:$0xff] %v4604_v6  ;;  %1530 = vbcast.lane.b32.xlu0 %v5799_v4, 256  ;;  %5800 = vst [vmem:[#allocation83_spill] sm:$0xff] %v4609_v60  ;;  %v1885_v36 = vadd.f32 %v1869_v2, %v1733_v22  ;;  %v1870_v20 = vmul.f32 %v4368_v40, %v4604_v6  ;;  %v3637_v41 = vpop.f32.mrb[5].mxu0  ;;  %v1888_v40 = vadd.f32 %v1872_v3, %v1736_v56 }
 0x250   :  { %5804 = vst [vmem:[#allocation3_spill] sm:$0xff] %v4616_v43  ;;  %1537 = vbcast.lane.b32.xlu1 %v5805_v35, 256  ;;  %v4621_v45 = vpop.permute.xlu0 %772  ;;  %v4623_v34 = vpop.f32.mrb[6].mxu0  ;;  %v5809_v41 = vld [vmem:[#allocation63_spill] sm:$0xff]  ;;  %v4633_v52 = vrot.slane %v1913_v62, %v4616_v43  ;;  %v4636_v35 = vrot.slane %v1914_v55, %v4616_v43  ;;  %v4639_v56 = vrot.slane %v1897_v32, %v4616_v43 }
 0x251   :  { %5806 = vst [vmem:[#allocation60_spill] sm:$0xff] %v4621_v45  ;;  %5807 = vst [vmem:[#allocation84_spill] sm:$0xff] %v4623_v34  ;;  %v1929_v29 = vcombine.low %v1885_v36, %v1887_v42  ;;  %v1930_v22 = vcombine.high %v1885_v36, %v1887_v42  ;;  %v1886_v2 = vadd.f32 %v1870_v20, %v1734_v21  ;;  %v3638_v4 = vpop.f32.mrb[7].mxu0  ;;  %v1965_v39 = vunpack.c.0.s8 %v5809_v41  ;;  %v5814_v36 = vld [vmem:[#allocation10_spill] sm:$0xff] }
 0x252   :  { %v4628_v5 = vpop.permute.xlu1 %779  ;;  %5811 = vst [vmem:[#allocation85_spill] sm:$0xff] %v4636_v35  ;;  %v4642_v42 = vrot.slane %v1898_v37, %v4616_v43  ;;  %v1832_v20 = vrot.slane %v4328_v63, %v5814_v36  ;;  %v1839_v63 = vrot.slane %v4332_v11, %v5814_v36  ;;  %v5822_v4 = vld [vmem:[#allocation51_spill] sm:$0xff] }
 0x253   :  { %5810 = vst [vmem:[#allocation63_spill] sm:$0xff] %v4628_v5  ;;  %1682 = vbcast.lane.b32.xlu0 %v1680_v50, 256  ;;  %v1945_v15 = vcombine.low %v1886_v2, %v1888_v40  ;;  %v1946_v3 = vcombine.high %v1886_v2, %v1888_v40  ;;  %v4649_v62 = vrot.slane %v1929_v29, %v4616_v43 }
 0x254   :  { %5812 = vst [vmem:[#allocation86_spill] sm:$0xff] %v4642_v42  ;;  %1689 = vbcast.lane.b32.xlu1 %v1687_v18, 256  ;;  %v4644_v21 = vpop.permute.xlu0 %908  ;;  %v4652_v55 = vrot.slane %v1930_v22, %v4616_v43  ;;  %v4661_v37 = vsub.s32 %v1965_v39, %v5801_v44  ;;  %v1961_v29 = vcombine.low %v4639_v56, %v4633_v52 }
 0x255   :  { %5813 = vst [vmem:[#allocation87_spill] sm:$0xff] %v4644_v21  ;;  %5815 = vst [vmem:[#allocation88_spill] sm:$0xff] %v4649_v62  ;;  %v4655_v50 = vrot.slane %v1945_v15, %v4616_v43  ;;  %v4658_v32 = vrot.slane %v1946_v3, %v4616_v43  ;;  %v1977_v22 = vcombine.low %v4642_v42, %v4636_v35  ;;  %v5826_v3 = vld [vmem:[#allocation53_spill] sm:$0xff] }
 0x256   :  { %5816 = vst [vmem:[#allocation89_spill] sm:$0xff] %v4652_v55  ;;  %5819 = vst [vmem:[#allocation92_spill] sm:$0xff] %v4661_v37  ;;  %v4663_v40 = vpop.permute.xlu1 %915  ;;  %v1846_v41 = vrot.slane %v5822_v4, %v5814_v36 }
 0x257   :  { %5817 = vst [vmem:[#allocation90_spill] sm:$0xff] %v4655_v50  ;;  %5818 = vst [vmem:[#allocation91_spill] sm:$0xff] %v4658_v32  ;;  %1834 = vbcast.lane.b32.xlu0 %v1832_v20, 256  ;;  %v1993_v15 = vcombine.low %v4649_v62, %v4655_v50  ;;  %v2009_v2 = vcombine.low %v4652_v55, %v4658_v32  ;;  %v1853_v20 = vrot.slane %v5826_v3, %v5814_v36 }
 0x258   :  { %5820 = vst [vmem:[#allocation93_spill] sm:$0xff] %v4663_v40  ;;  %1841 = vbcast.lane.b32.xlu1 %v1839_v63, 256  ;;  %v4675_v44 = vpop.permute.xlu0 %1060  ;;  %v4690_v51 = vrot.slane %v1977_v22, %v4661_v37  ;;  %v4693_v63 = vrot.slane %v1961_v29, %v4661_v37  ;;  %v3719_v29 = vld [vmem:[%s5514_s6 + $0x40] sm:$0xff]  }
 0x259   :  { %5821 = vst [vmem:[#allocation94_spill] sm:$0xff] %v4675_v44  ;;  %v4680_v11 = vrot.slane %v2009_v2, %v4661_v37  ;;  %v4683_v39 = vrot.slane %v1993_v15, %v4661_v37  ;;  %v3721_v15 = vld [vmem:[%s5514_s6 + $0x48] sm:$0xff]   ;;  %3557 = vmatprep.subr.bf16.mxu1 %v3719_v29  ;;  %v3724_v29 = vld [vmem:[%s5514_s6 + $0x10] sm:$0xff]   ;;  %v5861_v37 = vld [vmem:[#allocation14_spill] sm:$0xff] }
 0x25a   :  { %v4685_v18 = vpop.permute.xlu1 %1067  ;;  %5827 = vst [vmem:[#allocation53_spill] sm:$0xff] %v4690_v51  ;;  %5828 = vst [vmem:[#allocation97_spill] sm:$0xff] %v4693_v63  ;;  %v4811_v55 = vrot.slane %v5861_v37, %v3846_v9  ;;  %v4817_v62 = vrot.slane %v5861_v37, %v3840_v7  ;;  %v4825_v42 = vrot.slane %v5861_v37, %v5775_v0 }
 0x25b   :  { %5823 = vst [vmem:[#allocation51_spill] sm:$0xff] %v4680_v11  ;;  %5824 = vst [vmem:[#allocation95_spill] sm:$0xff] %v4683_v39  ;;  %1848 = vbcast.lane.b32.xlu0 %v1846_v41, 256  ;;  %v4831_v9 = vrot.slane %v5861_v37, %v5785_v54  ;;  %v4835_v7 = vrot.slane %v5861_v37, %v3862_v16  ;;  %v4853_v16 = vrot.slane %v5861_v37, %v5808_v38 }
 0x25c   :  { %5825 = vst [vmem:[#allocation96_spill] sm:$0xff] %v4685_v18  ;;  %1855 = vbcast.lane.b32.xlu1 %v1853_v20, 256  ;;  %v4695_v4 = vpop.permute.xlu0 %1212  ;;  %v3720_v20 = vld [vmem:[%s5514_s6] sm:$0xff]   ;;  %v963_v50 = vmul.f32 %v4811_v55, %v4644_v21  ;;  %v964_v43 = vmul.f32 %v4811_v55, %v4663_v40  ;;  %v4839_v21 = vrot.slane %v5861_v37, %v3856_v13 }
 0x25d   :  { %5829 = vst [vmem:[#allocation98_spill] sm:$0xff] %v4695_v4  ;;  %3558 = vmatpush3.bf16.msra.mxu1 %v3720_v20  ;;  %v3725_v20 = vld [vmem:[%s5514_s6 + $0x58] sm:$0xff]   ;;  %v827_v40 = vmul.f32 %v4817_v62, %v4621_v45  ;;  %v828_v0 = vmul.f32 %v4817_v62, %v4628_v5  ;;  %v1116_v54 = vmul.f32 %v4825_v42, %v4685_v18 }
 0x25e   :  { %v4701_v6 = vpop.permute.xlu1 %1219  ;;  %3559 = vmatprep.subr.bf16.mxu1 %v3721_v15  ;;  %v4857_v13 = vrot.slane %v5861_v37, %v5814_v36  ;;  %v1267_v18 = vmul.f32 %v4831_v9, %v4695_v4 }
 0x25f   :  { %5830 = vst [vmem:[#allocation99_spill] sm:$0xff] %v4701_v6 }
 0x260   :  { %v4703_v41 = vpop.permute.xlu0 %1364 }
 0x261   :  { %5831 = vst [vmem:[#allocation100_spill] sm:$0xff] %v4703_v41  ;;  %3560 = vmatpush3.bf16.msra.mxu1 %v3722_v17  ;;  %v3727_v17 = vld [vmem:[%s5514_s6 + $0x60] sm:$0xff]  }
 0x262   :  { %v4705_v3 = vpop.permute.xlu1 %1371  ;;  %3561 = vmatprep.subr.bf16.mxu1 %v3723_v48 }
 0x263   :  { %5832 = vst [vmem:[#allocation101_spill] sm:$0xff] %v4705_v3 }
 0x264   :  { %v4707_v22 = vpop.permute.xlu0 %1516 }
 0x265   :  { %5833 = vst [vmem:[#allocation102_spill] sm:$0xff] %v4707_v22  ;;  %3562 = vmatpush3.bf16.msra.mxu1 %v3724_v29 }
 0x266   :  { %v4709_v25 = vpop.permute.xlu1 %1523  ;;  %3563 = vmatprep.subr.bf16.mxu1 %v3725_v20 }
 0x267   :  { %5834 = vst [vmem:[#allocation103_spill] sm:$0xff] %v4709_v25 }
 0x268   :  { %v4720_v2 = vpop.permute.xlu0 %1668 }
 0x269   :  { %5835 = vst [vmem:[#allocation104_spill] sm:$0xff] %v4720_v2  ;;  %3564 = vmatpush3.bf16.msra.mxu1 %v3726_v58 }
 0x26a   :  { %v4722_v24 = vpop.permute.xlu1 %1675  ;;  %3565 = vmatprep.subr.bf16.mxu1 %v3727_v17 }
 0x26b   :  { %5836 = vst [vmem:[#allocation105_spill] sm:$0xff] %v4722_v24 }
 0x26c   :  { %v4730_v27 = vpop.permute.xlu0 %1820 }
 0x26d   :  { %5837 = vst [vmem:[#allocation106_spill] sm:$0xff] %v4730_v27  ;;  %3566 = vmatpush3.bf16.msra.mxu1 %v3728_v33 }
 0x26e   :  { %v4732_v12 = vpop.permute.xlu1 %1827 }
 0x26f   :  { %5838 = vst [vmem:[#allocation107_spill] sm:$0xff] %v4732_v12 }
 0x270   :  { %v4740_v14 = vpop.permute.xlu0 %758 }
 0x271   :  { %5839 = vst [vmem:[#allocation108_spill] sm:$0xff] %v4740_v14  ;;  %v825_v37 = vmul.f32 %v4817_v62, %v4740_v14 }
 0x272   :  { %v4742_v15 = vpop.permute.xlu1 %765 }
 0x273   :  { %5840 = vst [vmem:[#allocation109_spill] sm:$0xff] %v4742_v15  ;;  %v826_v36 = vmul.f32 %v4817_v62, %v4742_v15 }
 0x274   :  { %v4750_v46 = vpop.permute.xlu0 %894 }
 0x275   :  { %5841 = vst [vmem:[#allocation110_spill] sm:$0xff] %v4750_v46  ;;  %v961_v45 = vmul.f32 %v4811_v55, %v4750_v46 }
 0x276   :  { %v4752_v48 = vpop.permute.xlu1 %901 }
 0x277   :  { %5842 = vst [vmem:[#allocation111_spill] sm:$0xff] %v4752_v48  ;;  %v962_v5 = vmul.f32 %v4811_v55, %v4752_v48  ;;  %v977_v48 = vadd.f32 %v961_v45, %v825_v37 }
 0x278   :  { %v4757_v29 = vpop.permute.xlu0 %1046 }
 0x279   :  { %5843 = vst [vmem:[#allocation112_spill] sm:$0xff] %v4757_v29  ;;  %v1113_v46 = vmul.f32 %v4825_v42, %v4757_v29  ;;  %v978_v14 = vadd.f32 %v962_v5, %v826_v36 }
 0x27a   :  { %v4759_v28 = vpop.permute.xlu1 %1053 }
 0x27b   :  { %5844 = vst [vmem:[#allocation113_spill] sm:$0xff] %v4759_v28 }
 0x27c   :  { %v4761_v20 = vpop.permute.xlu0 %1198 }
 0x27d   :  { %v1265_v15 = vmul.f32 %v4831_v9, %v4761_v20 }
 0x27e   :  { %v4763_v47 = vpop.permute.xlu1 %1205 }
 0x27f   :  { %v1266_v29 = vmul.f32 %v4831_v9, %v4763_v47 }
 0x280   :  { %v4765_v19 = vpop.permute.xlu0 %1350 }
 0x281   :  { %5845 = vst [vmem:[#allocation114_spill] sm:$0xff] %v4765_v19  ;;  %v1417_v45 = vmul.f32 %v4835_v7, %v4765_v19 }
 0x282   :  { %v4767_v31 = vpop.permute.xlu1 %1357 }
 0x283   :  { %5846 = vst [vmem:[#allocation115_spill] sm:$0xff] %v4767_v31  ;;  %v1418_v5 = vmul.f32 %v4835_v7, %v4767_v31 }
 0x284   :  { %v4769_v30 = vpop.permute.xlu0 %1502 }
 0x285   :  { %5847 = vst [vmem:[#allocation116_spill] sm:$0xff] %v4769_v30 }
 0x286   :  { %v4771_v58 = vpop.permute.xlu1 %1509 }
 0x287   :  { %5848 = vst [vmem:[#allocation117_spill] sm:$0xff] %v4771_v58 }
 0x288   :  { %v4773_v10 = vpop.permute.xlu0 %1654 }
 0x289   :  { %5849 = vst [vmem:[#allocation118_spill] sm:$0xff] %v4773_v10 }
 0x28a   :  { %v4775_v17 = vpop.permute.xlu1 %1661 }
 0x28b   :  { %5850 = vst [vmem:[#allocation119_spill] sm:$0xff] %v4775_v17 }
 0x28c   :  { %v4777_v61 = vpop.permute.xlu0 %1806 }
 0x28d   :  { %5851 = vst [vmem:[#allocation120_spill] sm:$0xff] %v4777_v61 }
 0x28e   :  { %v4779_v1 = vpop.permute.xlu1 %1813 }
 0x28f   :  { %5852 = vst [vmem:[#allocation121_spill] sm:$0xff] %v4779_v1 }
 0x290   :  { %v4781_v33 = vpop.permute.xlu0 %800 }
 0x292   :  { %v4783_v59 = vpop.permute.xlu1 %807 }
 0x294   :  { %v4785_v53 = vpop.permute.xlu0 %936 }
 0x296   :  { %v4787_v8 = vpop.permute.xlu1 %943 }
 0x298   :  { %v4789_v23 = vpop.permute.xlu0 %1088 }
 0x29a   :  { %v4791_v57 = vpop.permute.xlu1 %1095 }
 0x29c   :  { %v4793_v26 = vpop.permute.xlu0 %1240 }
 0x29d   :  { %5853 = vst [vmem:[#allocation122_spill] sm:$0xff] %v4793_v26 }
 0x29e   :  { %v4795_v49 = vpop.permute.xlu1 %1247 }
 0x29f   :  { %5854 = vst [vmem:[#allocation123_spill] sm:$0xff] %v4795_v49 }
 0x2a0   :  { %v4797_v34 = vpop.permute.xlu0 %1392 }
 0x2a1   :  { %5855 = vst [vmem:[#allocation124_spill] sm:$0xff] %v4797_v34 }
 0x2a2   :  { %v4799_v60 = vpop.permute.xlu1 %1399 }
 0x2a3   :  { %5856 = vst [vmem:[#allocation125_spill] sm:$0xff] %v4799_v60 }
 0x2a4   :  { %v4801_v63 = vpop.permute.xlu0 %1544 }
 0x2a5   :  { %5857 = vst [vmem:[#allocation126_spill] sm:$0xff] %v4801_v63  ;;  %v1268_v63 = vmul.f32 %v4831_v9, %v4701_v6  ;;  %v1420_v6 = vmul.f32 %v4835_v7, %v4705_v3 }
 0x2a6   :  { %v4803_v39 = vpop.permute.xlu1 %1551 }
 0x2a7   :  { %5858 = vst [vmem:[#allocation127_spill] sm:$0xff] %v4803_v39  ;;  %v980_v39 = vadd.f32 %v964_v43, %v828_v0  ;;  %v1114_v0 = vmul.f32 %v4825_v42, %v4759_v28 }
 0x2a8   :  { %v4805_v51 = vpop.permute.xlu0 %1696 }
 0x2a9   :  { %5859 = vst [vmem:[#allocation128_spill] sm:$0xff] %v4805_v51  ;;  %v1130_v3 = vadd.f32 %v1114_v0, %v978_v14  ;;  %v1570_v14 = vmul.f32 %v4839_v21, %v4771_v58 }
 0x2aa   :  { %v4807_v11 = vpop.permute.xlu1 %1703 }
 0x2ab   :  { %5860 = vst [vmem:[#allocation129_spill] sm:$0xff] %v4807_v11  ;;  %v1115_v11 = vmul.f32 %v4825_v42, %v4675_v44  ;;  %v979_v44 = vadd.f32 %v963_v50, %v827_v40  ;;  %v1132_v50 = vadd.f32 %v1116_v54, %v980_v39  ;;  %v1419_v40 = vmul.f32 %v4835_v7, %v4703_v41 }
 0x2ac   :  { %v4813_v32 = vpop.permute.xlu0 %786  ;;  %v1571_v54 = vmul.f32 %v4839_v21, %v4707_v22  ;;  %v1129_v39 = vadd.f32 %v1113_v46, %v977_v48  ;;  %v1569_v46 = vmul.f32 %v4839_v21, %v4769_v30 }
 0x2ad   :  { %v1131_v43 = vadd.f32 %v1115_v11, %v979_v44  ;;  %v1284_v28 = vadd.f32 %v1268_v63, %v1132_v50  ;;  %v1572_v44 = vmul.f32 %v4839_v21, %v4709_v25  ;;  %v1724_v63 = vmul.f32 %v4853_v16, %v4722_v24 }
 0x2ae   :  { %v4827_v35 = vpop.permute.xlu1 %793  ;;  %v1281_v50 = vadd.f32 %v1265_v15, %v1129_v39  ;;  %v1282_v25 = vadd.f32 %v1266_v29, %v1130_v3  ;;  %v1721_v3 = vmul.f32 %v4853_v16, %v4773_v10  ;;  %v1722_v15 = vmul.f32 %v4853_v16, %v4775_v17 }
 0x2af   :  { %v1283_v60 = vadd.f32 %v1267_v18, %v1131_v43  ;;  %v1436_v37 = vadd.f32 %v1420_v6, %v1284_v28  ;;  %v1723_v18 = vmul.f32 %v4853_v16, %v4720_v2  ;;  %v1875_v28 = vmul.f32 %v4857_v13, %v4730_v27 }
 0x2b0   :  { %v4849_v51 = vpop.permute.xlu0 %922  ;;  %v1876_v6 = vmul.f32 %v4857_v13, %v4732_v12  ;;  %v1434_v24 = vadd.f32 %v1418_v5, %v1282_v25  ;;  %v967_v25 = vmul.f32 %v4811_v55, %v4785_v53 }
 0x2b1   :  { %v1435_v36 = vadd.f32 %v1419_v40, %v1283_v60  ;;  %v1588_v0 = vadd.f32 %v1572_v44, %v1436_v37  ;;  %v1433_v40 = vadd.f32 %v1417_v45, %v1281_v50  ;;  %v1874_v37 = vmul.f32 %v4857_v13, %v4779_v1 }
 0x2b2   :  { %v4867_v38 = vpop.permute.xlu1 %929 }
 0x2b3   :  { %v1587_v48 = vadd.f32 %v1571_v54, %v1435_v36  ;;  %v1740_v54 = vadd.f32 %v1724_v63, %v1588_v0  ;;  %v1585_v44 = vadd.f32 %v1569_v46, %v1433_v40  ;;  %v1586_v36 = vadd.f32 %v1570_v14, %v1434_v24 }
 0x2b4   :  { %v4881_v4 = vpop.permute.xlu0 %1074  ;;  %v965_v24 = vmul.f32 %v4811_v55, %v4849_v51  ;;  %v1873_v63 = vmul.f32 %v4857_v13, %v4777_v61  ;;  %v831_v46 = vmul.f32 %v4817_v62, %v4781_v33  ;;  %v968_v14 = vmul.f32 %v4811_v55, %v4787_v8 }
 0x2b5   :  { %v1739_v29 = vadd.f32 %v1723_v18, %v1587_v48  ;;  %v4929_v50 = vadd.f32 %v1876_v6, %v1740_v54  ;;  %v1737_v18 = vadd.f32 %v1721_v3, %v1585_v44  ;;  %v1738_v48 = vadd.f32 %v1722_v15, %v1586_v36 }
 0x2b6   :  { %v4891_v11 = vpop.permute.xlu1 %1081  ;;  %v1119_v0 = vmul.f32 %v4825_v42, %v4789_v23  ;;  %v829_v40 = vmul.f32 %v4817_v62, %v4813_v32  ;;  %v966_v3 = vmul.f32 %v4811_v55, %v4867_v38  ;;  %v1117_v15 = vmul.f32 %v4825_v42, %v4881_v4 }
 0x2b7   :  { %v4923_v45 = vadd.f32 %v1875_v28, %v1739_v29  ;;  %v4943_v6 = vadd.f32 %v1874_v37, %v1738_v48  ;;  %v832_v29 = vmul.f32 %v4817_v62, %v4783_v59  ;;  %v983_v54 = vadd.f32 %v967_v25, %v831_v46 }
 0x2b8   :  { %v1120_v44 = vmul.f32 %v4825_v42, %v4791_v57  ;;  %v1271_v36 = vmul.f32 %v4831_v9, %v4793_v26  ;;  %v830_v48 = vmul.f32 %v4817_v62, %v4827_v35  ;;  %v981_v12 = vadd.f32 %v965_v24, %v829_v40  ;;  %v5935_v26 = vld [vmem:[#allocation35_spill] sm:$0xff] }
 0x2b9   :  { %v4901_v43 = vpop.permute.xlu0 %1226  ;;  %v1118_v55 = vmul.f32 %v4825_v42, %v4891_v11  ;;  %v984_v1 = vadd.f32 %v968_v14, %v832_v29  ;;  %v1135_v25 = vadd.f32 %v1119_v0, %v983_v54  ;;  %v1272_v46 = vmul.f32 %v4831_v9, %v4795_v49  ;;  %v5867_v14 = vld [vmem:[#allocation125_spill] sm:$0xff]  ;;  %v5868_v29 = vld [vmem:[#allocation126_spill] sm:$0xff] }
 0x2ba   :  { %v4911_v60 = vpop.permute.xlu1 %1233  ;;  %v1269_v27 = vmul.f32 %v4831_v9, %v4901_v43  ;;  %v1423_v61 = vmul.f32 %v4835_v7, %v4797_v34  ;;  %v982_v17 = vadd.f32 %v966_v3, %v830_v48  ;;  %v1133_v10 = vadd.f32 %v1117_v15, %v981_v12  ;;  %v5932_v34 = vld [vmem:[#allocation111_spill] sm:$0xff] }
 0x2bb   :  { %v1270_v62 = vmul.f32 %v4831_v9, %v4911_v60  ;;  %v1136_v24 = vadd.f32 %v1120_v44, %v984_v1  ;;  %v1287_v40 = vadd.f32 %v1271_v36, %v1135_v25  ;;  %v1424_v0 = vmul.f32 %v4835_v7, %v5867_v14  ;;  %v5870_v1 = vld [vmem:[#allocation127_spill] sm:$0xff]  ;;  %v5871_v36 = vld [vmem:[#allocation128_spill] sm:$0xff] }
 0x2bc   :  { %v1575_v54 = vmul.f32 %v4839_v21, %v5868_v29  ;;  %v1134_v58 = vadd.f32 %v1118_v55, %v982_v17  ;;  %v1285_v30 = vadd.f32 %v1269_v27, %v1133_v10  ;;  %v1576_v44 = vmul.f32 %v4839_v21, %v5870_v1 }
 0x2bd   :  { %v4917_v39 = vpop.permute.xlu0 %1378  ;;  %v1288_v3 = vadd.f32 %v1272_v46, %v1136_v24  ;;  %v1439_v15 = vadd.f32 %v1423_v61, %v1287_v40  ;;  %v1727_v48 = vmul.f32 %v4853_v16, %v5871_v36  ;;  %v1889_v27 = vadd.f32 %v1873_v63, %v1737_v18  ;;  %v5873_v61 = vld [vmem:[#allocation129_spill] sm:$0xff] }
 0x2be   :  { %5862 = vst [vmem:[#allocation14_spill] sm:$0xff] %v4917_v39  ;;  %v4927_v5 = vpop.permute.xlu1 %1385  ;;  %v1421_v42 = vmul.f32 %v4835_v7, %v4917_v39  ;;  %v1286_v29 = vadd.f32 %v1270_v62, %v1134_v58  ;;  %v1728_v46 = vmul.f32 %v4853_v16, %v5873_v61  ;;  %v2050_v18 = vcombine.high %v4943_v6, %v4929_v50 }
 0x2bf   :  { %5863 = vst [vmem:[#allocation130_spill] sm:$0xff] %v4927_v5  ;;  %v1422_v12 = vmul.f32 %v4835_v7, %v4927_v5  ;;  %v1440_v17 = vadd.f32 %v1424_v0, %v1288_v3  ;;  %v1591_v55 = vadd.f32 %v1575_v54, %v1439_v15  ;;  %v2033_v3 = vcombine.low %v1889_v27, %v4923_v45  ;;  %v5934_v5 = vld [vmem:[#allocation93_spill] sm:$0xff] }
 0x2c0   :  { %v1437_v14 = vadd.f32 %v1421_v42, %v1285_v30  ;;  %v2034_v15 = vcombine.high %v1889_v27, %v4923_v45  ;;  %v5882_v27 = vld [vmem:[#allocation91_spill] sm:$0xff] }
 0x2c1   :  { %v4941_v28 = vpop.permute.xlu0 %1530  ;;  %v1438_v40 = vadd.f32 %v1422_v12, %v1286_v29  ;;  %v1592_v63 = vadd.f32 %v1576_v44, %v1440_v17  ;;  %v1743_v62 = vadd.f32 %v1727_v48, %v1591_v55  ;;  %v5876_v29 = vld [vmem:[#allocation85_spill] sm:$0xff]  ;;  %v5877_v12 = vld [vmem:[#allocation86_spill] sm:$0xff] }
 0x2c2   :  { %5864 = vst [vmem:[#allocation131_spill] sm:$0xff] %v4941_v28  ;;  %v4957_v37 = vpop.permute.xlu1 %1537  ;;  %v1573_v9 = vmul.f32 %v4839_v21, %v4941_v28  ;;  %v5929_v28 = vld [vmem:[#allocation49_spill] sm:$0xff] }
 0x2c3   :  { %5865 = vst [vmem:[#allocation132_spill] sm:$0xff] %v4957_v37  ;;  %v1574_v10 = vmul.f32 %v4839_v21, %v4957_v37  ;;  %v2049_v21 = vcombine.low %v4943_v6, %v4929_v50  ;;  %v1744_v50 = vadd.f32 %v1728_v46, %v1592_v63  ;;  %v5883_v46 = vld [vmem:[#allocation89_spill] sm:$0xff]  ;;  %v5928_v37 = vld [vmem:[#allocation70_spill] sm:$0xff] }
 0x2c4   :  { %v1589_v36 = vadd.f32 %v1573_v9, %v1437_v14  ;;  %v1978_v9 = vcombine.high %v5877_v12, %v5876_v29  ;;  %v2010_v63 = vcombine.high %v5883_v46, %v5882_v27 }
 0x2c5   :  { %v4969_v2 = vpop.permute.xlu0 %1682  ;;  %v1590_v0 = vadd.f32 %v1574_v10, %v1438_v40 }
 0x2c6   :  { %5866 = vst [vmem:[#allocation133_spill] sm:$0xff] %v4969_v2  ;;  %v4979_v22 = vpop.permute.xlu1 %1689  ;;  %v1725_v7 = vmul.f32 %v4853_v16, %v4969_v2 }
 0x2c7   :  { %5869 = vst [vmem:[#allocation134_spill] sm:$0xff] %v4979_v22  ;;  %v1726_v58 = vmul.f32 %v4853_v16, %v4979_v22 }
 0x2c8   :  { %v1741_v54 = vadd.f32 %v1725_v7, %v1589_v36  ;;  %v5879_v7 = vld [vmem:[#allocation3_spill] sm:$0xff] }
 0x2c9   :  { %v4989_v25 = vpop.permute.xlu0 %1834  ;;  %v1742_v44 = vadd.f32 %v1726_v58, %v1590_v0  ;;  %v2057_v17 = vrot.slane %v2049_v21, %v5879_v7  ;;  %v2064_v55 = vrot.slane %v2050_v18, %v5879_v7  ;;  %v2041_v58 = vrot.slane %v2033_v3, %v5879_v7  ;;  %v5884_v0 = vld [vmem:[#allocation92_spill] sm:$0xff] }
 0x2ca   :  { %5872 = vst [vmem:[#allocation135_spill] sm:$0xff] %v4989_v25  ;;  %v4997_v24 = vpop.permute.xlu1 %1841  ;;  %v1877_v30 = vmul.f32 %v4857_v13, %v4989_v25  ;;  %v5881_v25 = vld [vmem:[#allocation88_spill] sm:$0xff]  ;;  %v1992_v21 = vrot.slane %v1978_v9, %v5884_v0  ;;  %v5885_v18 = vcombine.high %v4639_v56, %v4633_v52  ;;  %v5886_v56 = vld [vmem:[#allocation51_spill] sm:$0xff] }
 0x2cb   :  { %5874 = vst [vmem:[#allocation136_spill] sm:$0xff] %v4997_v24  ;;  %v1878_v14 = vmul.f32 %v4857_v13, %v4997_v24  ;;  %v5880_v24 = vld [vmem:[#allocation90_spill] sm:$0xff]  ;;  %v3730_v3 = vld [vmem:[%s5514_s6 + $0x28] sm:$0xff]  }
 0x2cc   :  { %v1893_v48 = vadd.f32 %v1877_v30, %v1741_v54  ;;  %v1994_v45 = vcombine.high %v5881_v25, %v5880_v24  ;;  %v2048_v30 = vrot.slane %v2034_v15, %v5879_v7  ;;  %v1976_v54 = vrot.slane %v5885_v18, %v5884_v0  ;;  %v3729_v24 = vld [vmem:[%s5514_s6 + $0x68] sm:$0xff]  }
 0x2cd   :  { %v5007_v42 = vpop.permute.xlu0 %1848  ;;  %v1894_v40 = vadd.f32 %v1878_v14, %v1742_v44  ;;  %v2097_v14 = vcombine.low %v2041_v58, %v2057_v17  ;;  %3567 = vmatprep.subr.bf16.mxu1 %v3729_v24 }
 0x2ce   :  { %5875 = vst [vmem:[#allocation137_spill] sm:$0xff] %v5007_v42  ;;  %v1879_v16 = vmul.f32 %v4857_v13, %v5007_v42  ;;  %v5017_v6 = vpop.permute.xlu1 %1855  ;;  %v2114_v25 = vcombine.high %v2048_v30, %v2064_v55  ;;  %3568 = vmatpush3.bf16.msra.mxu1 %v3730_v3 }
 0x2cf   :  { %5878 = vst [vmem:[#allocation85_spill] sm:$0xff] %v5017_v6  ;;  %v1880_v36 = vmul.f32 %v4857_v13, %v5017_v6 }
 0x2d0   :  { %v1895_v10 = vadd.f32 %v1879_v16, %v1743_v62  ;;  %v2098_v16 = vcombine.high %v2041_v58, %v2057_v17  ;;  %v5889_v17 = vld [vmem:[#allocation97_spill] sm:$0xff] }
 0x2d1   :  { %v1896_v12 = vadd.f32 %v1880_v36, %v1744_v50  ;;  %v2113_v50 = vcombine.low %v2048_v30, %v2064_v55  ;;  %v5888_v36 = vld [vmem:[#allocation95_spill] sm:$0xff]  ;;  %v2105_v30 = vrot.slane %v2097_v14, %v5884_v0 }
 0x2d2   :  { %v2065_v42 = vcombine.low %v1893_v48, %v1895_v10  ;;  %v2066_v29 = vcombine.high %v1893_v48, %v1895_v10  ;;  %v5887_v48 = vld [vmem:[#allocation53_spill] sm:$0xff]  ;;  %v2026_v55 = vcombine.high %v5889_v17, %v5888_v36 }
 0x2d3   :  { %v2081_v62 = vcombine.low %v1894_v40, %v1896_v12  ;;  %v2082_v13 = vcombine.high %v1894_v40, %v1896_v12  ;;  %v2030_v10 = vcombine.high %v5887_v48, %v5886_v56  ;;  %v2024_v40 = vrot.slane %v2010_v63, %v5884_v0  ;;  %v3731_v63 = vld [vmem:[%s5514_s6 + $0x70] sm:$0xff]  }
 0x2d4   :  { %v2073_v15 = vrot.slane %v2065_v42, %v5879_v7  ;;  %v2080_v9 = vrot.slane %v2066_v29, %v5879_v7  ;;  %v2008_v12 = vrot.slane %v1994_v45, %v5884_v0  ;;  %v2121_v29 = vrot.slane %v2113_v50, %v5884_v0  ;;  %v3732_v45 = vld [vmem:[%s5514_s6 + $0x30] sm:$0xff]   ;;  %3569 = vmatprep.subr.bf16.mxu1 %v3731_v63 }
 0x2d5   :  { %v2089_v44 = vrot.slane %v2081_v62, %v5879_v7  ;;  %v2096_v52 = vrot.slane %v2082_v13, %v5879_v7  ;;  %v2128_v62 = vrot.slane %v2114_v25, %v5884_v0  ;;  %v2112_v13 = vrot.slane %v2098_v16, %v5884_v0  ;;  %3570 = vmatpush3.bf16.msra.mxu1 %v3732_v45 }
 0x2d6   :  { %v2031_v3 = vcombine.low %v1992_v21, %v2024_v40  ;;  %v2027_v25 = vcombine.low %v1976_v54, %v2008_v12  ;;  %v2028_v16 = vcombine.high %v1976_v54, %v2008_v12 }
 0x2d7   :  { %v2129_v27 = vcombine.low %v2073_v15, %v2089_v44  ;;  %v2130_v46 = vcombine.high %v2073_v15, %v2089_v44  ;;  %v2145_v42 = vcombine.low %v2080_v9, %v2096_v52  ;;  %v2146_v58 = vcombine.high %v2080_v9, %v2096_v52 }
 0x2d8   :  { %v2032_v15 = vcombine.high %v1992_v21, %v2024_v40  ;;  %v3734_v21 = vld [vmem:[%s5514_s6 + $0x38] sm:$0xff]  }
 0x2d9   :  { %v2153_v18 = vrot.slane %v2145_v42, %v5884_v0  ;;  %v2137_v24 = vrot.slane %v2129_v27, %v5884_v0  ;;  %v2160_v50 = vrot.slane %v2146_v58, %v5884_v0  ;;  %v2144_v14 = vrot.slane %v2130_v46, %v5884_v0  ;;  %v3733_v46 = vld [vmem:[%s5514_s6 + $0x78] sm:$0xff]  }
 0x2da   :  { %3571 = vmatprep.subr.bf16.mxu1 %v3733_v46 }
 0x2db   :  { %v2166_v9 = vcombine.high %v2121_v29, %v2153_v18  ;;  %v2162_v44 = vcombine.high %v2105_v30, %v2137_v24  ;;  %v2167_v52 = vcombine.low %v2128_v62, %v2160_v50  ;;  %v2163_v7 = vcombine.low %v2112_v13, %v2144_v14  ;;  %3572 = vmatpush3.bf16.msra.mxu1 %v3734_v21 }
 0x2dc   :  { %v2168_v6 = vcombine.high %v2128_v62, %v2160_v50  ;;  %v2164_v61 = vcombine.high %v2112_v13, %v2144_v14  ;;  %v2165_v22 = vcombine.low %v2121_v29, %v2153_v18  ;;  %v2161_v42 = vcombine.low %v2105_v30, %v2137_v24 }
 0x2dd   :  { %v3656_v2 = vpack.i.bf16 %v2166_v9, %v2030_v10  ;;  %v3661_v27 = vpack.i.bf16 %v2162_v44, %v2026_v55  ;;  %v3666_v1 = vpack.i.bf16 %v2167_v52, %v2031_v3  ;;  %v3671_v58 = vpack.i.bf16 %v2163_v7, %v2027_v25 }
 0x2de   :  { %v3676_v54 = vpack.i.bf16 %v2168_v6, %v2032_v15  ;;  %v3681_v40 = vpack.i.bf16 %v2164_v61, %v2028_v16  ;;  %v5890_v10 = vmov 0.0   ;;  %v5891_v18 = vcombine.low %v5887_v48, %v5886_v56 }
 0x2df   :  { %3657 = vrot.lane.b32.xlu0 %v3656_v2, %s3771_s11  ;;  %3662 = vrot.lane.b32.xlu1 %v3661_v27, %s3771_s11  ;;  %v5892_v14 = vcombine.low %v5889_v17, %v5888_v36 }
 0x2e0   :  { %3639 = vmatprep.subr.bf16.mxu1 %v5890_v10 }
 0x2e3   :  { %3667 = vrot.lane.b32.xlu0 %v3666_v1, %s3772_s12  ;;  %3672 = vrot.lane.b32.xlu1 %v3671_v58, %s3772_s12 }
 0x2e7   :  { %3677 = vrot.lane.b32.xlu0 %v3676_v54, %s3773_s13  ;;  %3682 = vrot.lane.b32.xlu1 %v3681_v40, %s3773_s13  ;;  %v3735_v54 = vld [vmem:[%s5514_s6 + $0x110] sm:$0xff]   ;;  %v3736_v40 = vld [vmem:[%s5514_s6 + $0x118] sm:$0xff]  }
 0x351   :  { %v3658_v61 = vpop.permute.xlu0 %3657  ;;  %v3663_v6 = vpop.permute.xlu1 %3662 }
 0x352   :  { %v3660_v7 = vunpack.i.h.bf16 %v3658_v61  ;;  %v3659_v2 = vunpack.i.l.bf16 %v3658_v61  ;;  %v3665_v55 = vunpack.i.h.bf16 %v3663_v6  ;;  %v3664_v12 = vunpack.i.l.bf16 %v3663_v6  ;;  %v3737_v61 = vld [vmem:[%s5514_s6 + $0xd0] sm:$0xff]  }
 0x353   :  { %v3738_v6 = vld [vmem:[%s5514_s6 + $0x90] sm:$0xff]   ;;  %3582 = vmatprep.subr.bf16.mxu0 %v3737_v61 }
 0x354   :  { %v2227_v1 = vsel %vm2217_vm5, %v2165_v22, %v3660_v7  ;;  %v2226_v24 = vsel %vm2217_vm5, %v5891_v18, %v3659_v2  ;;  %v2219_v50 = vsel %vm2217_vm5, %v2161_v42, %v3665_v55  ;;  %v2218_v3 = vsel %vm2217_vm5, %v5892_v14, %v3664_v12  ;;  %v3739_v7 = vld [vmem:[%s5514_s6 + $0xd8] sm:$0xff]   ;;  %3583 = vmatpush3.bf16.msra.mxu0 %v3738_v6  ;;  %v3742_v55 = vld [vmem:[%s5514_s6 + $0xa0] sm:$0xff]   ;;  %v3743_v12 = vld [vmem:[%s5514_s6 + $0xe8] sm:$0xff]  }
 0x355   :  { %v3668_v29 = vpop.permute.xlu0 %3667  ;;  %v3673_v30 = vpop.permute.xlu1 %3672  ;;  %v3740_v2 = vld [vmem:[%s5514_s6 + $0x98] sm:$0xff]   ;;  %3584 = vmatprep.subr.bf16.mxu0 %v3739_v7  ;;  %v5905_v7 = vld [vmem:[#allocation8_spill] sm:$0xff] }
 0x356   :  { %v3670_v62 = vunpack.i.h.bf16 %v3668_v29  ;;  %v3669_v13 = vunpack.i.l.bf16 %v3668_v29  ;;  %v3675_v63 = vunpack.i.h.bf16 %v3673_v30  ;;  %v3674_v45 = vunpack.i.l.bf16 %v3673_v30  ;;  %v3744_v29 = vld [vmem:[%s5514_s6 + $0xa8] sm:$0xff]   ;;  %v5903_v61 = vld [vmem:[#allocation9_spill] sm:$0xff] }
 0x358   :  { %v2228_v22 = vsel %vm2220_vm10, %v2226_v24, %v3669_v13  ;;  %v2229_v27 = vsel %vm2220_vm10, %v2227_v1, %v3670_v62  ;;  %v2221_v56 = vsel %vm2220_vm10, %v2218_v3, %v3674_v45  ;;  %v2222_v48 = vsel %vm2220_vm10, %v2219_v50, %v3675_v63  ;;  %3585 = vmatpush3.bf16.msra.mxu0 %v3740_v2  ;;  %v3745_v62 = vld [vmem:[%s5514_s6 + $0xf0] sm:$0xff]   ;;  %v3476_v1 = vld [vmem:[%s5517_s7] ss:$0 sm:$0xff]  ;;  %v5893_v50 = vld [vmem:[#allocation83_spill] sm:$0xff] }
 0x359   :  { %v3678_v25 = vpop.permute.xlu0 %3677  ;;  %v3683_v15 = vpop.permute.xlu1 %3682  ;;  %v3746_v24 = vld [vmem:[%s5514_s6 + $0xb0] sm:$0xff]  }
 0x35a   :  { %v3680_v16 = vunpack.i.h.bf16 %v3678_v25  ;;  %v3679_v9 = vunpack.i.l.bf16 %v3678_v25  ;;  %v3685_v44 = vunpack.i.h.bf16 %v3683_v15  ;;  %v3684_v52 = vunpack.i.l.bf16 %v3683_v15  ;;  %v5894_v15 = vld [vmem:[#allocation84_spill] sm:$0xff] }
 0x35c   :  { %v2224_v42 = vsel %vm2223_vm13, %v2221_v56, %v3684_v52  ;;  %v2225_v36 = vsel %vm2223_vm13, %v2222_v48, %v3685_v44  ;;  %v2230_v17 = vsel %vm2223_vm13, %v2228_v22, %v3679_v9  ;;  %v2231_v58 = vsel %vm2223_vm13, %v2229_v27, %v3680_v16  ;;  %v5895_v52 = vld [vmem:[#allocation12_spill] sm:$0xff]  ;;  %v5897_v56 = vld [vmem:[#allocation5_spill] sm:$0xff] }
 0x35d   :  { %v2232_v46 = vpack.c.bf16 %v2225_v36, %v2224_v42  ;;  %v2233_v21 = vpack.c.bf16 %v2231_v58, %v2230_v17  ;;  %v5898_v42 = vld [vmem:[#allocation13_spill] sm:$0xff]  ;;  %v5900_v17 = vld [vmem:[#allocation7_spill] sm:$0xff] }
 0x35f   :  { %2414 = vmatprep.mubr.bf16.mxu1 %v2233_v21 }
 0x360   :  { %2415 = vmatmul.mubr.bf16.vlgmr.msra.gmra.mrb[16].mxu1 %v2232_v46  ;;  %v5901_v46 = vld [vmem:[#allocation4_spill] sm:$0xff] }
 0x361   :  { %3643 = vmatprep.mubr.msk.bf16.mxu1 %vm3768_vm4, %v5890_v10  ;;  %3640 = vmatpush3.bf16.msra.mxu1 %v3735_v54  ;;  %v5902_v54 = vld [vmem:[#allocation6_spill] sm:$0xff]  ;;  %vm3389_vm4 = vcmask 1041409  }
 0x362   :  { %3641 = vmatprep.subr.bf16.mxu1 %v5890_v10  ;;  %v3741_v10 = vld [vmem:[%s5514_s6 + $0xe0] sm:$0xff]  }
 0x363   :  { %3586 = vmatprep.subr.bf16.mxu0 %v3741_v10 }
 0x364   :  { %3587 = vmatpush3.bf16.msra.mxu0 %v3742_v55  ;;  %v5907_v55 = vld [vmem:[#allocation31_spill] sm:$0xff] }
 0x365   :  { %3642 = vmatpush3.bf16.msra.mxu1 %v3736_v40  ;;  %3588 = vmatprep.subr.bf16.mxu0 %v3743_v12 }
 0x368   :  { %3589 = vmatpush3.bf16.msra.mxu0 %v3744_v29  ;;  %v5908_v29 = vld [vmem:[#allocation11_spill] sm:$0xff] }
 0x369   :  { %3590 = vmatprep.subr.bf16.mxu0 %v3745_v62 }
 0x36c   :  { %3591 = vmatpush3.bf16.msra.mxu0 %v3746_v24 }
 0x433   :  { %v3573_v30 = vpop.f32.mrb[16].mxu1 }
 0x434   :  { %v3574_v13 = vpop.f32.mrb[17].mxu1 }
 0x435   :  { %v3575_v63 = vadd.f32 %v3574_v13, %v3573_v30  ;;  %v3576_v45 = vpop.f32.mrb[18].mxu1  ;;  %v5910_v13 = vld [vmem:[#allocation32_spill] sm:$0xff] }
 0x436   :  { %v3577_v18 = vpop.f32.mrb[19].mxu1 }
 0x437   :  { %v2458_v14 = vadd.f32 %v3575_v63, %v5893_v50  ;;  %v3578_v3 = vadd.f32 %v3577_v18, %v3576_v45  ;;  %v5911_v45 = vld [vmem:[#allocation15_spill] sm:$0xff]  ;;  %v5912_v18 = vld [vmem:[#allocation16_spill] sm:$0xff] }
 0x439   :  { %v2471_v25 = vadd.f32 %v3476_v1, %v2458_v14  ;;  %v2461_v16 = vadd.f32 %v3578_v3, %v5894_v15 }
 0x43b   :  { %3753 = vtanh.f32 %v2471_v25  ;;  %v2472_v9 = vadd.f32 %v3476_v1, %v2461_v16  ;;  %v5915_v16 = vld [vmem:[#allocation67_spill] sm:$0xff] }
 0x43d   :  { %3755 = vtanh.f32 %v2472_v9 }
 0x445   :  { %v3754_v44 = vpop.eup %3753 }
 0x446   :  { %v5140_v22 = vmul.f32 %v3754_v44, %v5895_v52  ;;  %v5916_v44 = vld [vmem:[#allocation68_spill] sm:$0xff]  ;;  %v5922_v52 = vld [vmem:[#allocation63_spill] sm:$0xff] }
 0x447   :  { %v3756_v27 = vpop.eup %3755 }
 0x448   :  { %5896 = vst [vmem:[#allocation86_spill] sm:$0xff] %v5140_v22  ;;  %v2480_v48 = vrot.slane %v5140_v22, %v5897_v56  ;;  %v5145_v36 = vmul.f32 %v3756_v27, %v5898_v42  ;;  %v2504_v58 = vrot.slane %v5140_v22, %v5900_v17  ;;  %v5151_v21 = vrot.slane %v5140_v22, %v5901_v46 }
 0x449   :  { %v5155_v40 = vrot.slane %v5140_v22, %v5902_v54  ;;  %v5159_v6 = vrot.slane %v5140_v22, %v5903_v61  ;;  %v5163_v2 = vrot.slane %v5140_v22, %v5905_v7  ;;  %v5170_v30 = vrot.slane %v5140_v22, %v5908_v29  ;;  %v5927_v29 = vld [vmem:[#allocation69_spill] sm:$0xff] }
 0x44a   :  { %5899 = vst [vmem:[#allocation90_spill] sm:$0xff] %v5145_v36  ;;  %v2484_v10 = vrot.slane %v5145_v36, %v5897_v56  ;;  %v2485_v12 = vmul.f32 %v2480_v48, %v5907_v55  ;;  %v3115_v62 = vpack.c.bf16 %v5145_v36, %v5140_v22  ;;  %v2486_v63 = vmul.f32 %v2480_v48, %v5910_v13  ;;  %v5917_v56 = vld [vmem:[#allocation47_spill] sm:$0xff]  ;;  %v5923_v22 = vld [vmem:[#allocation33_spill] sm:$0xff] }
 0x44b   :  { %5904 = vst [vmem:[#allocation88_spill] sm:$0xff] %v5159_v6  ;;  %5906 = vst [vmem:[#allocation91_spill] sm:$0xff] %v5163_v2  ;;  %v2487_v1 = vmul.f32 %v2480_v48, %v5911_v45  ;;  %v2488_v24 = vmul.f32 %v2480_v48, %v5912_v18  ;;  %v2508_v50 = vrot.slane %v5145_v36, %v5900_v17  ;;  %v5920_v45 = vld [vmem:[#allocation109_spill] sm:$0xff]  ;;  %v5931_v2 = vld [vmem:[#allocation110_spill] sm:$0xff] }
 0x44c   :  { %5909 = vst [vmem:[#allocation89_spill] sm:$0xff] %v5170_v30  ;;  %v5181_v14 = vrot.slane %v5145_v36, %v5901_v46  ;;  %v5185_v3 = vrot.slane %v5145_v36, %v5902_v54  ;;  %v5189_v25 = vrot.slane %v5145_v36, %v5903_v61  ;;  %v5193_v15 = vrot.slane %v5145_v36, %v5905_v7  ;;  %v5918_v46 = vld [vmem:[#allocation48_spill] sm:$0xff]  ;;  %v5924_v30 = vld [vmem:[#allocation34_spill] sm:$0xff] }
 0x44d   :  { %3644 = vmatmul.mubr.msk.bf16.vlgmr.msra.gmra.mrb[20].mxu1 %vm2217_vm5, %v3115_v62  ;;  %v2489_v9 = vmul.f32 %v2480_v48, %v5915_v16  ;;  %v2490_v27 = vmul.f32 %v2480_v48, %v5916_v44  ;;  %v2491_v17 = vmul.f32 %v2480_v48, %v5917_v56  ;;  %v2492_v55 = vmul.f32 %v2480_v48, %v5918_v46  ;;  %v5919_v54 = vld [vmem:[#allocation108_spill] sm:$0xff]  ;;  %v5925_v46 = vld [vmem:[#allocation17_spill] sm:$0xff]  ;;  %v5926_v36 = vld [vmem:[#allocation18_spill] sm:$0xff] }
 0x44e   :  { %5913 = vst [vmem:[#allocation51_spill] sm:$0xff] %v5189_v25  ;;  %5914 = vst [vmem:[#allocation53_spill] sm:$0xff] %v5193_v15  ;;  %v2493_v13 = vmul.f32 %v2484_v10, %v5919_v54  ;;  %v2494_v18 = vmul.f32 %v2484_v10, %v5920_v45  ;;  %v5921_v61 = vld [vmem:[#allocation60_spill] sm:$0xff]  ;;  %v2496_v0 = vmul.f32 %v2484_v10, %v5922_v52  ;;  %v5930_v15 = vld [vmem:[#allocation50_spill] sm:$0xff] }
 0x44f   :  { %v2495_v42 = vmul.f32 %v2484_v10, %v5921_v61  ;;  %v2497_v7 = vmul.f32 %v2484_v10, %v4813_v32  ;;  %v2498_v62 = vmul.f32 %v2484_v10, %v4827_v35  ;;  %v2499_v16 = vmul.f32 %v2484_v10, %v4781_v33 }
 0x450   :  { %v2500_v44 = vmul.f32 %v2484_v10, %v4783_v59  ;;  %v2509_v56 = vmul.f32 %v2504_v58, %v5923_v22  ;;  %v2510_v48 = vmul.f32 %v2504_v58, %v5924_v30  ;;  %v2511_v54 = vmul.f32 %v2504_v58, %v5925_v46  ;;  %v5933_v10 = vld [vmem:[#allocation87_spill] sm:$0xff] }
 0x451   :  { %v2512_v45 = vmul.f32 %v2504_v58, %v5926_v36  ;;  %v2513_v61 = vmul.f32 %v2504_v58, %v5927_v29  ;;  %v2514_v52 = vmul.f32 %v2504_v58, %v5928_v37  ;;  %v2515_v32 = vmul.f32 %v2504_v58, %v5929_v28 }
 0x452   :  { %v2516_v35 = vmul.f32 %v2504_v58, %v5930_v15  ;;  %v2517_v33 = vmul.f32 %v2508_v50, %v5931_v2  ;;  %v2518_v59 = vmul.f32 %v2508_v50, %v5932_v34  ;;  %v2519_v22 = vmul.f32 %v2508_v50, %v5933_v10 }
 0x453   :  { %v2520_v30 = vmul.f32 %v2508_v50, %v5934_v5  ;;  %v2521_v46 = vmul.f32 %v2508_v50, %v4849_v51  ;;  %v2522_v36 = vmul.f32 %v2508_v50, %v4867_v38  ;;  %v2523_v29 = vmul.f32 %v2508_v50, %v4785_v53 }
 0x454   :  { %v2524_v37 = vmul.f32 %v2508_v50, %v4787_v8  ;;  %v2525_v39 = vadd.f32 %v2509_v56, %v2485_v12  ;;  %v2526_v28 = vadd.f32 %v2510_v48, %v2486_v63  ;;  %v2527_v41 = vadd.f32 %v2511_v54, %v2487_v1  ;;  %v5936_v8 = vld [vmem:[#allocation36_spill] sm:$0xff]  ;;  %v5937_v63 = vld [vmem:[#allocation19_spill] sm:$0xff] }
 0x455   :  { %v2528_v58 = vadd.f32 %v2512_v45, %v2488_v24  ;;  %v2529_v15 = vadd.f32 %v2513_v61, %v2489_v9  ;;  %v2530_v2 = vadd.f32 %v2514_v52, %v2490_v27  ;;  %v2531_v31 = vadd.f32 %v2515_v32, %v2491_v17  ;;  %v5938_v24 = vld [vmem:[#allocation20_spill] sm:$0xff]  ;;  %v5939_v9 = vld [vmem:[#allocation71_spill] sm:$0xff] }
 0x456   :  { %v2532_v34 = vadd.f32 %v2516_v35, %v2492_v55  ;;  %v2533_v25 = vadd.f32 %v2517_v33, %v2493_v13  ;;  %v2534_v10 = vadd.f32 %v2518_v59, %v2494_v18  ;;  %v2535_v19 = vadd.f32 %v2519_v22, %v2495_v42  ;;  %v5941_v17 = vld [vmem:[#allocation52_spill] sm:$0xff]  ;;  %v5942_v13 = vld [vmem:[#allocation54_spill] sm:$0xff] }
 0x457   :  { %v2536_v5 = vadd.f32 %v2520_v30, %v2496_v0  ;;  %v2537_v6 = vadd.f32 %v2521_v46, %v2497_v7  ;;  %v2538_v51 = vadd.f32 %v2522_v36, %v2498_v62  ;;  %v2539_v49 = vadd.f32 %v2523_v29, %v2499_v16  ;;  %v5940_v0 = vld [vmem:[#allocation72_spill] sm:$0xff]  ;;  %v5944_v62 = vld [vmem:[#allocation113_spill] sm:$0xff] }
 0x458   :  { %v2540_v38 = vadd.f32 %v2524_v37, %v2500_v44  ;;  %v2549_v53 = vmul.f32 %v5151_v21, %v5935_v26  ;;  %v2550_v12 = vmul.f32 %v5151_v21, %v5936_v8  ;;  %v2551_v1 = vmul.f32 %v5151_v21, %v5937_v63  ;;  %v5943_v18 = vld [vmem:[#allocation112_spill] sm:$0xff]  ;;  %v5945_v44 = vld [vmem:[#allocation94_spill] sm:$0xff] }
 0x459   :  { %v2552_v50 = vmul.f32 %v5151_v21, %v5938_v24  ;;  %v2553_v42 = vmul.f32 %v5151_v21, %v5939_v9  ;;  %v2554_v27 = vmul.f32 %v5151_v21, %v5940_v0  ;;  %v2555_v55 = vmul.f32 %v5151_v21, %v5941_v17  ;;  %v5946_v48 = vld [vmem:[#allocation96_spill] sm:$0xff] }
 0x45a   :  { %v2556_v26 = vmul.f32 %v5151_v21, %v5942_v13  ;;  %v2557_v7 = vmul.f32 %v5181_v14, %v5943_v18  ;;  %v2558_v16 = vmul.f32 %v5181_v14, %v5944_v62  ;;  %v2559_v56 = vmul.f32 %v5181_v14, %v5945_v44 }
 0x45b   :  { %v2560_v54 = vmul.f32 %v5181_v14, %v5946_v48  ;;  %v2561_v45 = vmul.f32 %v5181_v14, %v4881_v4  ;;  %v2562_v61 = vmul.f32 %v5181_v14, %v4891_v11  ;;  %v2563_v21 = vmul.f32 %v5181_v14, %v4789_v23  ;;  %v5947_v23 = vld [vmem:[#allocation37_spill] sm:$0xff] }
 0x45c   :  { %v2564_v52 = vmul.f32 %v5181_v14, %v4791_v57  ;;  %v2565_v32 = vadd.f32 %v2549_v53, %v2525_v39  ;;  %v2566_v35 = vadd.f32 %v2550_v12, %v2526_v28  ;;  %v2567_v33 = vadd.f32 %v2551_v1, %v2527_v41  ;;  %v5948_v57 = vld [vmem:[#allocation38_spill] sm:$0xff]  ;;  %v5949_v41 = vld [vmem:[#allocation21_spill] sm:$0xff]  ;;  %v5956_v53 = vld [vmem:[#allocation99_spill] sm:$0xff] }
 0x45d   :  { %v2568_v59 = vadd.f32 %v2552_v50, %v2528_v58  ;;  %v2569_v22 = vadd.f32 %v2553_v42, %v2529_v15  ;;  %v2570_v30 = vadd.f32 %v2554_v27, %v2530_v2  ;;  %v2571_v46 = vadd.f32 %v2555_v55, %v2531_v31  ;;  %v5950_v28 = vld [vmem:[#allocation22_spill] sm:$0xff]  ;;  %v5954_v2 = vld [vmem:[#allocation56_spill] sm:$0xff]  ;;  %v5958_v27 = vld [vmem:[#allocation123_spill] sm:$0xff] }
 0x45e   :  { %v2572_v36 = vadd.f32 %v2556_v26, %v2532_v34  ;;  %v2573_v29 = vadd.f32 %v2557_v7, %v2533_v25  ;;  %v2574_v37 = vadd.f32 %v2558_v16, %v2534_v10  ;;  %v2575_v4 = vadd.f32 %v2559_v56, %v2535_v19  ;;  %v5951_v25 = vld [vmem:[#allocation73_spill] sm:$0xff]  ;;  %v5952_v58 = vld [vmem:[#allocation74_spill] sm:$0xff] }
 0x45f   :  { %v2576_v8 = vadd.f32 %v2560_v54, %v2536_v5  ;;  %v2577_v63 = vadd.f32 %v2561_v45, %v2537_v6  ;;  %v2578_v11 = vadd.f32 %v2562_v61, %v2538_v51  ;;  %v2579_v24 = vadd.f32 %v2563_v21, %v2539_v49  ;;  %v5953_v49 = vld [vmem:[#allocation55_spill] sm:$0xff]  ;;  %v5955_v51 = vld [vmem:[#allocation98_spill] sm:$0xff]  ;;  %v5960_v21 = vld [vmem:[#allocation88_spill] sm:$0xff] }
 0x460   :  { %v2580_v9 = vadd.f32 %v2564_v52, %v2540_v38  ;;  %v2589_v0 = vmul.f32 %v5155_v40, %v5947_v23  ;;  %v2590_v39 = vmul.f32 %v5155_v40, %v5948_v57  ;;  %v2591_v14 = vmul.f32 %v5155_v40, %v5949_v41  ;;  %v5957_v42 = vld [vmem:[#allocation122_spill] sm:$0xff]  ;;  %v5959_v61 = vld [vmem:[#allocation39_spill] sm:$0xff]  ;;  %v5971_v57 = vld [vmem:[#allocation100_spill] sm:$0xff] }
 0x461   :  { %v2592_v31 = vmul.f32 %v5155_v40, %v5950_v28  ;;  %v2593_v19 = vmul.f32 %v5155_v40, %v5951_v25  ;;  %v2594_v6 = vmul.f32 %v5155_v40, %v5952_v58  ;;  %v2595_v15 = vmul.f32 %v5155_v40, %v5953_v49  ;;  %v5970_v23 = vld [vmem:[#allocation115_spill] sm:$0xff]  ;;  %v5972_v41 = vld [vmem:[#allocation101_spill] sm:$0xff]  ;;  %v5973_v28 = vld [vmem:[#allocation14_spill] sm:$0xff] }
 0x462   :  { %v2596_v34 = vmul.f32 %v5155_v40, %v5954_v2  ;;  %v2597_v10 = vmul.f32 %v5185_v3, %v4761_v20  ;;  %v2598_v5 = vmul.f32 %v5185_v3, %v4763_v47  ;;  %v2599_v38 = vmul.f32 %v5185_v3, %v5955_v51  ;;  %v5974_v25 = vld [vmem:[#allocation130_spill] sm:$0xff]  ;;  %v5975_v58 = vld [vmem:[#allocation124_spill] sm:$0xff]  ;;  %v5976_v49 = vld [vmem:[#allocation125_spill] sm:$0xff] }
 0x463   :  { %v2600_v12 = vmul.f32 %v5185_v3, %v5956_v53  ;;  %v2601_v1 = vmul.f32 %v5185_v3, %v4901_v43  ;;  %v2602_v50 = vmul.f32 %v5185_v3, %v4911_v60  ;;  %v2603_v40 = vmul.f32 %v5185_v3, %v5957_v42 }
 0x464   :  { %v2604_v20 = vmul.f32 %v5185_v3, %v5958_v27  ;;  %v2605_v17 = vadd.f32 %v2589_v0, %v2565_v32  ;;  %v2606_v47 = vadd.f32 %v2590_v39, %v2566_v35  ;;  %v2607_v55 = vadd.f32 %v2591_v14, %v2567_v33  ;;  %v5961_v3 = vld [vmem:[#allocation40_spill] sm:$0xff]  ;;  %v5962_v35 = vld [vmem:[#allocation23_spill] sm:$0xff] }
 0x465   :  { %v2608_v13 = vadd.f32 %v2592_v31, %v2568_v59  ;;  %v2609_v26 = vadd.f32 %v2593_v19, %v2569_v22  ;;  %v2610_v18 = vadd.f32 %v2594_v6, %v2570_v30  ;;  %v2611_v7 = vadd.f32 %v2595_v15, %v2571_v46  ;;  %v5963_v59 = vld [vmem:[#allocation24_spill] sm:$0xff]  ;;  %v5964_v30 = vld [vmem:[#allocation75_spill] sm:$0xff] }
 0x466   :  { %v2612_v62 = vadd.f32 %v2596_v34, %v2572_v36  ;;  %v2613_v16 = vadd.f32 %v2597_v10, %v2573_v29  ;;  %v2614_v44 = vadd.f32 %v2598_v5, %v2574_v37  ;;  %v2615_v43 = vadd.f32 %v2599_v38, %v2575_v4  ;;  %v5965_v36 = vld [vmem:[#allocation76_spill] sm:$0xff]  ;;  %v5966_v37 = vld [vmem:[#allocation57_spill] sm:$0xff] }
 0x467   :  { %v2616_v56 = vadd.f32 %v2600_v12, %v2576_v8  ;;  %v2617_v48 = vadd.f32 %v2601_v1, %v2577_v63  ;;  %v2618_v60 = vadd.f32 %v2602_v50, %v2578_v11  ;;  %v2619_v54 = vadd.f32 %v2603_v40, %v2579_v24  ;;  %v5967_v8 = vld [vmem:[#allocation58_spill] sm:$0xff]  ;;  %v5969_v24 = vld [vmem:[#allocation51_spill] sm:$0xff] }
 0x468   :  { %v2620_v45 = vadd.f32 %v2604_v20, %v2580_v9  ;;  %v2629_v52 = vmul.f32 %v5960_v21, %v5959_v61  ;;  %v2630_v32 = vmul.f32 %v5960_v21, %v5961_v3  ;;  %v2631_v33 = vmul.f32 %v5960_v21, %v5962_v35  ;;  %v5968_v11 = vld [vmem:[#allocation114_spill] sm:$0xff]  ;;  %v5977_v3 = vld [vmem:[#allocation41_spill] sm:$0xff]  ;;  %v5978_v35 = vld [vmem:[#allocation91_spill] sm:$0xff] }
 0x469   :  { %v2632_v22 = vmul.f32 %v5960_v21, %v5963_v59  ;;  %v2633_v46 = vmul.f32 %v5960_v21, %v5964_v30  ;;  %v2634_v29 = vmul.f32 %v5960_v21, %v5965_v36  ;;  %v2635_v4 = vmul.f32 %v5960_v21, %v5966_v37  ;;  %v5979_v30 = vld [vmem:[#allocation42_spill] sm:$0xff] }
 0x46a   :  { %v2636_v63 = vmul.f32 %v5960_v21, %v5967_v8  ;;  %v2637_v9 = vmul.f32 %v5969_v24, %v5968_v11  ;;  %v2638_v0 = vmul.f32 %v5969_v24, %v5970_v23  ;;  %v2639_v39 = vmul.f32 %v5969_v24, %v5971_v57 }
 0x46b   :  { %v2640_v14 = vmul.f32 %v5969_v24, %v5972_v41  ;;  %v2641_v31 = vmul.f32 %v5969_v24, %v5973_v28  ;;  %v2642_v19 = vmul.f32 %v5969_v24, %v5974_v25  ;;  %v2643_v6 = vmul.f32 %v5969_v24, %v5975_v58  ;;  %v5995_v58 = vld [vmem:[#allocation11_spill] sm:$0xff] }
 0x46c   :  { %v2644_v15 = vmul.f32 %v5969_v24, %v5976_v49  ;;  %v2645_v2 = vadd.f32 %v2629_v52, %v2605_v17  ;;  %v2646_v34 = vadd.f32 %v2630_v32, %v2606_v47  ;;  %v2647_v10 = vadd.f32 %v2631_v33, %v2607_v55  ;;  %v5980_v47 = vld [vmem:[#allocation25_spill] sm:$0xff]  ;;  %v5989_v33 = vld [vmem:[#allocation102_spill] sm:$0xff]  ;;  %v5994_v24 = vld [vmem:[#allocation127_spill] sm:$0xff] }
 0x46d   :  { %v2648_v5 = vadd.f32 %v2632_v22, %v2608_v13  ;;  %v2649_v51 = vadd.f32 %v2633_v46, %v2609_v26  ;;  %v2650_v38 = vadd.f32 %v2634_v29, %v2610_v18  ;;  %v2651_v53 = vadd.f32 %v2635_v4, %v2611_v7  ;;  %v5981_v13 = vld [vmem:[#allocation26_spill] sm:$0xff]  ;;  %v5982_v18 = vld [vmem:[#allocation77_spill] sm:$0xff]  ;;  %v5990_v46 = vld [vmem:[#allocation103_spill] sm:$0xff] }
 0x46e   :  { %v2652_v12 = vadd.f32 %v2636_v63, %v2612_v62  ;;  %v2653_v1 = vadd.f32 %v2637_v9, %v2613_v16  ;;  %v2654_v50 = vadd.f32 %v2638_v0, %v2614_v44  ;;  %v2655_v42 = vadd.f32 %v2639_v39, %v2615_v43  ;;  %v5983_v62 = vld [vmem:[#allocation78_spill] sm:$0xff]  ;;  %v5984_v44 = vld [vmem:[#allocation59_spill] sm:$0xff]  ;;  %v5988_v52 = vld [vmem:[#allocation117_spill] sm:$0xff] }
 0x46f   :  { %v2656_v40 = vadd.f32 %v2640_v14, %v2616_v56  ;;  %v2657_v27 = vadd.f32 %v2641_v31, %v2617_v48  ;;  %v2658_v20 = vadd.f32 %v2642_v19, %v2618_v60  ;;  %v2659_v61 = vadd.f32 %v2643_v6, %v2619_v54  ;;  %v5985_v56 = vld [vmem:[#allocation61_spill] sm:$0xff]  ;;  %v5986_v60 = vld [vmem:[#allocation116_spill] sm:$0xff]  ;;  %v5991_v29 = vld [vmem:[#allocation131_spill] sm:$0xff] }
 0x470   :  { %v2660_v21 = vadd.f32 %v2644_v15, %v2620_v45  ;;  %v2669_v59 = vmul.f32 %v5978_v35, %v5977_v3  ;;  %v2670_v17 = vmul.f32 %v5978_v35, %v5979_v30  ;;  %v2671_v55 = vmul.f32 %v5978_v35, %v5980_v47  ;;  %v5987_v54 = vld [vmem:[#allocation53_spill] sm:$0xff]  ;;  %v5992_v4 = vld [vmem:[#allocation132_spill] sm:$0xff]  ;;  %v5993_v63 = vld [vmem:[#allocation126_spill] sm:$0xff] }
 0x471   :  { %v2672_v26 = vmul.f32 %v5978_v35, %v5981_v13  ;;  %v2673_v7 = vmul.f32 %v5978_v35, %v5982_v18  ;;  %v2674_v16 = vmul.f32 %v5978_v35, %v5983_v62  ;;  %v2675_v43 = vmul.f32 %v5978_v35, %v5984_v44  ;;  %v5996_v6 = vld [vmem:[#allocation90_spill] sm:$0xff]  ;;  %v5997_v18 = vld [vmem:[#allocation43_spill] sm:$0xff] }
 0x472   :  { %v2676_v48 = vmul.f32 %v5978_v35, %v5985_v56  ;;  %v2677_v45 = vmul.f32 %v5987_v54, %v5986_v60  ;;  %v2678_v32 = vmul.f32 %v5987_v54, %v5988_v52  ;;  %v2679_v22 = vmul.f32 %v5987_v54, %v5989_v33  ;;  %v6013_v52 = vld [vmem:[#allocation129_spill] sm:$0xff] }
 0x473   :  { %v2680_v36 = vmul.f32 %v5987_v54, %v5990_v46  ;;  %v2681_v37 = vmul.f32 %v5987_v54, %v5991_v29  ;;  %v2682_v8 = vmul.f32 %v5987_v54, %v5992_v4  ;;  %v2683_v11 = vmul.f32 %v5987_v54, %v5993_v63 }
 0x474   :  { %v2684_v9 = vmul.f32 %v5987_v54, %v5994_v24  ;;  %v2685_v23 = vadd.f32 %v2669_v59, %v2645_v2  ;;  %v2686_v0 = vadd.f32 %v2670_v17, %v2646_v34  ;;  %v2687_v57 = vadd.f32 %v2671_v55, %v2647_v10  ;;  %v5998_v2 = vld [vmem:[#allocation89_spill] sm:$0xff]  ;;  %v5999_v10 = vld [vmem:[#allocation44_spill] sm:$0xff]  ;;  %v6006_v59 = vld [vmem:[#allocation118_spill] sm:$0xff] }
 0x475   :  { %v2688_v39 = vadd.f32 %v2672_v26, %v2648_v5  ;;  %v2689_v41 = vadd.f32 %v2673_v7, %v2649_v51  ;;  %v2690_v14 = vadd.f32 %v2674_v16, %v2650_v38  ;;  %v2691_v28 = vadd.f32 %v2675_v43, %v2651_v53  ;;  %v6000_v51 = vld [vmem:[#allocation27_spill] sm:$0xff]  ;;  %v6001_v53 = vld [vmem:[#allocation28_spill] sm:$0xff]  ;;  %v6009_v16 = vld [vmem:[#allocation105_spill] sm:$0xff] }
 0x476   :  { %v2692_v31 = vadd.f32 %v2676_v48, %v2652_v12  ;;  %v2693_v25 = vadd.f32 %v2677_v45, %v2653_v1  ;;  %v2694_v19 = vadd.f32 %v2678_v32, %v2654_v50  ;;  %v2708_v49 = vrot.slane %v5996_v6, %v5995_v58  ;;  %v6002_v1 = vld [vmem:[#allocation79_spill] sm:$0xff]  ;;  %v6008_v7 = vld [vmem:[#allocation104_spill] sm:$0xff]  ;;  %v6010_v43 = vld [vmem:[#allocation133_spill] sm:$0xff] }
 0x477   :  { %v2695_v15 = vadd.f32 %v2679_v22, %v2655_v42  ;;  %v2696_v3 = vadd.f32 %v2680_v36, %v2656_v40  ;;  %v2697_v35 = vadd.f32 %v2681_v37, %v2657_v27  ;;  %v2698_v30 = vadd.f32 %v2682_v8, %v2658_v20  ;;  %v6003_v42 = vld [vmem:[#allocation80_spill] sm:$0xff]  ;;  %v6004_v27 = vld [vmem:[#allocation62_spill] sm:$0xff]  ;;  %v6007_v55 = vld [vmem:[#allocation119_spill] sm:$0xff] }
 0x478   :  { %v2699_v47 = vadd.f32 %v2683_v11, %v2659_v61  ;;  %v2700_v13 = vadd.f32 %v2684_v9, %v2660_v21  ;;  %v2709_v34 = vmul.f32 %v5998_v2, %v5997_v18  ;;  %v2710_v5 = vmul.f32 %v5998_v2, %v5999_v10  ;;  %v6005_v61 = vld [vmem:[#allocation64_spill] sm:$0xff]  ;;  %v6011_v48 = vld [vmem:[#allocation134_spill] sm:$0xff] }
 0x479   :  { %v2711_v38 = vmul.f32 %v5998_v2, %v6000_v51  ;;  %v2712_v12 = vmul.f32 %v5998_v2, %v6001_v53  ;;  %v2713_v50 = vmul.f32 %v5998_v2, %v6002_v1  ;;  %v2714_v40 = vmul.f32 %v5998_v2, %v6003_v42  ;;  %v6012_v54 = vld [vmem:[#allocation128_spill] sm:$0xff]  ;;  %v6014_v58 = vld [vmem:[#allocation10_spill] sm:$0xff]  ;;  %v6027_v42 = vld [vmem:[#allocation107_spill] sm:$0xff] }
 0x47a   :  { %v2715_v20 = vmul.f32 %v5998_v2, %v6004_v27  ;;  %v2716_v21 = vmul.f32 %v5998_v2, %v6005_v61  ;;  %v2717_v17 = vmul.f32 %v2708_v49, %v6006_v59  ;;  %v2718_v26 = vmul.f32 %v2708_v49, %v6007_v55  ;;  %v6015_v18 = vld [vmem:[#allocation86_spill] sm:$0xff]  ;;  %v6028_v27 = vld [vmem:[#allocation135_spill] sm:$0xff]  ;;  %v6029_v61 = vld [vmem:[#allocation136_spill] sm:$0xff] }
 0x47b   :  { %v2719_v62 = vmul.f32 %v2708_v49, %v6008_v7  ;;  %v2720_v44 = vmul.f32 %v2708_v49, %v6009_v16  ;;  %v2721_v56 = vmul.f32 %v2708_v49, %v6010_v43  ;;  %v2722_v60 = vmul.f32 %v2708_v49, %v6011_v48  ;;  %v6026_v1 = vld [vmem:[#allocation106_spill] sm:$0xff]  ;;  %v6030_v59 = vld [vmem:[#allocation137_spill] sm:$0xff] }
 0x47c   :  { %v2723_v45 = vmul.f32 %v2708_v49, %v6012_v54  ;;  %v2724_v32 = vmul.f32 %v2708_v49, %v6013_v52  ;;  %v2725_v33 = vadd.f32 %v2709_v34, %v2685_v23  ;;  %v2726_v22 = vadd.f32 %v2710_v5, %v2686_v0  ;;  %v6021_v34 = vld [vmem:[#allocation82_spill] sm:$0xff]  ;;  %v6031_v55 = vld [vmem:[#allocation85_spill] sm:$0xff] }
 0x47d   :  { %v2727_v46 = vadd.f32 %v2711_v38, %v2687_v57  ;;  %v2728_v36 = vadd.f32 %v2712_v12, %v2688_v39  ;;  %v2729_v29 = vadd.f32 %v2713_v50, %v2689_v41  ;;  %v2730_v37 = vadd.f32 %v2714_v40, %v2690_v14  ;;  %v6016_v57 = vld [vmem:[#allocation45_spill] sm:$0xff]  ;;  %v6017_v41 = vld [vmem:[#allocation46_spill] sm:$0xff] }
 0x47e   :  { %v2731_v4 = vadd.f32 %v2715_v20, %v2691_v28  ;;  %v2732_v8 = vadd.f32 %v2716_v21, %v2692_v31  ;;  %v2733_v63 = vadd.f32 %v2717_v17, %v2693_v25  ;;  %v2734_v11 = vadd.f32 %v2718_v26, %v2694_v19  ;;  %v6018_v28 = vld [vmem:[#allocation29_spill] sm:$0xff]  ;;  %v6019_v25 = vld [vmem:[#allocation30_spill] sm:$0xff] }
 0x47f   :  { %v2735_v24 = vadd.f32 %v2719_v62, %v2695_v15  ;;  %v2736_v9 = vadd.f32 %v2720_v44, %v2696_v3  ;;  %v2744_v2 = vrot.slane %v6015_v18, %v6014_v58  ;;  %v2748_v10 = vrot.slane %v5996_v6, %v6014_v58  ;;  %v6020_v15 = vld [vmem:[#allocation81_spill] sm:$0xff]  ;;  %v6023_v12 = vld [vmem:[#allocation66_spill] sm:$0xff] }
 0x480   :  { %v2737_v51 = vadd.f32 %v2721_v56, %v2697_v35  ;;  %v2738_v49 = vadd.f32 %v2722_v60, %v2698_v30  ;;  %v2739_v23 = vadd.f32 %v2723_v45, %v2699_v47  ;;  %v2740_v0 = vadd.f32 %v2724_v32, %v2700_v13  ;;  %v6022_v38 = vld [vmem:[#allocation65_spill] sm:$0xff]  ;;  %v6024_v35 = vld [vmem:[#allocation120_spill] sm:$0xff] }
 0x481   :  { %v2749_v39 = vmul.f32 %v2744_v2, %v6016_v57  ;;  %v2750_v14 = vmul.f32 %v2744_v2, %v6017_v41  ;;  %v2751_v31 = vmul.f32 %v2744_v2, %v6018_v28  ;;  %v2752_v19 = vmul.f32 %v2744_v2, %v6019_v25  ;;  %v6025_v47 = vld [vmem:[#allocation121_spill] sm:$0xff] }
 0x482   :  { %v2753_v3 = vmul.f32 %v2744_v2, %v6020_v15  ;;  %v2754_v5 = vmul.f32 %v2744_v2, %v6021_v34  ;;  %v2755_v53 = vmul.f32 %v2744_v2, %v6022_v38  ;;  %v2756_v6 = vmul.f32 %v2744_v2, %v6023_v12 }
 0x483   :  { %v2757_v30 = vmul.f32 %v2748_v10, %v6024_v35  ;;  %v2758_v13 = vmul.f32 %v2748_v10, %v6025_v47  ;;  %v2759_v50 = vmul.f32 %v2748_v10, %v6026_v1  ;;  %v2760_v40 = vmul.f32 %v2748_v10, %v6027_v42 }
 0x484   :  { %v2761_v20 = vmul.f32 %v2748_v10, %v6028_v27  ;;  %v2762_v21 = vmul.f32 %v2748_v10, %v6029_v61  ;;  %v2763_v17 = vmul.f32 %v2748_v10, %v6030_v59  ;;  %v2764_v26 = vmul.f32 %v2748_v10, %v6031_v55  ;;  %v3747_v55 = vld [vmem:[%s5514_s6 + $0xf8] sm:$0xff]  }
 0x485   :  { %v2765_v7 = vadd.f32 %v2749_v39, %v2725_v33  ;;  %v2766_v62 = vadd.f32 %v2750_v14, %v2726_v22  ;;  %v2767_v16 = vadd.f32 %v2751_v31, %v2727_v46  ;;  %v2768_v44 = vadd.f32 %v2752_v19, %v2728_v36  ;;  %3592 = vmatprep.subr.bf16.mxu0 %v3747_v55 }
 0x486   :  { %v2769_v43 = vadd.f32 %v2753_v3, %v2729_v29  ;;  %v2770_v56 = vadd.f32 %v2754_v5, %v2730_v37  ;;  %v2771_v48 = vadd.f32 %v2755_v53, %v2731_v4  ;;  %v2772_v60 = vadd.f32 %v2756_v6, %v2732_v8  ;;  %v6032_v29 = vld [vmem:[#allocation3_spill] sm:$0xff]  ;;  %v6033_v3 = vld [vmem:[#allocation92_spill] sm:$0xff] }
 0x487   :  { %v2773_v54 = vadd.f32 %v2757_v30, %v2733_v63  ;;  %v2774_v45 = vadd.f32 %v2758_v13, %v2734_v11  ;;  %v2775_v52 = vadd.f32 %v2759_v50, %v2735_v24  ;;  %v2776_v32 = vadd.f32 %v2760_v40, %v2736_v9 }
 0x488   :  { %v2777_v58 = vadd.f32 %v2761_v20, %v2737_v51  ;;  %v2778_v18 = vadd.f32 %v2762_v21, %v2738_v49  ;;  %v2779_v2 = vadd.f32 %v2763_v17, %v2739_v23  ;;  %v2780_v57 = vadd.f32 %v2764_v26, %v2740_v0  ;;  %v3748_v26 = vld [vmem:[%s5514_s6 + $0xb8] sm:$0xff]  }
 0x489   :  { %v2782_v41 = vcombine.high %v2765_v7, %v2767_v16  ;;  %v2798_v28 = vcombine.high %v2766_v62, %v2768_v44  ;;  %v2814_v25 = vcombine.high %v2769_v43, %v2771_v48  ;;  %v2830_v10 = vcombine.high %v2770_v56, %v2772_v60  ;;  %3593 = vmatpush3.bf16.msra.mxu0 %v3748_v26 }
 0x48a   :  { %v2918_v33 = vcombine.high %v2773_v54, %v2775_v52  ;;  %v2934_v22 = vcombine.high %v2774_v45, %v2776_v32  ;;  %v2950_v46 = vcombine.high %v2777_v58, %v2779_v2  ;;  %v2966_v36 = vcombine.high %v2778_v18, %v2780_v57 }
 0x48b   :  { %v2796_v37 = vrot.slane %v2782_v41, %v6032_v29  ;;  %v2812_v4 = vrot.slane %v2798_v28, %v6032_v29  ;;  %v2828_v8 = vrot.slane %v2814_v25, %v6032_v29  ;;  %v2844_v63 = vrot.slane %v2830_v10, %v6032_v29  ;;  %v3749_v41 = vld [vmem:[%s5514_s6 + $0x100] sm:$0xff]  }
 0x48c   :  { %v2932_v11 = vrot.slane %v2918_v33, %v6032_v29  ;;  %v2948_v24 = vrot.slane %v2934_v22, %v6032_v29  ;;  %v2964_v9 = vrot.slane %v2950_v46, %v6032_v29  ;;  %v2980_v51 = vrot.slane %v2966_v36, %v6032_v29  ;;  %v3750_v28 = vld [vmem:[%s5514_s6 + $0xc0] sm:$0xff]   ;;  %3594 = vmatprep.subr.bf16.mxu0 %v3749_v41 }
 0x48d   :  { %v2861_v49 = vcombine.low %v2796_v37, %v2812_v4  ;;  %v2893_v23 = vcombine.low %v2828_v8, %v2844_v63  ;;  %v2781_v0 = vcombine.low %v2765_v7, %v2767_v16  ;;  %v2797_v39 = vcombine.low %v2766_v62, %v2768_v44  ;;  %3595 = vmatpush3.bf16.msra.mxu0 %v3750_v28 }
 0x48e   :  { %v2997_v14 = vcombine.low %v2932_v11, %v2948_v24  ;;  %v3029_v31 = vcombine.low %v2964_v9, %v2980_v51  ;;  %v2813_v19 = vcombine.low %v2769_v43, %v2771_v48  ;;  %v2829_v15 = vcombine.low %v2770_v56, %v2772_v60 }
 0x48f   :  { %v5407_v34 = vrot.slane %v2861_v49, %v6033_v3  ;;  %v5410_v5 = vrot.slane %v2893_v23, %v6033_v3  ;;  %v2789_v38 = vrot.slane %v2781_v0, %v6032_v29  ;;  %v2805_v53 = vrot.slane %v2797_v39, %v6032_v29 }
 0x490   :  { %v5415_v12 = vrot.slane %v2997_v14, %v6033_v3  ;;  %v5418_v6 = vrot.slane %v3029_v31, %v6033_v3  ;;  %v2821_v35 = vrot.slane %v2813_v19, %v6032_v29  ;;  %v2837_v30 = vrot.slane %v2829_v15, %v6032_v29  ;;  %v3751_v31 = vld [vmem:[%s5514_s6 + $0x108] sm:$0xff]  }
 0x491   :  { %v2914_v47 = vcombine.high %v5407_v34, %v5410_v5  ;;  %v2845_v13 = vcombine.low %v2789_v38, %v2805_v53  ;;  %v2917_v1 = vcombine.low %v2773_v54, %v2775_v52  ;;  %v2933_v50 = vcombine.low %v2774_v45, %v2776_v32  ;;  %v3752_v19 = vld [vmem:[%s5514_s6 + $0xc8] sm:$0xff]   ;;  %3596 = vmatprep.subr.bf16.mxu0 %v3751_v31 }
 0x492   :  { %v3050_v42 = vcombine.high %v5415_v12, %v5418_v6  ;;  %v2877_v40 = vcombine.low %v2821_v35, %v2837_v30  ;;  %v2949_v27 = vcombine.low %v2777_v58, %v2779_v2  ;;  %v2965_v20 = vcombine.low %v2778_v18, %v2780_v57  ;;  %3597 = vmatpush3.bf16.msra.mxu0 %v3752_v19 }
 0x493   :  { %v5427_v61 = vrot.slane %v2845_v13, %v6033_v3  ;;  %v2925_v21 = vrot.slane %v2917_v1, %v6032_v29  ;;  %v2941_v59 = vrot.slane %v2933_v50, %v6032_v29  ;;  %v2862_v17 = vcombine.high %v2796_v37, %v2812_v4 }
 0x494   :  { %v3686_v7 = vpack.i.bf16 %v3050_v42, %v2914_v47  ;;  %v5438_v62 = vrot.slane %v2877_v40, %v6033_v3  ;;  %v2957_v16 = vrot.slane %v2949_v27, %v6032_v29  ;;  %v2973_v44 = vrot.slane %v2965_v20, %v6032_v29 }
 0x495   :  { %v2981_v43 = vcombine.low %v2925_v21, %v2941_v59  ;;  %v2876_v56 = vrot.slane %v2862_v17, %v6033_v3  ;;  %v2894_v48 = vcombine.high %v2828_v8, %v2844_v63  ;;  %v2998_v60 = vcombine.high %v2932_v11, %v2948_v24 }
 0x496   :  { %3687 = vrot.lane.b32.xlu0 %v3686_v7, %s3771_s11  ;;  %v2910_v54 = vcombine.high %v5427_v61, %v5438_v62  ;;  %v3013_v45 = vcombine.low %v2957_v16, %v2973_v44  ;;  %v3030_v52 = vcombine.high %v2964_v9, %v2980_v51  ;;  %v2846_v32 = vcombine.high %v2789_v38, %v2805_v53 }
 0x497   :  { %v5447_v58 = vrot.slane %v2981_v43, %v6033_v3  ;;  %v2908_v18 = vrot.slane %v2894_v48, %v6033_v3  ;;  %v3012_v2 = vrot.slane %v2998_v60, %v6033_v3  ;;  %v2878_v57 = vcombine.high %v2821_v35, %v2837_v30 }
 0x498   :  { %v3021_v25 = vrot.slane %v3013_v45, %v6033_v3  ;;  %v3044_v10 = vrot.slane %v3030_v52, %v6033_v3  ;;  %v2860_v33 = vrot.slane %v2846_v32, %v6033_v3  ;;  %v2982_v22 = vcombine.high %v2925_v21, %v2941_v59 }
 0x499   :  { %v2915_v46 = vcombine.low %v2876_v56, %v2908_v18  ;;  %v2892_v36 = vrot.slane %v2878_v57, %v6033_v3  ;;  %v3014_v29 = vcombine.high %v2957_v16, %v2973_v44  ;;  %v2916_v37 = vcombine.high %v2876_v56, %v2908_v18 }
 0x49a   :  { %v3046_v4 = vcombine.high %v5447_v58, %v3021_v25  ;;  %v3051_v8 = vcombine.low %v3012_v2, %v3044_v10  ;;  %v2996_v63 = vrot.slane %v2982_v22, %v6033_v3  ;;  %v3052_v11 = vcombine.high %v3012_v2, %v3044_v10 }
 0x49b   :  { %v2911_v24 = vcombine.low %v2860_v33, %v2892_v36  ;;  %v3028_v9 = vrot.slane %v3014_v29, %v6033_v3  ;;  %v2912_v51 = vcombine.high %v2860_v33, %v2892_v36  ;;  %v3049_v49 = vcombine.low %v5415_v12, %v5418_v6  ;;  %v3533_v36 = vld [vmem:[%s5517_s7 + $0x1] ss:$0 sm:$0xff] }
 0x49c   :  { %v3691_v23 = vpack.i.bf16 %v3046_v4, %v2910_v54  ;;  %v3696_v0 = vpack.i.bf16 %v3051_v8, %v2915_v46  ;;  %v3706_v39 = vpack.i.bf16 %v3052_v11, %v2916_v37  ;;  %v2913_v14 = vcombine.low %v5407_v34, %v5410_v5 }
 0x49d   :  { %v3047_v15 = vcombine.low %v2996_v63, %v3028_v9  ;;  %v3048_v3 = vcombine.high %v2996_v63, %v3028_v9  ;;  %v3045_v38 = vcombine.low %v5447_v58, %v3021_v25  ;;  %v2909_v53 = vcombine.low %v5427_v61, %v5438_v62  ;;  %v6034_v9 = vld [vmem:[#allocation12_spill] sm:$0xff] }
 0x49e   :  { %3692 = vrot.lane.b32.xlu1 %v3691_v23, %s3771_s11  ;;  %3697 = vrot.lane.b32.xlu0 %v3696_v0, %s3772_s12  ;;  %v15_v25 = vstv %s5518_s9  ;;  %v6035_v23 = vld [vmem:[#allocation13_spill] sm:$0xff] }
 0x49f   :  { %v3701_v34 = vpack.i.bf16 %v3047_v15, %v2911_v24  ;;  %v3711_v5 = vpack.i.bf16 %v3048_v3, %v2912_v51  ;;  %16 = vst [vmem:[#allocation2] sm:$0x1] %v15_v25 }
 0x4a2   :  { %3702 = vrot.lane.b32.xlu1 %v3701_v34, %s3772_s12  ;;  %3707 = vrot.lane.b32.xlu0 %v3706_v39, %s3773_s13 }
 0x4a6   :  { %3712 = vrot.lane.b32.xlu1 %v3711_v5, %s3773_s13 }
 0x508   :  { %v3688_v12 = vpop.permute.xlu0 %3687 }
 0x509   :  { %v3690_v6 = vunpack.i.h.bf16 %v3688_v12  ;;  %v3689_v35 = vunpack.i.l.bf16 %v3688_v12 }
 0x50b   :  { %v3108_v50 = vsel %vm2217_vm5, %v3049_v49, %v3690_v6  ;;  %v3107_v42 = vsel %vm2217_vm5, %v2913_v14, %v3689_v35 }
 0x510   :  { %v3693_v30 = vpop.permute.xlu1 %3692  ;;  %v3698_v47 = vpop.permute.xlu0 %3697 }
 0x511   :  { %v3700_v13 = vunpack.i.h.bf16 %v3698_v47  ;;  %v3699_v1 = vunpack.i.l.bf16 %v3698_v47  ;;  %v3695_v20 = vunpack.i.h.bf16 %v3693_v30  ;;  %v3694_v61 = vunpack.i.l.bf16 %v3693_v30 }
 0x513   :  { %v3109_v17 = vsel %vm2220_vm10, %v3107_v42, %v3699_v1  ;;  %v3110_v55 = vsel %vm2220_vm10, %v3108_v50, %v3700_v13  ;;  %v3102_v56 = vsel %vm2217_vm5, %v3045_v38, %v3695_v20  ;;  %v3101_v48 = vsel %vm2217_vm5, %v2909_v53, %v3694_v61  ;;  %v3534_v1 = vld [vmem:[%s5519_s8] ss:$0 sm:$0xff] }
 0x514   :  { %v3703_v40 = vpop.permute.xlu1 %3702  ;;  %v3708_v27 = vpop.permute.xlu0 %3707  ;;  %v3535_v61 = vld [vmem:[#allocation2] ss:$0 sm:$0xff] }
 0x515   :  { %v3710_v21 = vunpack.i.h.bf16 %v3708_v27  ;;  %v3709_v59 = vunpack.i.l.bf16 %v3708_v27  ;;  %v3705_v26 = vunpack.i.h.bf16 %v3703_v40  ;;  %v3704_v7 = vunpack.i.l.bf16 %v3703_v40 }
 0x517   :  { %v3111_v62 = vsel %vm2223_vm13, %v3109_v17, %v3709_v59  ;;  %v3112_v16 = vsel %vm2223_vm13, %v3110_v55, %v3710_v21  ;;  %v3103_v45 = vsel %vm2220_vm10, %v3101_v48, %v3704_v7  ;;  %v3104_v52 = vsel %vm2220_vm10, %v3102_v56, %v3705_v26 }
 0x518   :  { %v3713_v44 = vpop.permute.xlu1 %3712  ;;  %v3114_v43 = vpack.c.bf16 %v3112_v16, %v3111_v62 }
 0x519   :  { %v3715_v60 = vunpack.i.h.bf16 %v3713_v44  ;;  %v3714_v54 = vunpack.i.l.bf16 %v3713_v44 }
 0x51a   :  { %3296 = vmatprep.mubr.bf16.mxu0 %v3114_v43 }
 0x51b   :  { %v3105_v32 = vsel %vm2223_vm13, %v3103_v45, %v3714_v54  ;;  %v3106_v58 = vsel %vm2223_vm13, %v3104_v52, %v3715_v60 }
 0x51c   :  { %v3113_v18 = vpack.c.bf16 %v3106_v58, %v3105_v32 }
 0x51e   :  { %3297 = vmatmul.mubr.bf16.vlgmr.msra.gmra.mrb[8].mxu0 %v3113_v18 }
 0x520   :  { %v3339_v2 = vpop.f32.mrb[20].mxu1 }
 0x521   :  { %v3645_v57 = vpop.f32.mrb[21].mxu1 }
 0x522   :  { %v3342_v41 = vpop.f32.mrb[22].mxu1 }
 0x523   :  { %v3646_v28 = vpop.f32.mrb[23].mxu1 }
 0x5f1   :  { %v3598_v10 = vpop.f32.mrb[8].mxu0 }
 0x5f2   :  { %v3599_v33 = vpop.f32.mrb[9].mxu0 }
 0x5f3   :  { %v3600_v22 = vadd.f32 %v3599_v33, %v3598_v10  ;;  %v3601_v46 = vpop.f32.mrb[10].mxu0 }
 0x5f4   :  { %v3602_v29 = vpop.f32.mrb[11].mxu0 }
 0x5f5   :  { %v3340_v37 = vadd.f32 %v3600_v22, %v3339_v2  ;;  %v3603_v4 = vadd.f32 %v3602_v29, %v3601_v46 }
 0x5f7   :  { %v3354_v8 = vadd.f32 %v3533_v36, %v3340_v37  ;;  %v3343_v63 = vadd.f32 %v3603_v4, %v3342_v41 }
 0x5f9   :  { %3757 = vtanh.f32 %v3354_v8  ;;  %v3355_v11 = vadd.f32 %v3533_v36, %v3343_v63 }
 0x5fb   :  { %3759 = vtanh.f32 %v3355_v11 }
 0x603   :  { %v3758_v24 = vpop.eup %3757 }
 0x604   :  { %v3358_v51 = vmul.f32 %v3758_v24, %v6034_v9 }
 0x605   :  { %v3760_v49 = vpop.eup %3759 }
 0x606   :  { %v3359_v0 = vmul.f32 %v3760_v49, %v6035_v23  ;;  %v3360_v39 = vsel %vm2217_vm5, %v3358_v51, 0.0 }
 0x607   :  { %v3361_v14 = vrot.slane %v3360_v39, 4 }
 0x608   :  { %v3367_v31 = vsel %vm2217_vm5, %v3359_v0, 0.0 }
 0x609   :  { %v3362_v19 = vadd.f32 %v3361_v14, %v3360_v39  ;;  %v3368_v15 = vrot.slane %v3367_v31, 4 }
 0x60b   :  { %v3363_v3 = vrot.slane %v3362_v19, 2  ;;  %v3369_v38 = vadd.f32 %v3368_v15, %v3367_v31 }
 0x60d   :  { %v3364_v53 = vadd.f32 %v3363_v3, %v3362_v19  ;;  %v3370_v34 = vrot.slane %v3369_v38, 2 }
 0x60f   :  { %v3365_v5 = vrot.slane %v3364_v53, 1  ;;  %v3371_v12 = vadd.f32 %v3370_v34, %v3369_v38 }
 0x611   :  { %v3366_v6 = vadd.f32 %v3365_v5, %v3364_v53  ;;  %v3372_v35 = vrot.slane %v3371_v12, 1 }
 0x613   :  { %v3373_v30 = vadd.f32 %v3372_v35, %v3371_v12  ;;  %v3375_v47 = vmul.f32 0.125, %v3366_v6 }
 0x615   :  { %v3376_v13 = vmul.f32 0.125, %v3373_v30  ;;  %v3384_v42 = vmul.f32 %v3534_v1, %v3375_v47 }
 0x617   :  { %v3385_v50 = vmul.f32 %v3534_v1, %v3376_v13 }
 0x619   :  { %v3388_v40 = vrot.slane %v3385_v50, 7 }
 0x61b   :  { %v3390_v27 = vsel %vm3389_vm4, %v3388_v40, %v3384_v42 }
 0x61c   :  { %v3393_v20 = vsel %vm3392_vm14, %v3390_v27, 0.0 }
 0x61d   :  { %3394 = vadd.xlane.f32.xlu0 %v3393_v20 }
 0x6aa   :  { %v3395_v21 = vpop.xlane.xlu0 %3394 }
 0x6ab   :  { %v3403_v59 = vadd.f32 %v3535_v61, %v3395_v21 }
 0x6ad   :  { %v3536_v17 = vmul.f32 -1.442695, %v3403_v59 }
 0x6af   :  { %3761 = vpow2.f32 %v3536_v17 }
 0x6b9   :  { %v3762_v55 = vpop.eup %3761 }
 0x6ba   :  { %v3407_v26 = vadd.f32 1.0, %v3762_v55 }
 0x6bc   :  { %3763 = vrcp.f32 %v3407_v26 }
 0x6c6   :  { %v3764_v7 = vpop.eup %3763 }
 0x6c7   :  { %3411 = vst.msk [vmem:[%s5520_s10] sm:$0x3] %vm3410_vm15, %v3764_v7 }

</bundles_post_ra>
